<compile_context>
chip_gen: v7x
topology: tpu7x:2x2x1
jax: 0.10.0
libtpu: 0.0.40
codegen_flags: <defaults>
</compile_context>

<pallas_src>
import jax
import jax.numpy as jnp
from jax.experimental import pallas as pl
from jax.experimental.pallas import tpu as pltpu


# ------------------------------ fused kernel ------------------------------- #

def _fused_forward_kernel(x_ref, t1_ref, b1_ref, t2_ref, b2_ref,
                          wfc_hbm, bfc_ref, wa1_ref, ba1_ref, wa2_ref, ba2_ref,
                          out_ref,
                          x1s, h1s, x2s, h2s, wfc_vmem, fc_sem):
    """Whole forward pass; all intermediates stay in VMEM.

    x_ref  : [H*B, W*Cin]            obs, batch-minor rows (row = h*B + b)
    t1_ref : [KH*W*Cin,  OW1*C1]     conv1 banded block-Toeplitz, concatenated along K (bf16)
    t2_ref : [KH*OW1*C1, OW2*C2]     conv2 likewise (bf16)
    wfc_hbm: [OH2*W2C, feat]         encoder fc weight, left in HBM (manual overlapped DMA, bf16)
    b*_ref : [1, N] bias rows (conv biases pre-tiled across the output width, f32)
    """
    WC = x_ref.shape[1]                 # W*Cin
    M1, K1 = x1s.shape                  # (B*OH1, KH*W*Cin)
    KH = K1 // WC
    W1C = h1s.shape[1]                  # OW1*C1
    M2 = x2s.shape[0]                   # B*OH2
    W2C = h2s.shape[1]                  # OW2*C2
    B = out_ref.shape[0]
    OH2 = M2 // B
    feat = bfc_ref.shape[1]

    # Kick off the big fc_w HBM->VMEM copy now; it completes under the conv compute.
    fc_cp = pltpu.make_async_copy(wfc_hbm, wfc_vmem, fc_sem)
    fc_cp.start()

    # ---- conv1 + ReLU: KH contiguous block copies build the batched im2col-along-H slab,
    #      then ONE GEMM for the whole batch (rows are (oh, b) batch-minor). ----
    for kh in range(KH):
        x1s[:, kh * WC:(kh + 1) * WC] = x_ref[kh * B:kh * B + M1, :]
    a1 = jnp.dot(x1s[...].astype(jnp.bfloat16), t1_ref[...],
                 preferred_element_type=jnp.float32)
    h1s[...] = jnp.maximum(a1 + b1_ref[...], 0.0)           # [B*OH1, OW1*C1], stays in VMEM

    # ---- conv2 + ReLU (same scheme; sources stay contiguous thanks to batch-minor rows) ----
    for kh in range(KH):
        x2s[:, kh * W1C:(kh + 1) * W1C] = h1s[kh * B:kh * B + M2, :]
    a2 = jnp.dot(x2s[...].astype(jnp.bfloat16), t2_ref[...],
                 preferred_element_type=jnp.float32)
    h2s[...] = jnp.maximum(a2 + b2_ref[...], 0.0)            # [B*OH2, OW2*C2]

    # ---- encoder Linear + ReLU, with the NHWC flatten folded into the contraction:
    #      out[b,:] = sum_r h2[b,r,:] @ fc_w[r*W2C:(r+1)*W2C, :]  (no f_scr, no row stores) ----
    fc_cp.wait()
    accf = jnp.broadcast_to(bfc_ref[...], (B, feat))          # single broadcast, bias folded in
    for r in range(OH2):
        lhs = h2s[r * B:(r + 1) * B, :].astype(jnp.bfloat16)  # contiguous [B, W2C] slice
        accf = accf + jnp.dot(lhs, wfc_vmem[r * W2C:(r + 1) * W2C, :],
                              preferred_element_type=jnp.float32)
    h = jnp.maximum(accf, 0.0)

    # ---- actor MLP head (tiny; kept fully f32 for numerics) ----
    h = jnp.maximum(jnp.dot(h, wa1_ref[...], preferred_element_type=jnp.float32)
                    + ba1_ref[...], 0.0)
    out_ref[...] = jnp.tanh(jnp.dot(h, wa2_ref[...], preferred_element_type=jnp.float32)
                            + ba2_ref[...])


# ------------------------------ host wrapper -------------------------------- #

def export_model_forward(obs_nchw, p):
    """ExportModel.forward: actor(encoder(obs)) -> deterministic actions."""
    B, Cin, H, W = obs_nchw.shape
    # NCHW -> [H, B, W, Cin] -> [H*B, W*Cin]: batch-minor row ordering makes every in-kernel
    # im2col copy and FC row-slice a contiguous block (tiny XLA layout op on the 8 KB obs).
    x2 = jnp.transpose(obs_nchw, (2, 0, 3, 1)).reshape(H * B, W * Cin)

    KH = p["t1c"].shape[0] // (W * Cin)
    OH1 = H - KH + 1
    OH2 = OH1 - KH + 1
    W1C = p["t1c"].shape[1]
    W2C = p["t2c"].shape[1]
    flat, feat = p["fc_w"].shape
    hid = p["actor1_w"].shape[1]
    act = p["actor2_w"].shape[1]

    operands = (x2, p["t1c"], p["b1r"], p["t2c"], p["b2r"],
                p["fc_w"], p["bfcr"], p["actor1_w"], p["ba1r"],
                p["actor2_w"], p["ba2r"])

    flops = 2 * (B * OH1 * (KH * W * Cin) * W1C
                 + B * OH2 * (KH * W1C) * W2C
                 + B * flat * feat + B * feat * hid + B * hid * act)
    bytes_accessed = sum(o.size * o.dtype.itemsize for o in operands) + B * act * 4

    vmem = pltpu.MemorySpace.VMEM
    in_specs = [pl.BlockSpec(memory_space=vmem)] * len(operands)
    in_specs[5] = pl.BlockSpec(memory_space=pl.ANY)   # fc_w: manual DMA overlapped with convs

    # NOTE: if this forward is ever run at larger batch, add a grid axis over B marked
    # "parallel" (shards across v7x's 2 TensorCores) and tile M; at B=2 the kernel is
    # weight-DMA-bound, so a single invocation is optimal.  For steady-state serving the
    # repacked weights can additionally be pinned VMEM-resident across calls
    # (pltpu.with_memory_space_constraint) to remove the per-call weight DMA entirely.
    return pl.pallas_call(
        _fused_forward_kernel,
        out_shape=jax.ShapeDtypeStruct((B, act), jnp.float32),
        in_specs=in_specs,
        out_specs=pl.BlockSpec(memory_space=vmem),
        scratch_shapes=[
            pltpu.VMEM((B * OH1, KH * W * Cin), jnp.float32),   # conv1 im2col slab
            pltpu.VMEM((B * OH1, W1C), jnp.float32),            # conv1 activations
            pltpu.VMEM((B * OH2, KH * W1C), jnp.float32),       # conv2 im2col slab
            pltpu.VMEM((B * OH2, W2C), jnp.float32),            # conv2 activations
            pltpu.VMEM((flat, feat), jnp.bfloat16),             # fc_w landing buffer
            pltpu.SemaphoreType.DMA(()),                        # fc_w DMA completion
        ],
        cost_estimate=pl.CostEstimate(flops=flops, transcendentals=B * act,
                                      bytes_accessed=bytes_accessed),
    )(*operands)


# ----------------------- parameter construction / prep ---------------------- #

def init_params(key, cin=4, hw=16, feat=64, hidden=64, act_dim=6):
    c1, c2, k = 16, 32, 3
    flat = (hw - 2 * (k - 1)) ** 2 * c2
    ks = jax.random.split(key, 5)

    def w(kk, shape, scale):
        return (scale * jax.random.normal(kk, shape)).astype(jnp.float32)

    return dict(
        conv1_w=w(ks[0], (k, k, cin, c1), 0.10), conv1_b=jnp.zeros((c1,), jnp.float32),
        conv2_w=w(ks[1], (k, k, c1, c2), 0.05), conv2_b=jnp.zeros((c2,), jnp.float32),
        fc_w=w(ks[2], (flat, feat), 0.02),      fc_b=jnp.zeros((feat,), jnp.float32),
        actor1_w=w(ks[3], (feat, hidden), 0.10), actor1_b=jnp.zeros((hidden,), jnp.float32),
        actor2_w=w(ks[4], (hidden, act_dim), 0.10), actor2_b=jnp.zeros((act_dim,), jnp.float32),
    )


def _toeplitz_conv_weight(w_hwio, out_w):
    """[KH,KW,Cin,Cout] -> [KH, (out_w+KW-1)*Cin, out_w*Cout] banded block-Toeplitz.

    T[kh][w*Cin+ci, ow*Cout+co] = w[kh, w-ow, ci, co] if 0 <= w-ow < KW else 0, so that
    a valid stride-1 conv becomes  H[oh, ow*Cout+co] = sum_kh (X2[kh+oh, :] @ T[kh]).
    """
    KH, KW, Cin, Cout = w_hwio.shape
    in_w = out_w + KW - 1
    wp = jnp.arange(in_w)[:, None]
    ow = jnp.arange(out_w)[None, :]
    kw_idx = wp - ow
    valid = ((kw_idx >= 0) & (kw_idx < KW)).astype(w_hwio.dtype)
    kw_safe = jnp.clip(kw_idx, 0, KW - 1)
    mats = []
    for kh in range(KH):
        blk = w_hwio[kh][kw_safe] * valid[:, :, None, None]      # [in_w, out_w, Cin, Cout]
        mats.append(jnp.transpose(blk, (0, 2, 1, 3)).reshape(in_w * Cin, out_w * Cout))
    return jnp.stack(mats, axis=0)


def prepare_params(p, hw):
    """One-time (outside jit) repack of the synthetic weights into kernel layout.

    Flatten order is NHWC (same as the reference below); porting real PyTorch (NCHW-flatten)
    weights would just need a one-time host-side row permutation of fc_w here.
    """
    kh1 = p["conv1_w"].shape[0]
    kh2 = p["conv2_w"].shape[0]
    ow1 = hw - kh1 + 1
    ow2 = ow1 - kh2 + 1
    t1 = _toeplitz_conv_weight(p["conv1_w"], ow1)      # [KH, W*Cin,  OW1*C1]
    t2 = _toeplitz_conv_weight(p["conv2_w"], ow2)      # [KH, OW1*C1, OW2*C2]
    return dict(
        # Big matrices in bf16 (halves weight DMA, single-pass MXU); f32 accumulation in-kernel.
        t1c=t1.reshape(-1, t1.shape[-1]).astype(jnp.bfloat16),
        t2c=t2.reshape(-1, t2.shape[-1]).astype(jnp.bfloat16),
        fc_w=p["fc_w"].astype(jnp.bfloat16),
        # Biases and the tiny actor head stay f32.
        b1r=jnp.tile(p["conv1_b"], ow1)[None, :],
        b2r=jnp.tile(p["conv2_b"], ow2)[None, :],
        bfcr=p["fc_b"][None, :],
        actor1_w=p["actor1_w"], ba1r=p["actor1_b"][None, :],
        actor2_w=p["actor2_w"], ba2r=p["actor2_b"][None, :],
    )


# ------------------------------ reference path ------------------------------ #

def reference_forward(obs_nchw, p):
    """Pure-JAX reference (mirrors the PyTorch forward semantics), full-precision."""
    hp = jax.lax.Precision.HIGHEST
    x = jnp.transpose(obs_nchw, (0, 2, 3, 1))
    x = jax.lax.conv_general_dilated(x, p["conv1_w"], (1, 1), "VALID",
                                     dimension_numbers=("NHWC", "HWIO", "NHWC"),
                                     precision=hp)
    x = jnp.maximum(x + p["conv1_b"], 0.0)
    x = jax.lax.conv_general_dilated(x, p["conv2_w"], (1, 1), "VALID",
                                     dimension_numbers=("NHWC", "HWIO", "NHWC"),
                                     precision=hp)
    x = jnp.maximum(x + p["conv2_b"], 0.0)
    f = x.reshape(x.shape[0], -1)
    h = jnp.maximum(jnp.dot(f, p["fc_w"], precision=hp) + p["fc_b"], 0.0)
    h = jnp.maximum(jnp.dot(h, p["actor1_w"], precision=hp) + p["actor1_b"], 0.0)
    return jnp.tanh(jnp.dot(h, p["actor2_w"], precision=hp) + p["actor2_b"])


if __name__ == "__main__":
    key = jax.random.PRNGKey(0)
    k_obs, k_params = jax.random.split(key)
    obs = jax.random.normal(k_obs, (2, 4, 16, 16), dtype=jnp.float32)  # NCHW, like PyTorch
    params = init_params(k_params)
    prepared = prepare_params(params, hw=obs.shape[-1])    # one-time host-side weight repack

    fwd = jax.jit(export_model_forward)
    actions = jax.block_until_ready(fwd(obs, prepared))

    ref = reference_forward(obs, params)
    assert actions.shape == (2, 6), actions.shape
    err = float(jnp.max(jnp.abs(actions - ref)))
    assert jnp.allclose(actions, ref, atol=5e-3, rtol=5e-3), err
    print("KERNEL_OK")
</pallas_src>

<mosaic_0001>
module attributes {stable_mosaic.version = 11 : i64} {
  func.func @_fused_forward_kernel(%arg0: memref<32x64xf32, #tpu.memory_space<vmem>>, %arg1: memref<192x224xbf16, #tpu.memory_space<vmem>>, %arg2: memref<1x224xf32, #tpu.memory_space<vmem>>, %arg3: memref<672x384xbf16, #tpu.memory_space<vmem>>, %arg4: memref<1x384xf32, #tpu.memory_space<vmem>>, %arg5: memref<4608x64xbf16, #tpu.memory_space<any>>, %arg6: memref<1x64xf32, #tpu.memory_space<vmem>>, %arg7: memref<64x64xf32, #tpu.memory_space<vmem>>, %arg8: memref<1x64xf32, #tpu.memory_space<vmem>>, %arg9: memref<64x6xf32, #tpu.memory_space<vmem>>, %arg10: memref<1x6xf32, #tpu.memory_space<vmem>>, %arg11: memref<2x6xf32, #tpu.memory_space<vmem>>, %arg12: memref<28x192xf32, #tpu.memory_space<vmem>>, %arg13: memref<28x224xf32, #tpu.memory_space<vmem>>, %arg14: memref<24x672xf32, #tpu.memory_space<vmem>>, %arg15: memref<24x384xf32, #tpu.memory_space<vmem>>, %arg16: memref<4608x64xbf16, #tpu.memory_space<vmem>>, %arg17: memref<!tpu.dma_semaphore, #tpu.memory_space<semaphore_mem>>) attributes {dimension_semantics = [], scalar_prefetch = 0 : i64, scratch_operands = 6 : i64, tpu.core_type = #tpu.core_type<tc>} {
    tpu.enqueue_dma source(%arg5 : memref<4608x64xbf16, #tpu.memory_space<any>>) target(%arg16 : memref<4608x64xbf16, #tpu.memory_space<vmem>>) target_semaphore(%arg17 : memref<!tpu.dma_semaphore, #tpu.memory_space<semaphore_mem>>)
    %c0 = arith.constant 0 : index
    %c0_0 = arith.constant 0 : index
    %0 = vector.load %arg0[%c0, %c0_0] : memref<32x64xf32, #tpu.memory_space<vmem>>, vector<28x64xf32>
    %c0_1 = arith.constant 0 : index
    %c0_2 = arith.constant 0 : index
    %1 = vector.load %arg12[%c0_1, %c0_2] : memref<28x192xf32, #tpu.memory_space<vmem>>, vector<28x64xf32>
    tpu.vector_store %arg12[%c0_1, %c0_2], %0 {strides = array<i32>} : memref<28x192xf32, #tpu.memory_space<vmem>>, vector<28x64xf32>,
    %c2 = arith.constant 2 : index
    %c0_3 = arith.constant 0 : index
    %2 = vector.load %arg0[%c2, %c0_3] : memref<32x64xf32, #tpu.memory_space<vmem>>, vector<28x64xf32>
    %c0_4 = arith.constant 0 : index
    %c64 = arith.constant 64 : index
    %3 = vector.load %arg12[%c0_4, %c64] : memref<28x192xf32, #tpu.memory_space<vmem>>, vector<28x64xf32>
    tpu.vector_store %arg12[%c0_4, %c64], %2 {strides = array<i32>} : memref<28x192xf32, #tpu.memory_space<vmem>>, vector<28x64xf32>,
    %c4 = arith.constant 4 : index
    %c0_5 = arith.constant 0 : index
    %4 = vector.load %arg0[%c4, %c0_5] : memref<32x64xf32, #tpu.memory_space<vmem>>, vector<28x64xf32>
    %c0_6 = arith.constant 0 : index
    %c128 = arith.constant 128 : index
    %5 = vector.load %arg12[%c0_6, %c128] : memref<28x192xf32, #tpu.memory_space<vmem>>, vector<28x64xf32>
    tpu.vector_store %arg12[%c0_6, %c128], %4 {strides = array<i32>} : memref<28x192xf32, #tpu.memory_space<vmem>>, vector<28x64xf32>,
    %c0_7 = arith.constant 0 : index
    %c0_8 = arith.constant 0 : index
    %6 = vector.load %arg12[%c0_7, %c0_8] : memref<28x192xf32, #tpu.memory_space<vmem>>, vector<28x192xf32>
    %7 = arith.truncf %6 : vector<28x192xf32> to vector<28x192xbf16>
    %c0_9 = arith.constant 0 : index
    %c0_10 = arith.constant 0 : index
    %8 = vector.load %arg1[%c0_9, %c0_10] : memref<192x224xbf16, #tpu.memory_space<vmem>>, vector<192x224xbf16>
    %cst = arith.constant dense<0.000000e+00> : vector<28x224xf32>
    %9 = tpu.matmul %7, %8, %cst {dimension_numbers = #tpu.dot_dimension_numbers<[1], [0], [0], [1], [0, 0, 1, 1], [], []>} : vector<28x192xbf16>, vector<192x224xbf16>, vector<28x224xf32> -> vector<28x224xf32>
    %c0_11 = arith.constant 0 : index
    %c0_12 = arith.constant 0 : index
    %10 = vector.load %arg2[%c0_11, %c0_12] : memref<1x224xf32, #tpu.memory_space<vmem>>, vector<1x224xf32>
    %11 = vector.broadcast %10 : vector<1x224xf32> to vector<28x224xf32>
    %12 = arith.addf %9, %11 : vector<28x224xf32>
    %cst_13 = arith.constant 0.000000e+00 : f32
    %13 = vector.broadcast %cst_13 : f32 to vector<28x224xf32>
    %14 = arith.maximumf %12, %13 : vector<28x224xf32>
    %c0_14 = arith.constant 0 : index
    %c0_15 = arith.constant 0 : index
    %15 = vector.load %arg13[%c0_14, %c0_15] : memref<28x224xf32, #tpu.memory_space<vmem>>, vector<28x224xf32>
    tpu.vector_store %arg13[%c0_14, %c0_15], %14 {strides = array<i32>} : memref<28x224xf32, #tpu.memory_space<vmem>>, vector<28x224xf32>,
    %c0_16 = arith.constant 0 : index
    %c0_17 = arith.constant 0 : index
    %16 = vector.load %arg13[%c0_16, %c0_17] : memref<28x224xf32, #tpu.memory_space<vmem>>, vector<24x224xf32>
    %c0_18 = arith.constant 0 : index
    %c0_19 = arith.constant 0 : index
    %17 = vector.load %arg14[%c0_18, %c0_19] : memref<24x672xf32, #tpu.memory_space<vmem>>, vector<24x224xf32>
    tpu.vector_store %arg14[%c0_18, %c0_19], %16 {strides = array<i32>} : memref<24x672xf32, #tpu.memory_space<vmem>>, vector<24x224xf32>,
    %c2_20 = arith.constant 2 : index
    %c0_21 = arith.constant 0 : index
    %18 = vector.load %arg13[%c2_20, %c0_21] : memref<28x224xf32, #tpu.memory_space<vmem>>, vector<24x224xf32>
    %c0_22 = arith.constant 0 : index
    %c224 = arith.constant 224 : index
    %19 = vector.load %arg14[%c0_22, %c224] : memref<24x672xf32, #tpu.memory_space<vmem>>, vector<24x224xf32>
    tpu.vector_store %arg14[%c0_22, %c224], %18 {strides = array<i32>} : memref<24x672xf32, #tpu.memory_space<vmem>>, vector<24x224xf32>,
    %c4_23 = arith.constant 4 : index
    %c0_24 = arith.constant 0 : index
    %20 = vector.load %arg13[%c4_23, %c0_24] : memref<28x224xf32, #tpu.memory_space<vmem>>, vector<24x224xf32>
    %c0_25 = arith.constant 0 : index
    %c448 = arith.constant 448 : index
    %21 = vector.load %arg14[%c0_25, %c448] : memref<24x672xf32, #tpu.memory_space<vmem>>, vector<24x224xf32>
    tpu.vector_store %arg14[%c0_25, %c448], %20 {strides = array<i32>} : memref<24x672xf32, #tpu.memory_space<vmem>>, vector<24x224xf32>,
    %c0_26 = arith.constant 0 : index
    %c0_27 = arith.constant 0 : index
    %22 = vector.load %arg14[%c0_26, %c0_27] : memref<24x672xf32, #tpu.memory_space<vmem>>, vector<24x672xf32>
    %23 = arith.truncf %22 : vector<24x672xf32> to vector<24x672xbf16>
    %c0_28 = arith.constant 0 : index
    %c0_29 = arith.constant 0 : index
    %24 = vector.load %arg3[%c0_28, %c0_29] : memref<672x384xbf16, #tpu.memory_space<vmem>>, vector<672x384xbf16>
    %cst_30 = arith.constant dense<0.000000e+00> : vector<24x384xf32>
    %25 = tpu.matmul %23, %24, %cst_30 {dimension_numbers = #tpu.dot_dimension_numbers<[1], [0], [0], [1], [0, 0, 1, 1], [], []>} : vector<24x672xbf16>, vector<672x384xbf16>, vector<24x384xf32> -> vector<24x384xf32>
    %c0_31 = arith.constant 0 : index
    %c0_32 = arith.constant 0 : index
    %26 = vector.load %arg4[%c0_31, %c0_32] : memref<1x384xf32, #tpu.memory_space<vmem>>, vector<1x384xf32>
    %27 = vector.broadcast %26 : vector<1x384xf32> to vector<24x384xf32>
    %28 = arith.addf %25, %27 : vector<24x384xf32>
    %cst_33 = arith.constant 0.000000e+00 : f32
    %29 = vector.broadcast %cst_33 : f32 to vector<24x384xf32>
    %30 = arith.maximumf %28, %29 : vector<24x384xf32>
    %c0_34 = arith.constant 0 : index
    %c0_35 = arith.constant 0 : index
    %31 = vector.load %arg15[%c0_34, %c0_35] : memref<24x384xf32, #tpu.memory_space<vmem>>, vector<24x384xf32>
    tpu.vector_store %arg15[%c0_34, %c0_35], %30 {strides = array<i32>} : memref<24x384xf32, #tpu.memory_space<vmem>>, vector<24x384xf32>,
    tpu.wait_dma2 semaphore(%arg17 : memref<!tpu.dma_semaphore, #tpu.memory_space<semaphore_mem>>) src(%arg5 : memref<4608x64xbf16, #tpu.memory_space<any>>) dst(%arg16 : memref<4608x64xbf16, #tpu.memory_space<vmem>>)
    %c0_36 = arith.constant 0 : index
    %c0_37 = arith.constant 0 : index
    %32 = vector.load %arg6[%c0_36, %c0_37] : memref<1x64xf32, #tpu.memory_space<vmem>>, vector<1x64xf32>
    %33 = vector.shape_cast %32 : vector<1x64xf32> to vector<1x64xf32>
    %34 = vector.broadcast %33 : vector<1x64xf32> to vector<2x64xf32>
    %c0_38 = arith.constant 0 : index
    %c0_39 = arith.constant 0 : index
    %35 = vector.load %arg15[%c0_38, %c0_39] : memref<24x384xf32, #tpu.memory_space<vmem>>, vector<2x384xf32>
    %36 = arith.truncf %35 : vector<2x384xf32> to vector<2x384xbf16>
    %c0_40 = arith.constant 0 : index
    %c0_41 = arith.constant 0 : index
    %37 = vector.load %arg16[%c0_40, %c0_41] : memref<4608x64xbf16, #tpu.memory_space<vmem>>, vector<384x64xbf16>
    %cst_42 = arith.constant dense<0.000000e+00> : vector<2x64xf32>
    %38 = tpu.matmul %36, %37, %cst_42 {dimension_numbers = #tpu.dot_dimension_numbers<[1], [0], [0], [1], [0, 0, 1, 1], [], []>} : vector<2x384xbf16>, vector<384x64xbf16>, vector<2x64xf32> -> vector<2x64xf32>
    %39 = arith.addf %34, %38 : vector<2x64xf32>
    %c2_43 = arith.constant 2 : index
    %c0_44 = arith.constant 0 : index
    %40 = vector.load %arg15[%c2_43, %c0_44] : memref<24x384xf32, #tpu.memory_space<vmem>>, vector<2x384xf32>
    %41 = arith.truncf %40 : vector<2x384xf32> to vector<2x384xbf16>
    %c384 = arith.constant 384 : index
    %c0_45 = arith.constant 0 : index
    %42 = vector.load %arg16[%c384, %c0_45] : memref<4608x64xbf16, #tpu.memory_space<vmem>>, vector<384x64xbf16>
    %cst_46 = arith.constant dense<0.000000e+00> : vector<2x64xf32>
    %43 = tpu.matmul %41, %42, %cst_46 {dimension_numbers = #tpu.dot_dimension_numbers<[1], [0], [0], [1], [0, 0, 1, 1], [], []>} : vector<2x384xbf16>, vector<384x64xbf16>, vector<2x64xf32> -> vector<2x64xf32>
    %44 = arith.addf %39, %43 : vector<2x64xf32>
    %c4_47 = arith.constant 4 : index
    %c0_48 = arith.constant 0 : index
    %45 = vector.load %arg15[%c4_47, %c0_48] : memref<24x384xf32, #tpu.memory_space<vmem>>, vector<2x384xf32>
    %46 = arith.truncf %45 : vector<2x384xf32> to vector<2x384xbf16>
    %c768 = arith.constant 768 : index
    %c0_49 = arith.constant 0 : index
    %47 = vector.load %arg16[%c768, %c0_49] : memref<4608x64xbf16, #tpu.memory_space<vmem>>, vector<384x64xbf16>
    %cst_50 = arith.constant dense<0.000000e+00> : vector<2x64xf32>
    %48 = tpu.matmul %46, %47, %cst_50 {dimension_numbers = #tpu.dot_dimension_numbers<[1], [0], [0], [1], [0, 0, 1, 1], [], []>} : vector<2x384xbf16>, vector<384x64xbf16>, vector<2x64xf32> -> vector<2x64xf32>
    %49 = arith.addf %44, %48 : vector<2x64xf32>
    %c6 = arith.constant 6 : index
    %c0_51 = arith.constant 0 : index
    %50 = vector.load %arg15[%c6, %c0_51] : memref<24x384xf32, #tpu.memory_space<vmem>>, vector<2x384xf32>
    %51 = arith.truncf %50 : vector<2x384xf32> to vector<2x384xbf16>
    %c1152 = arith.constant 1152 : index
    %c0_52 = arith.constant 0 : index
    %52 = vector.load %arg16[%c1152, %c0_52] : memref<4608x64xbf16, #tpu.memory_space<vmem>>, vector<384x64xbf16>
    %cst_53 = arith.constant dense<0.000000e+00> : vector<2x64xf32>
    %53 = tpu.matmul %51, %52, %cst_53 {dimension_numbers = #tpu.dot_dimension_numbers<[1], [0], [0], [1], [0, 0, 1, 1], [], []>} : vector<2x384xbf16>, vector<384x64xbf16>, vector<2x64xf32> -> vector<2x64xf32>
    %54 = arith.addf %49, %53 : vector<2x64xf32>
    %c8 = arith.constant 8 : index
    %c0_54 = arith.constant 0 : index
    %55 = vector.load %arg15[%c8, %c0_54] : memref<24x384xf32, #tpu.memory_space<vmem>>, vector<2x384xf32>
    %56 = arith.truncf %55 : vector<2x384xf32> to vector<2x384xbf16>
    %c1536 = arith.constant 1536 : index
    %c0_55 = arith.constant 0 : index
    %57 = vector.load %arg16[%c1536, %c0_55] : memref<4608x64xbf16, #tpu.memory_space<vmem>>, vector<384x64xbf16>
    %cst_56 = arith.constant dense<0.000000e+00> : vector<2x64xf32>
    %58 = tpu.matmul %56, %57, %cst_56 {dimension_numbers = #tpu.dot_dimension_numbers<[1], [0], [0], [1], [0, 0, 1, 1], [], []>} : vector<2x384xbf16>, vector<384x64xbf16>, vector<2x64xf32> -> vector<2x64xf32>
    %59 = arith.addf %54, %58 : vector<2x64xf32>
    %c10 = arith.constant 10 : index
    %c0_57 = arith.constant 0 : index
    %60 = vector.load %arg15[%c10, %c0_57] : memref<24x384xf32, #tpu.memory_space<vmem>>, vector<2x384xf32>
    %61 = arith.truncf %60 : vector<2x384xf32> to vector<2x384xbf16>
    %c1920 = arith.constant 1920 : index
    %c0_58 = arith.constant 0 : index
    %62 = vector.load %arg16[%c1920, %c0_58] : memref<4608x64xbf16, #tpu.memory_space<vmem>>, vector<384x64xbf16>
    %cst_59 = arith.constant dense<0.000000e+00> : vector<2x64xf32>
    %63 = tpu.matmul %61, %62, %cst_59 {dimension_numbers = #tpu.dot_dimension_numbers<[1], [0], [0], [1], [0, 0, 1, 1], [], []>} : vector<2x384xbf16>, vector<384x64xbf16>, vector<2x64xf32> -> vector<2x64xf32>
    %64 = arith.addf %59, %63 : vector<2x64xf32>
    %c12 = arith.constant 12 : index
    %c0_60 = arith.constant 0 : index
    %65 = vector.load %arg15[%c12, %c0_60] : memref<24x384xf32, #tpu.memory_space<vmem>>, vector<2x384xf32>
    %66 = arith.truncf %65 : vector<2x384xf32> to vector<2x384xbf16>
    %c2304 = arith.constant 2304 : index
    %c0_61 = arith.constant 0 : index
    %67 = vector.load %arg16[%c2304, %c0_61] : memref<4608x64xbf16, #tpu.memory_space<vmem>>, vector<384x64xbf16>
    %cst_62 = arith.constant dense<0.000000e+00> : vector<2x64xf32>
    %68 = tpu.matmul %66, %67, %cst_62 {dimension_numbers = #tpu.dot_dimension_numbers<[1], [0], [0], [1], [0, 0, 1, 1], [], []>} : vector<2x384xbf16>, vector<384x64xbf16>, vector<2x64xf32> -> vector<2x64xf32>
    %69 = arith.addf %64, %68 : vector<2x64xf32>
    %c14 = arith.constant 14 : index
    %c0_63 = arith.constant 0 : index
    %70 = vector.load %arg15[%c14, %c0_63] : memref<24x384xf32, #tpu.memory_space<vmem>>, vector<2x384xf32>
    %71 = arith.truncf %70 : vector<2x384xf32> to vector<2x384xbf16>
    %c2688 = arith.constant 2688 : index
    %c0_64 = arith.constant 0 : index
    %72 = vector.load %arg16[%c2688, %c0_64] : memref<4608x64xbf16, #tpu.memory_space<vmem>>, vector<384x64xbf16>
    %cst_65 = arith.constant dense<0.000000e+00> : vector<2x64xf32>
    %73 = tpu.matmul %71, %72, %cst_65 {dimension_numbers = #tpu.dot_dimension_numbers<[1], [0], [0], [1], [0, 0, 1, 1], [], []>} : vector<2x384xbf16>, vector<384x64xbf16>, vector<2x64xf32> -> vector<2x64xf32>
    %74 = arith.addf %69, %73 : vector<2x64xf32>
    %c16 = arith.constant 16 : index
    %c0_66 = arith.constant 0 : index
    %75 = vector.load %arg15[%c16, %c0_66] : memref<24x384xf32, #tpu.memory_space<vmem>>, vector<2x384xf32>
    %76 = arith.truncf %75 : vector<2x384xf32> to vector<2x384xbf16>
    %c3072 = arith.constant 3072 : index
    %c0_67 = arith.constant 0 : index
    %77 = vector.load %arg16[%c3072, %c0_67] : memref<4608x64xbf16, #tpu.memory_space<vmem>>, vector<384x64xbf16>
    %cst_68 = arith.constant dense<0.000000e+00> : vector<2x64xf32>
    %78 = tpu.matmul %76, %77, %cst_68 {dimension_numbers = #tpu.dot_dimension_numbers<[1], [0], [0], [1], [0, 0, 1, 1], [], []>} : vector<2x384xbf16>, vector<384x64xbf16>, vector<2x64xf32> -> vector<2x64xf32>
    %79 = arith.addf %74, %78 : vector<2x64xf32>
    %c18 = arith.constant 18 : index
    %c0_69 = arith.constant 0 : index
    %80 = vector.load %arg15[%c18, %c0_69] : memref<24x384xf32, #tpu.memory_space<vmem>>, vector<2x384xf32>
    %81 = arith.truncf %80 : vector<2x384xf32> to vector<2x384xbf16>
    %c3456 = arith.constant 3456 : index
    %c0_70 = arith.constant 0 : index
    %82 = vector.load %arg16[%c3456, %c0_70] : memref<4608x64xbf16, #tpu.memory_space<vmem>>, vector<384x64xbf16>
    %cst_71 = arith.constant dense<0.000000e+00> : vector<2x64xf32>
    %83 = tpu.matmul %81, %82, %cst_71 {dimension_numbers = #tpu.dot_dimension_numbers<[1], [0], [0], [1], [0, 0, 1, 1], [], []>} : vector<2x384xbf16>, vector<384x64xbf16>, vector<2x64xf32> -> vector<2x64xf32>
    %84 = arith.addf %79, %83 : vector<2x64xf32>
    %c20 = arith.constant 20 : index
    %c0_72 = arith.constant 0 : index
    %85 = vector.load %arg15[%c20, %c0_72] : memref<24x384xf32, #tpu.memory_space<vmem>>, vector<2x384xf32>
    %86 = arith.truncf %85 : vector<2x384xf32> to vector<2x384xbf16>
    %c3840 = arith.constant 3840 : index
    %c0_73 = arith.constant 0 : index
    %87 = vector.load %arg16[%c3840, %c0_73] : memref<4608x64xbf16, #tpu.memory_space<vmem>>, vector<384x64xbf16>
    %cst_74 = arith.constant dense<0.000000e+00> : vector<2x64xf32>
    %88 = tpu.matmul %86, %87, %cst_74 {dimension_numbers = #tpu.dot_dimension_numbers<[1], [0], [0], [1], [0, 0, 1, 1], [], []>} : vector<2x384xbf16>, vector<384x64xbf16>, vector<2x64xf32> -> vector<2x64xf32>
    %89 = arith.addf %84, %88 : vector<2x64xf32>
    %c22 = arith.constant 22 : index
    %c0_75 = arith.constant 0 : index
    %90 = vector.load %arg15[%c22, %c0_75] : memref<24x384xf32, #tpu.memory_space<vmem>>, vector<2x384xf32>
    %91 = arith.truncf %90 : vector<2x384xf32> to vector<2x384xbf16>
    %c4224 = arith.constant 4224 : index
    %c0_76 = arith.constant 0 : index
    %92 = vector.load %arg16[%c4224, %c0_76] : memref<4608x64xbf16, #tpu.memory_space<vmem>>, vector<384x64xbf16>
    %cst_77 = arith.constant dense<0.000000e+00> : vector<2x64xf32>
    %93 = tpu.matmul %91, %92, %cst_77 {dimension_numbers = #tpu.dot_dimension_numbers<[1], [0], [0], [1], [0, 0, 1, 1], [], []>} : vector<2x384xbf16>, vector<384x64xbf16>, vector<2x64xf32> -> vector<2x64xf32>
    %94 = arith.addf %89, %93 : vector<2x64xf32>
    %cst_78 = arith.constant 0.000000e+00 : f32
    %95 = vector.broadcast %cst_78 : f32 to vector<2x64xf32>
    %96 = arith.maximumf %94, %95 : vector<2x64xf32>
    %c0_79 = arith.constant 0 : index
    %c0_80 = arith.constant 0 : index
    %97 = vector.load %arg7[%c0_79, %c0_80] : memref<64x64xf32, #tpu.memory_space<vmem>>, vector<64x64xf32>
    %cst_81 = arith.constant dense<0.000000e+00> : vector<2x64xf32>
    %98 = tpu.matmul %96, %97, %cst_81 {dimension_numbers = #tpu.dot_dimension_numbers<[1], [0], [0], [1], [0, 0, 1, 1], [], []>} : vector<2x64xf32>, vector<64x64xf32>, vector<2x64xf32> -> vector<2x64xf32>
    %c0_82 = arith.constant 0 : index
    %c0_83 = arith.constant 0 : index
    %99 = vector.load %arg8[%c0_82, %c0_83] : memref<1x64xf32, #tpu.memory_space<vmem>>, vector<1x64xf32>
    %100 = vector.broadcast %99 : vector<1x64xf32> to vector<2x64xf32>
    %101 = arith.addf %98, %100 : vector<2x64xf32>
    %cst_84 = arith.constant 0.000000e+00 : f32
    %102 = vector.broadcast %cst_84 : f32 to vector<2x64xf32>
    %103 = arith.maximumf %101, %102 : vector<2x64xf32>
    %c0_85 = arith.constant 0 : index
    %c0_86 = arith.constant 0 : index
    %104 = vector.load %arg9[%c0_85, %c0_86] : memref<64x6xf32, #tpu.memory_space<vmem>>, vector<64x6xf32>
    %cst_87 = arith.constant dense<0.000000e+00> : vector<2x6xf32>
    %105 = tpu.matmul %103, %104, %cst_87 {dimension_numbers = #tpu.dot_dimension_numbers<[1], [0], [0], [1], [0, 0, 1, 1], [], []>} : vector<2x64xf32>, vector<64x6xf32>, vector<2x6xf32> -> vector<2x6xf32>
    %c0_88 = arith.constant 0 : index
    %c0_89 = arith.constant 0 : index
    %106 = vector.load %arg10[%c0_88, %c0_89] : memref<1x6xf32, #tpu.memory_space<vmem>>, vector<1x6xf32>
    %107 = vector.broadcast %106 : vector<1x6xf32> to vector<2x6xf32>
    %108 = arith.addf %105, %107 : vector<2x6xf32>
    %109 = math.tanh %108 : vector<2x6xf32>
    %c0_90 = arith.constant 0 : index
    %c0_91 = arith.constant 0 : index
    %110 = vector.load %arg11[%c0_90, %c0_91] : memref<2x6xf32, #tpu.memory_space<vmem>>, vector<2x6xf32>
    tpu.vector_store %arg11[%c0_90, %c0_91], %109 {strides = array<i32>} : memref<2x6xf32, #tpu.memory_space<vmem>>, vector<2x6xf32>,
    return
  }
}

</mosaic_0001>

<bundles_post_ra>
// kernel: export_model_forward.1
= control target key start
LH: loop header
LB: loop body
LE: loop exit
PB: predicated region body
PF: predicated region fallthrough
CT: control target
= control target key end

     0   :  { %16 = vsyncpa [#allocation9], 0  ;;  %s5154_s29 = smov 64   ;;  %s7786_s0 = inlined_call_operand.vmem [shape: f32[32,64], index: 0, kind: input, shape index: {}]   ;;  %s7787_s1 = inlined_call_operand.vmem [shape: bf16[192,224], index: 1, kind: input, shape index: {}]   ;;  %s7788_s2 = inlined_call_operand.vmem [shape: f32[1,224], index: 2, kind: input, shape index: {}]   ;;  %s7789_s3 = inlined_call_operand.vmem [shape: bf16[672,384], index: 3, kind: input, shape index: {}]   ;;  %s7790_s4 = inlined_call_operand.vmem [shape: f32[1,384], index: 4, kind: input, shape index: {}]   ;;  %s7791_s5 = inlined_call_operand.vmem [shape: bf16[4608,64], index: 5, kind: input, shape index: {}]   ;;  %s7792_s6 = inlined_call_operand.vmem [shape: f32[1,64], index: 6, kind: input, shape index: {}]   ;;  %s7793_s7 = inlined_call_operand.vmem [shape: f32[64,64], index: 7, kind: input, shape index: {}]   ;;  %s7794_s8 = inlined_call_operand.vmem [shape: f32[1,64], index: 8, kind: input, shape index: {}]   ;;  %s7795_s9 = inlined_call_operand.vmem [shape: f32[64,6], index: 9, kind: input, shape index: {}]   ;;  %s7796_s10 = inlined_call_operand.vmem [shape: f32[1,6], index: 10, kind: input, shape index: {}]   ;;  %s7797_s11 = inlined_call_operand.hbm [shape: f32[2,6], index: 11, kind: output, shape index: {}]  }
   0x1   :  { %v5224_v0 = vld [vmem:[%s7791_s5] sm:$0xff]  ;;  %v5229_v1 = vld [vmem:[%s7791_s5 + $0x8] sm:$0xff]  ;;  %v5234_v2 = vld [vmem:[%s7791_s5 + $0x10] sm:$0xff] }
   0x2   :  { %v5239_v3 = vld [vmem:[%s7791_s5 + $0x18] sm:$0xff]  ;;  %v5244_v4 = vld [vmem:[%s7791_s5 + $0x20] sm:$0xff]  ;;  %v5249_v5 = vld [vmem:[%s7791_s5 + $0x28] sm:$0xff] }
   0x3   :  { %v5254_v6 = vld [vmem:[%s7791_s5 + $0x30] sm:$0xff]  ;;  %v5259_v7 = vld [vmem:[%s7791_s5 + $0x38] sm:$0xff]  ;;  %v5264_v8 = vld [vmem:[%s7791_s5 + $0x40] sm:$0xff] }
   0x4   :  { %v5269_v9 = vld [vmem:[%s7791_s5 + $0x48] sm:$0xff]  ;;  %v5274_v10 = vld [vmem:[%s7791_s5 + $0x50] sm:$0xff]  ;;  %v5279_v11 = vld [vmem:[%s7791_s5 + $0x58] sm:$0xff] }
   0x5   :  { %v5284_v12 = vld [vmem:[%s7791_s5 + $0x60] sm:$0xff]  ;;  %v5289_v13 = vld [vmem:[%s7791_s5 + $0x68] sm:$0xff]  ;;  %v5294_v14 = vld [vmem:[%s7791_s5 + $0x70] sm:$0xff] }
   0x6   :  { %v5299_v15 = vld [vmem:[%s7791_s5 + $0x78] sm:$0xff]  ;;  %v5304_v16 = vld [vmem:[%s7791_s5 + $0x80] sm:$0xff]  ;;  %v5309_v17 = vld [vmem:[%s7791_s5 + $0x88] sm:$0xff] }
   0x7   :  { %v5314_v18 = vld [vmem:[%s7791_s5 + $0x90] sm:$0xff]  ;;  %v5319_v19 = vld [vmem:[%s7791_s5 + $0x98] sm:$0xff]  ;;  %v5324_v20 = vld [vmem:[%s7791_s5 + $0xa0] sm:$0xff] }
   0x8   :  { %v5329_v21 = vld [vmem:[%s7791_s5 + $0xa8] sm:$0xff]  ;;  %v5334_v22 = vld [vmem:[%s7791_s5 + $0xb0] sm:$0xff]  ;;  %v5339_v23 = vld [vmem:[%s7791_s5 + $0xb8] sm:$0xff] }
   0x9   :  { %v5344_v24 = vld [vmem:[%s7791_s5 + $0xc0] sm:$0xff]  ;;  %v5349_v25 = vld [vmem:[%s7791_s5 + $0xc8] sm:$0xff]  ;;  %v5354_v26 = vld [vmem:[%s7791_s5 + $0xd0] sm:$0xff] }
   0xa   :  { %v5359_v27 = vld [vmem:[%s7791_s5 + $0xd8] sm:$0xff]  ;;  %v5364_v28 = vld [vmem:[%s7791_s5 + $0xe0] sm:$0xff]  ;;  %v5369_v29 = vld [vmem:[%s7791_s5 + $0xe8] sm:$0xff] }
   0xb   :  { %7800 = vst [vmem:[#allocation13_spill] sm:$0xff] %v5364_v28  ;;  %7801 = vst [vmem:[#allocation14_spill] sm:$0xff] %v5369_v29  ;;  %v5374_v30 = vld [vmem:[%s7791_s5 + $0xf0] sm:$0xff]  ;;  %v5379_v31 = vld [vmem:[%s7791_s5 + $0xf8] sm:$0xff] }
   0xc   :  { %7802 = vst [vmem:[#allocation15_spill] sm:$0xff] %v5374_v30  ;;  %7803 = vst [vmem:[#allocation16_spill] sm:$0xff] %v5379_v31  ;;  %v5384_v32 = vld [vmem:[%s7791_s5 + $0x100] sm:$0xff]  ;;  %v5389_v33 = vld [vmem:[%s7791_s5 + $0x108] sm:$0xff] }
   0xd   :  { %v5394_v34 = vld [vmem:[%s7791_s5 + $0x110] sm:$0xff]  ;;  %v5399_v35 = vld [vmem:[%s7791_s5 + $0x118] sm:$0xff]  ;;  %v5404_v36 = vld [vmem:[%s7791_s5 + $0x120] sm:$0xff] }
   0xe   :  { %7804 = vst [vmem:[#allocation17_spill] sm:$0xff] %v5404_v36  ;;  %v5409_v37 = vld [vmem:[%s7791_s5 + $0x128] sm:$0xff]  ;;  %v5414_v38 = vld [vmem:[%s7791_s5 + $0x130] sm:$0xff]  ;;  %v5419_v39 = vld [vmem:[%s7791_s5 + $0x138] sm:$0xff] }
   0xf   :  { %7805 = vst [vmem:[#allocation18_spill] sm:$0xff] %v5409_v37  ;;  %7806 = vst [vmem:[#allocation19_spill] sm:$0xff] %v5414_v38  ;;  %v5424_v40 = vld [vmem:[%s7791_s5 + $0x140] sm:$0xff]  ;;  %v5429_v41 = vld [vmem:[%s7791_s5 + $0x148] sm:$0xff] }
  0x10   :  { %7807 = vst [vmem:[#allocation20_spill] sm:$0xff] %v5419_v39  ;;  %v5434_v42 = vld [vmem:[%s7791_s5 + $0x150] sm:$0xff]  ;;  %v5439_v43 = vld [vmem:[%s7791_s5 + $0x158] sm:$0xff]  ;;  %v5444_v44 = vld [vmem:[%s7791_s5 + $0x160] sm:$0xff] }
  0x11   :  { %7808 = vst [vmem:[#allocation21_spill] sm:$0xff] %v5444_v44  ;;  %v5449_v45 = vld [vmem:[%s7791_s5 + $0x168] sm:$0xff]  ;;  %v5454_v46 = vld [vmem:[%s7791_s5 + $0x170] sm:$0xff]  ;;  %v5459_v47 = vld [vmem:[%s7791_s5 + $0x178] sm:$0xff] }
  0x12   :  { %7809 = vst [vmem:[#allocation22_spill] sm:$0xff] %v5449_v45  ;;  %7810 = vst [vmem:[#allocation23_spill] sm:$0xff] %v5454_v46  ;;  %v5464_v48 = vld [vmem:[%s7791_s5 + $0x180] sm:$0xff]  ;;  %v5469_v49 = vld [vmem:[%s7791_s5 + $0x188] sm:$0xff] }
  0x13   :  { %7811 = vst [vmem:[#allocation24_spill] sm:$0xff] %v5459_v47  ;;  %7812 = vst [vmem:[#allocation25_spill] sm:$0xff] %v5464_v48  ;;  %v5474_v50 = vld [vmem:[%s7791_s5 + $0x190] sm:$0xff]  ;;  %v5479_v51 = vld [vmem:[%s7791_s5 + $0x198] sm:$0xff] }
  0x14   :  { %7813 = vst [vmem:[#allocation26_spill] sm:$0xff] %v5469_v49  ;;  %7814 = vst [vmem:[#allocation27_spill] sm:$0xff] %v5474_v50  ;;  %v5484_v52 = vld [vmem:[%s7791_s5 + $0x1a0] sm:$0xff]  ;;  %v5489_v53 = vld [vmem:[%s7791_s5 + $0x1a8] sm:$0xff] }
  0x15   :  { %7815 = vst [vmem:[#allocation28_spill] sm:$0xff] %v5479_v51  ;;  %7816 = vst [vmem:[#allocation29_spill] sm:$0xff] %v5484_v52  ;;  %v5494_v54 = vld [vmem:[%s7791_s5 + $0x1b0] sm:$0xff]  ;;  %v5499_v55 = vld [vmem:[%s7791_s5 + $0x1b8] sm:$0xff] }
  0x16   :  { %7817 = vst [vmem:[#allocation30_spill] sm:$0xff] %v5489_v53  ;;  %7818 = vst [vmem:[#allocation31_spill] sm:$0xff] %v5494_v54  ;;  %v5504_v56 = vld [vmem:[%s7791_s5 + $0x1c0] sm:$0xff]  ;;  %v5509_v57 = vld [vmem:[%s7791_s5 + $0x1c8] sm:$0xff] }
  0x17   :  { %7819 = vst [vmem:[#allocation32_spill] sm:$0xff] %v5499_v55  ;;  %7820 = vst [vmem:[#allocation33_spill] sm:$0xff] %v5504_v56  ;;  %v5514_v58 = vld [vmem:[%s7791_s5 + $0x1d0] sm:$0xff]  ;;  %v5519_v59 = vld [vmem:[%s7791_s5 + $0x1d8] sm:$0xff] }
  0x18   :  { %7821 = vst [vmem:[#allocation34_spill] sm:$0xff] %v5509_v57  ;;  %7822 = vst [vmem:[#allocation35_spill] sm:$0xff] %v5514_v58  ;;  %v5524_v60 = vld [vmem:[%s7791_s5 + $0x1e0] sm:$0xff]  ;;  %v5529_v61 = vld [vmem:[%s7791_s5 + $0x1e8] sm:$0xff] }
  0x19   :  { %7823 = vst [vmem:[#allocation36_spill] sm:$0xff] %v5519_v59  ;;  %7824 = vst [vmem:[#allocation37_spill] sm:$0xff] %v5524_v60  ;;  %v5534_v62 = vld [vmem:[%s7791_s5 + $0x1f0] sm:$0xff]  ;;  %v5539_v63 = vld [vmem:[%s7791_s5 + $0x1f8] sm:$0xff] }
  0x1a   :  { %7825 = vst [vmem:[#allocation38_spill] sm:$0xff] %v5529_v61  ;;  %7826 = vst [vmem:[#allocation39_spill] sm:$0xff] %v5534_v62  ;;  %v5544_v55 = vld [vmem:[%s7791_s5 + $0x200] sm:$0xff]  ;;  %v5549_v54 = vld [vmem:[%s7791_s5 + $0x208] sm:$0xff] }
  0x1b   :  { %7827 = vst [vmem:[#allocation40_spill] sm:$0xff] %v5539_v63  ;;  %7828 = vst [vmem:[#allocation41_spill] sm:$0xff] %v5544_v55  ;;  %v5554_v53 = vld [vmem:[%s7791_s5 + $0x210] sm:$0xff]  ;;  %v5559_v62 = vld [vmem:[%s7791_s5 + $0x218] sm:$0xff] }
  0x1c   :  { %7829 = vst [vmem:[#allocation42_spill] sm:$0xff] %v5549_v54  ;;  %7830 = vst [vmem:[#allocation43_spill] sm:$0xff] %v5554_v53  ;;  %v5564_v63 = vld [vmem:[%s7791_s5 + $0x220] sm:$0xff]  ;;  %v5569_v61 = vld [vmem:[%s7791_s5 + $0x228] sm:$0xff] }
  0x1d   :  { %7831 = vst [vmem:[#allocation44_spill] sm:$0xff] %v5559_v62  ;;  %7832 = vst [vmem:[#allocation45_spill] sm:$0xff] %v5564_v63  ;;  %v5574_v52 = vld [vmem:[%s7791_s5 + $0x230] sm:$0xff]  ;;  %v5579_v60 = vld [vmem:[%s7791_s5 + $0x238] sm:$0xff] }
  0x1e   :  { %7833 = vst [vmem:[#allocation46_spill] sm:$0xff] %v5569_v61  ;;  %7834 = vst [vmem:[#allocation47_spill] sm:$0xff] %v5574_v52  ;;  %v5584_v62 = vld [vmem:[%s7791_s5 + $0x240] sm:$0xff]  ;;  %v5589_v63 = vld [vmem:[%s7791_s5 + $0x248] sm:$0xff] }
  0x1f   :  { %7835 = vst [vmem:[#allocation48_spill] sm:$0xff] %v5579_v60  ;;  %7836 = vst [vmem:[#allocation49_spill] sm:$0xff] %v5584_v62  ;;  %v5594_v61 = vld [vmem:[%s7791_s5 + $0x250] sm:$0xff]  ;;  %v5599_v52 = vld [vmem:[%s7791_s5 + $0x258] sm:$0xff] }
  0x20   :  { %7837 = vst [vmem:[#allocation50_spill] sm:$0xff] %v5589_v63  ;;  %7838 = vst [vmem:[#allocation51_spill] sm:$0xff] %v5594_v61  ;;  %v5604_v60 = vld [vmem:[%s7791_s5 + $0x260] sm:$0xff]  ;;  %v5609_v62 = vld [vmem:[%s7791_s5 + $0x268] sm:$0xff] }
  0x21   :  { %7839 = vst [vmem:[#allocation52_spill] sm:$0xff] %v5599_v52  ;;  %7840 = vst [vmem:[#allocation53_spill] sm:$0xff] %v5604_v60  ;;  %v5614_v63 = vld [vmem:[%s7791_s5 + $0x270] sm:$0xff]  ;;  %v5619_v61 = vld [vmem:[%s7791_s5 + $0x278] sm:$0xff] }
  0x22   :  { %7841 = vst [vmem:[#allocation54_spill] sm:$0xff] %v5609_v62  ;;  %7842 = vst [vmem:[#allocation55_spill] sm:$0xff] %v5614_v63  ;;  %v5624_v52 = vld [vmem:[%s7791_s5 + $0x280] sm:$0xff]  ;;  %v5629_v60 = vld [vmem:[%s7791_s5 + $0x288] sm:$0xff] }
  0x23   :  { %7843 = vst [vmem:[#allocation56_spill] sm:$0xff] %v5619_v61  ;;  %7844 = vst [vmem:[#allocation57_spill] sm:$0xff] %v5624_v52  ;;  %v5634_v62 = vld [vmem:[%s7791_s5 + $0x290] sm:$0xff]  ;;  %v5639_v63 = vld [vmem:[%s7791_s5 + $0x298] sm:$0xff] }
  0x24   :  { %7845 = vst [vmem:[#allocation58_spill] sm:$0xff] %v5629_v60  ;;  %7846 = vst [vmem:[#allocation59_spill] sm:$0xff] %v5634_v62  ;;  %v5644_v61 = vld [vmem:[%s7791_s5 + $0x2a0] sm:$0xff]  ;;  %v5649_v52 = vld [vmem:[%s7791_s5 + $0x2a8] sm:$0xff] }
  0x25   :  { %7847 = vst [vmem:[#allocation60_spill] sm:$0xff] %v5639_v63  ;;  %7848 = vst [vmem:[#allocation61_spill] sm:$0xff] %v5644_v61  ;;  %v5654_v60 = vld [vmem:[%s7791_s5 + $0x2b0] sm:$0xff]  ;;  %v5659_v62 = vld [vmem:[%s7791_s5 + $0x2b8] sm:$0xff] }
  0x26   :  { %7849 = vst [vmem:[#allocation62_spill] sm:$0xff] %v5649_v52  ;;  %7850 = vst [vmem:[#allocation63_spill] sm:$0xff] %v5654_v60  ;;  %v5664_v63 = vld [vmem:[%s7791_s5 + $0x2c0] sm:$0xff]  ;;  %v5669_v61 = vld [vmem:[%s7791_s5 + $0x2c8] sm:$0xff] }
  0x27   :  { %7851 = vst [vmem:[#allocation64_spill] sm:$0xff] %v5659_v62  ;;  %7852 = vst [vmem:[#allocation65_spill] sm:$0xff] %v5664_v63  ;;  %v5674_v52 = vld [vmem:[%s7791_s5 + $0x2d0] sm:$0xff]  ;;  %v5679_v60 = vld [vmem:[%s7791_s5 + $0x2d8] sm:$0xff] }
  0x28   :  { %7853 = vst [vmem:[#allocation66_spill] sm:$0xff] %v5669_v61  ;;  %7854 = vst [vmem:[#allocation67_spill] sm:$0xff] %v5674_v52  ;;  %v5684_v62 = vld [vmem:[%s7791_s5 + $0x2e0] sm:$0xff]  ;;  %v5689_v63 = vld [vmem:[%s7791_s5 + $0x2e8] sm:$0xff] }
  0x29   :  { %7855 = vst [vmem:[#allocation68_spill] sm:$0xff] %v5679_v60  ;;  %7856 = vst [vmem:[#allocation69_spill] sm:$0xff] %v5684_v62  ;;  %v5694_v61 = vld [vmem:[%s7791_s5 + $0x2f0] sm:$0xff]  ;;  %v5699_v52 = vld [vmem:[%s7791_s5 + $0x2f8] sm:$0xff] }
  0x2a   :  { %7857 = vst [vmem:[#allocation70_spill] sm:$0xff] %v5689_v63  ;;  %7858 = vst [vmem:[#allocation71_spill] sm:$0xff] %v5694_v61  ;;  %v5704_v60 = vld [vmem:[%s7791_s5 + $0x300] sm:$0xff]  ;;  %v5709_v62 = vld [vmem:[%s7791_s5 + $0x308] sm:$0xff] }
  0x2b   :  { %7859 = vst [vmem:[#allocation72_spill] sm:$0xff] %v5699_v52  ;;  %7860 = vst [vmem:[#allocation73_spill] sm:$0xff] %v5704_v60  ;;  %v5714_v63 = vld [vmem:[%s7791_s5 + $0x310] sm:$0xff]  ;;  %v5719_v61 = vld [vmem:[%s7791_s5 + $0x318] sm:$0xff] }
  0x2c   :  { %7861 = vst [vmem:[#allocation74_spill] sm:$0xff] %v5709_v62  ;;  %7862 = vst [vmem:[#allocation75_spill] sm:$0xff] %v5714_v63  ;;  %v5724_v52 = vld [vmem:[%s7791_s5 + $0x320] sm:$0xff]  ;;  %v5729_v60 = vld [vmem:[%s7791_s5 + $0x328] sm:$0xff] }
  0x2d   :  { %7863 = vst [vmem:[#allocation76_spill] sm:$0xff] %v5719_v61  ;;  %7864 = vst [vmem:[#allocation77_spill] sm:$0xff] %v5724_v52  ;;  %v5734_v62 = vld [vmem:[%s7791_s5 + $0x330] sm:$0xff]  ;;  %v5739_v63 = vld [vmem:[%s7791_s5 + $0x338] sm:$0xff] }
  0x2e   :  { %7865 = vst [vmem:[#allocation78_spill] sm:$0xff] %v5729_v60  ;;  %7866 = vst [vmem:[#allocation79_spill] sm:$0xff] %v5734_v62  ;;  %v5744_v61 = vld [vmem:[%s7791_s5 + $0x340] sm:$0xff]  ;;  %v5749_v52 = vld [vmem:[%s7791_s5 + $0x348] sm:$0xff] }
  0x2f   :  { %7867 = vst [vmem:[#allocation80_spill] sm:$0xff] %v5739_v63  ;;  %7868 = vst [vmem:[#allocation81_spill] sm:$0xff] %v5744_v61  ;;  %v5754_v60 = vld [vmem:[%s7791_s5 + $0x350] sm:$0xff]  ;;  %v5759_v62 = vld [vmem:[%s7791_s5 + $0x358] sm:$0xff] }
  0x30   :  { %7869 = vst [vmem:[#allocation82_spill] sm:$0xff] %v5749_v52  ;;  %7870 = vst [vmem:[#allocation83_spill] sm:$0xff] %v5754_v60  ;;  %v5764_v63 = vld [vmem:[%s7791_s5 + $0x360] sm:$0xff]  ;;  %v5769_v61 = vld [vmem:[%s7791_s5 + $0x368] sm:$0xff] }
  0x31   :  { %7871 = vst [vmem:[#allocation84_spill] sm:$0xff] %v5759_v62  ;;  %7872 = vst [vmem:[#allocation85_spill] sm:$0xff] %v5764_v63  ;;  %v5774_v52 = vld [vmem:[%s7791_s5 + $0x370] sm:$0xff]  ;;  %v5779_v60 = vld [vmem:[%s7791_s5 + $0x378] sm:$0xff] }
  0x32   :  { %7873 = vst [vmem:[#allocation86_spill] sm:$0xff] %v5769_v61  ;;  %7874 = vst [vmem:[#allocation87_spill] sm:$0xff] %v5774_v52  ;;  %v5784_v62 = vld [vmem:[%s7791_s5 + $0x380] sm:$0xff]  ;;  %v5789_v63 = vld [vmem:[%s7791_s5 + $0x388] sm:$0xff] }
  0x33   :  { %7875 = vst [vmem:[#allocation88_spill] sm:$0xff] %v5779_v60  ;;  %7876 = vst [vmem:[#allocation89_spill] sm:$0xff] %v5784_v62  ;;  %v5794_v61 = vld [vmem:[%s7791_s5 + $0x390] sm:$0xff]  ;;  %v5799_v52 = vld [vmem:[%s7791_s5 + $0x398] sm:$0xff] }
  0x34   :  { %7877 = vst [vmem:[#allocation90_spill] sm:$0xff] %v5789_v63  ;;  %7878 = vst [vmem:[#allocation91_spill] sm:$0xff] %v5794_v61  ;;  %v5804_v60 = vld [vmem:[%s7791_s5 + $0x3a0] sm:$0xff]  ;;  %v5809_v62 = vld [vmem:[%s7791_s5 + $0x3a8] sm:$0xff] }
  0x35   :  { %7879 = vst [vmem:[#allocation92_spill] sm:$0xff] %v5799_v52  ;;  %7880 = vst [vmem:[#allocation93_spill] sm:$0xff] %v5804_v60  ;;  %v5814_v63 = vld [vmem:[%s7791_s5 + $0x3b0] sm:$0xff]  ;;  %v5819_v61 = vld [vmem:[%s7791_s5 + $0x3b8] sm:$0xff] }
  0x36   :  { %7881 = vst [vmem:[#allocation94_spill] sm:$0xff] %v5809_v62  ;;  %7882 = vst [vmem:[#allocation95_spill] sm:$0xff] %v5814_v63  ;;  %v5824_v52 = vld [vmem:[%s7791_s5 + $0x3c0] sm:$0xff]  ;;  %v5829_v60 = vld [vmem:[%s7791_s5 + $0x3c8] sm:$0xff] }
  0x37   :  { %7883 = vst [vmem:[#allocation96_spill] sm:$0xff] %v5819_v61  ;;  %7884 = vst [vmem:[#allocation97_spill] sm:$0xff] %v5824_v52  ;;  %v5834_v62 = vld [vmem:[%s7791_s5 + $0x3d0] sm:$0xff]  ;;  %v5839_v63 = vld [vmem:[%s7791_s5 + $0x3d8] sm:$0xff] }
  0x38   :  { %7885 = vst [vmem:[#allocation98_spill] sm:$0xff] %v5829_v60  ;;  %7886 = vst [vmem:[#allocation99_spill] sm:$0xff] %v5834_v62  ;;  %v5844_v61 = vld [vmem:[%s7791_s5 + $0x3e0] sm:$0xff]  ;;  %v5849_v52 = vld [vmem:[%s7791_s5 + $0x3e8] sm:$0xff] }
  0x39   :  { %7887 = vst [vmem:[#allocation100_spill] sm:$0xff] %v5839_v63  ;;  %7888 = vst [vmem:[#allocation101_spill] sm:$0xff] %v5844_v61  ;;  %v5854_v60 = vld [vmem:[%s7791_s5 + $0x3f0] sm:$0xff]  ;;  %v5859_v62 = vld [vmem:[%s7791_s5 + $0x3f8] sm:$0xff] }
  0x3a   :  { %7889 = vst [vmem:[#allocation102_spill] sm:$0xff] %v5849_v52  ;;  %7890 = vst [vmem:[#allocation103_spill] sm:$0xff] %v5854_v60  ;;  %v5864_v63 = vld [vmem:[%s7791_s5 + $0x400] sm:$0xff]  ;;  %v5869_v61 = vld [vmem:[%s7791_s5 + $0x408] sm:$0xff] }
  0x3b   :  { %7891 = vst [vmem:[#allocation104_spill] sm:$0xff] %v5859_v62  ;;  %7892 = vst [vmem:[#allocation105_spill] sm:$0xff] %v5864_v63  ;;  %v5874_v52 = vld [vmem:[%s7791_s5 + $0x410] sm:$0xff]  ;;  %v5879_v60 = vld [vmem:[%s7791_s5 + $0x418] sm:$0xff] }
  0x3c   :  { %7893 = vst [vmem:[#allocation106_spill] sm:$0xff] %v5869_v61  ;;  %7894 = vst [vmem:[#allocation107_spill] sm:$0xff] %v5874_v52  ;;  %v5884_v62 = vld [vmem:[%s7791_s5 + $0x420] sm:$0xff]  ;;  %v5889_v63 = vld [vmem:[%s7791_s5 + $0x428] sm:$0xff] }
  0x3d   :  { %7895 = vst [vmem:[#allocation108_spill] sm:$0xff] %v5879_v60  ;;  %7896 = vst [vmem:[#allocation109_spill] sm:$0xff] %v5884_v62  ;;  %v5894_v61 = vld [vmem:[%s7791_s5 + $0x430] sm:$0xff]  ;;  %v5899_v52 = vld [vmem:[%s7791_s5 + $0x438] sm:$0xff] }
  0x3e   :  { %7897 = vst [vmem:[#allocation110_spill] sm:$0xff] %v5889_v63  ;;  %7898 = vst [vmem:[#allocation111_spill] sm:$0xff] %v5894_v61  ;;  %v5904_v60 = vld [vmem:[%s7791_s5 + $0x440] sm:$0xff]  ;;  %v5909_v62 = vld [vmem:[%s7791_s5 + $0x448] sm:$0xff] }
  0x3f   :  { %7899 = vst [vmem:[#allocation112_spill] sm:$0xff] %v5899_v52  ;;  %7900 = vst [vmem:[#allocation113_spill] sm:$0xff] %v5904_v60  ;;  %v5914_v63 = vld [vmem:[%s7791_s5 + $0x450] sm:$0xff]  ;;  %v5919_v61 = vld [vmem:[%s7791_s5 + $0x458] sm:$0xff] }
  0x40   :  { %7901 = vst [vmem:[#allocation114_spill] sm:$0xff] %v5909_v62  ;;  %7902 = vst [vmem:[#allocation115_spill] sm:$0xff] %v5914_v63  ;;  %v5924_v52 = vld [vmem:[%s7791_s5 + $0x460] sm:$0xff]  ;;  %v5929_v60 = vld [vmem:[%s7791_s5 + $0x468] sm:$0xff] }
  0x41   :  { %7903 = vst [vmem:[#allocation116_spill] sm:$0xff] %v5919_v61  ;;  %7904 = vst [vmem:[#allocation117_spill] sm:$0xff] %v5924_v52  ;;  %v5934_v62 = vld [vmem:[%s7791_s5 + $0x470] sm:$0xff]  ;;  %v5939_v63 = vld [vmem:[%s7791_s5 + $0x478] sm:$0xff] }
  0x42   :  { %7905 = vst [vmem:[#allocation118_spill] sm:$0xff] %v5929_v60  ;;  %7906 = vst [vmem:[#allocation119_spill] sm:$0xff] %v5934_v62  ;;  %v5944_v61 = vld [vmem:[%s7791_s5 + $0x480] sm:$0xff]  ;;  %v5949_v52 = vld [vmem:[%s7791_s5 + $0x488] sm:$0xff] }
  0x43   :  { %7907 = vst [vmem:[#allocation120_spill] sm:$0xff] %v5939_v63  ;;  %7908 = vst [vmem:[#allocation121_spill] sm:$0xff] %v5944_v61  ;;  %v5954_v60 = vld [vmem:[%s7791_s5 + $0x490] sm:$0xff]  ;;  %v5959_v62 = vld [vmem:[%s7791_s5 + $0x498] sm:$0xff] }
  0x44   :  { %7909 = vst [vmem:[#allocation122_spill] sm:$0xff] %v5949_v52  ;;  %7910 = vst [vmem:[#allocation123_spill] sm:$0xff] %v5954_v60  ;;  %v5964_v63 = vld [vmem:[%s7791_s5 + $0x4a0] sm:$0xff]  ;;  %v5969_v61 = vld [vmem:[%s7791_s5 + $0x4a8] sm:$0xff] }
  0x45   :  { %7911 = vst [vmem:[#allocation124_spill] sm:$0xff] %v5959_v62  ;;  %7912 = vst [vmem:[#allocation125_spill] sm:$0xff] %v5964_v63  ;;  %v5974_v52 = vld [vmem:[%s7791_s5 + $0x4b0] sm:$0xff]  ;;  %v5979_v60 = vld [vmem:[%s7791_s5 + $0x4b8] sm:$0xff] }
  0x46   :  { %7913 = vst [vmem:[#allocation126_spill] sm:$0xff] %v5969_v61  ;;  %7914 = vst [vmem:[#allocation127_spill] sm:$0xff] %v5974_v52  ;;  %v5984_v62 = vld [vmem:[%s7791_s5 + $0x4c0] sm:$0xff]  ;;  %v5989_v63 = vld [vmem:[%s7791_s5 + $0x4c8] sm:$0xff] }
  0x47   :  { %7915 = vst [vmem:[#allocation128_spill] sm:$0xff] %v5979_v60  ;;  %7916 = vst [vmem:[#allocation129_spill] sm:$0xff] %v5984_v62  ;;  %v5994_v61 = vld [vmem:[%s7791_s5 + $0x4d0] sm:$0xff]  ;;  %v5999_v52 = vld [vmem:[%s7791_s5 + $0x4d8] sm:$0xff] }
  0x48   :  { %7917 = vst [vmem:[#allocation130_spill] sm:$0xff] %v5989_v63  ;;  %7918 = vst [vmem:[#allocation131_spill] sm:$0xff] %v5994_v61  ;;  %v6004_v60 = vld [vmem:[%s7791_s5 + $0x4e0] sm:$0xff]  ;;  %v6009_v62 = vld [vmem:[%s7791_s5 + $0x4e8] sm:$0xff] }
  0x49   :  { %7919 = vst [vmem:[#allocation132_spill] sm:$0xff] %v5999_v52  ;;  %7920 = vst [vmem:[#allocation133_spill] sm:$0xff] %v6004_v60  ;;  %v6014_v63 = vld [vmem:[%s7791_s5 + $0x4f0] sm:$0xff]  ;;  %v6019_v61 = vld [vmem:[%s7791_s5 + $0x4f8] sm:$0xff] }
  0x4a   :  { %7921 = vst [vmem:[#allocation134_spill] sm:$0xff] %v6009_v62  ;;  %7922 = vst [vmem:[#allocation135_spill] sm:$0xff] %v6014_v63  ;;  %v6024_v52 = vld [vmem:[%s7791_s5 + $0x500] sm:$0xff]  ;;  %v6029_v60 = vld [vmem:[%s7791_s5 + $0x508] sm:$0xff] }
  0x4b   :  { %7923 = vst [vmem:[#allocation136_spill] sm:$0xff] %v6019_v61  ;;  %7924 = vst [vmem:[#allocation137_spill] sm:$0xff] %v6024_v52  ;;  %v6034_v62 = vld [vmem:[%s7791_s5 + $0x510] sm:$0xff]  ;;  %v6039_v63 = vld [vmem:[%s7791_s5 + $0x518] sm:$0xff] }
  0x4c   :  { %7925 = vst [vmem:[#allocation138_spill] sm:$0xff] %v6029_v60  ;;  %7926 = vst [vmem:[#allocation139_spill] sm:$0xff] %v6034_v62  ;;  %v6044_v61 = vld [vmem:[%s7791_s5 + $0x520] sm:$0xff]  ;;  %v6049_v52 = vld [vmem:[%s7791_s5 + $0x528] sm:$0xff] }
  0x4d   :  { %7927 = vst [vmem:[#allocation140_spill] sm:$0xff] %v6039_v63  ;;  %7928 = vst [vmem:[#allocation141_spill] sm:$0xff] %v6044_v61  ;;  %v6054_v60 = vld [vmem:[%s7791_s5 + $0x530] sm:$0xff]  ;;  %v6059_v62 = vld [vmem:[%s7791_s5 + $0x538] sm:$0xff] }
  0x4e   :  { %7929 = vst [vmem:[#allocation142_spill] sm:$0xff] %v6049_v52  ;;  %7930 = vst [vmem:[#allocation143_spill] sm:$0xff] %v6054_v60  ;;  %v6064_v63 = vld [vmem:[%s7791_s5 + $0x540] sm:$0xff]  ;;  %v6069_v61 = vld [vmem:[%s7791_s5 + $0x548] sm:$0xff] }
  0x4f   :  { %7931 = vst [vmem:[#allocation144_spill] sm:$0xff] %v6059_v62  ;;  %7932 = vst [vmem:[#allocation145_spill] sm:$0xff] %v6064_v63  ;;  %v6074_v52 = vld [vmem:[%s7791_s5 + $0x550] sm:$0xff]  ;;  %v6079_v60 = vld [vmem:[%s7791_s5 + $0x558] sm:$0xff] }
  0x50   :  { %7933 = vst [vmem:[#allocation146_spill] sm:$0xff] %v6069_v61  ;;  %7934 = vst [vmem:[#allocation147_spill] sm:$0xff] %v6074_v52  ;;  %v6084_v62 = vld [vmem:[%s7791_s5 + $0x560] sm:$0xff]  ;;  %v6089_v63 = vld [vmem:[%s7791_s5 + $0x568] sm:$0xff] }
  0x51   :  { %7935 = vst [vmem:[#allocation148_spill] sm:$0xff] %v6079_v60  ;;  %7936 = vst [vmem:[#allocation149_spill] sm:$0xff] %v6084_v62  ;;  %v6094_v61 = vld [vmem:[%s7791_s5 + $0x570] sm:$0xff]  ;;  %v6099_v52 = vld [vmem:[%s7791_s5 + $0x578] sm:$0xff] }
  0x52   :  { %7937 = vst [vmem:[#allocation150_spill] sm:$0xff] %v6089_v63  ;;  %7938 = vst [vmem:[#allocation151_spill] sm:$0xff] %v6094_v61  ;;  %v6104_v60 = vld [vmem:[%s7791_s5 + $0x580] sm:$0xff]  ;;  %v6109_v62 = vld [vmem:[%s7791_s5 + $0x588] sm:$0xff] }
  0x53   :  { %7939 = vst [vmem:[#allocation152_spill] sm:$0xff] %v6099_v52  ;;  %7940 = vst [vmem:[#allocation153_spill] sm:$0xff] %v6104_v60  ;;  %v6114_v63 = vld [vmem:[%s7791_s5 + $0x590] sm:$0xff]  ;;  %v6119_v61 = vld [vmem:[%s7791_s5 + $0x598] sm:$0xff] }
  0x54   :  { %7941 = vst [vmem:[#allocation154_spill] sm:$0xff] %v6109_v62  ;;  %7942 = vst [vmem:[#allocation155_spill] sm:$0xff] %v6114_v63  ;;  %v6124_v52 = vld [vmem:[%s7791_s5 + $0x5a0] sm:$0xff]  ;;  %v6129_v60 = vld [vmem:[%s7791_s5 + $0x5a8] sm:$0xff] }
  0x55   :  { %7943 = vst [vmem:[#allocation156_spill] sm:$0xff] %v6119_v61  ;;  %7944 = vst [vmem:[#allocation157_spill] sm:$0xff] %v6124_v52  ;;  %v6134_v62 = vld [vmem:[%s7791_s5 + $0x5b0] sm:$0xff]  ;;  %v6139_v63 = vld [vmem:[%s7791_s5 + $0x5b8] sm:$0xff] }
  0x56   :  { %7945 = vst [vmem:[#allocation158_spill] sm:$0xff] %v6129_v60  ;;  %7946 = vst [vmem:[#allocation159_spill] sm:$0xff] %v6134_v62  ;;  %v6144_v61 = vld [vmem:[%s7791_s5 + $0x5c0] sm:$0xff]  ;;  %v6149_v52 = vld [vmem:[%s7791_s5 + $0x5c8] sm:$0xff] }
  0x57   :  { %7947 = vst [vmem:[#allocation160_spill] sm:$0xff] %v6139_v63  ;;  %7948 = vst [vmem:[#allocation161_spill] sm:$0xff] %v6144_v61  ;;  %v6154_v60 = vld [vmem:[%s7791_s5 + $0x5d0] sm:$0xff]  ;;  %v6159_v62 = vld [vmem:[%s7791_s5 + $0x5d8] sm:$0xff] }
  0x58   :  { %7949 = vst [vmem:[#allocation162_spill] sm:$0xff] %v6149_v52  ;;  %7950 = vst [vmem:[#allocation163_spill] sm:$0xff] %v6154_v60  ;;  %v6164_v63 = vld [vmem:[%s7791_s5 + $0x5e0] sm:$0xff]  ;;  %v6169_v61 = vld [vmem:[%s7791_s5 + $0x5e8] sm:$0xff] }
  0x59   :  { %7951 = vst [vmem:[#allocation164_spill] sm:$0xff] %v6159_v62  ;;  %7952 = vst [vmem:[#allocation165_spill] sm:$0xff] %v6164_v63  ;;  %v6174_v52 = vld [vmem:[%s7791_s5 + $0x5f0] sm:$0xff]  ;;  %v6179_v60 = vld [vmem:[%s7791_s5 + $0x5f8] sm:$0xff] }
  0x5a   :  { %7953 = vst [vmem:[#allocation166_spill] sm:$0xff] %v6169_v61  ;;  %7954 = vst [vmem:[#allocation167_spill] sm:$0xff] %v6174_v52  ;;  %v6184_v62 = vld [vmem:[%s7791_s5 + $0x600] sm:$0xff]  ;;  %v6189_v63 = vld [vmem:[%s7791_s5 + $0x608] sm:$0xff] }
  0x5b   :  { %7955 = vst [vmem:[#allocation168_spill] sm:$0xff] %v6179_v60  ;;  %7956 = vst [vmem:[#allocation169_spill] sm:$0xff] %v6184_v62  ;;  %v6194_v61 = vld [vmem:[%s7791_s5 + $0x610] sm:$0xff]  ;;  %v6199_v52 = vld [vmem:[%s7791_s5 + $0x618] sm:$0xff] }
  0x5c   :  { %7957 = vst [vmem:[#allocation170_spill] sm:$0xff] %v6189_v63  ;;  %7958 = vst [vmem:[#allocation171_spill] sm:$0xff] %v6194_v61  ;;  %v6204_v60 = vld [vmem:[%s7791_s5 + $0x620] sm:$0xff]  ;;  %v6209_v62 = vld [vmem:[%s7791_s5 + $0x628] sm:$0xff] }
  0x5d   :  { %7959 = vst [vmem:[#allocation172_spill] sm:$0xff] %v6199_v52  ;;  %7960 = vst [vmem:[#allocation173_spill] sm:$0xff] %v6204_v60  ;;  %v6214_v63 = vld [vmem:[%s7791_s5 + $0x630] sm:$0xff]  ;;  %v6219_v61 = vld [vmem:[%s7791_s5 + $0x638] sm:$0xff] }
  0x5e   :  { %7961 = vst [vmem:[#allocation174_spill] sm:$0xff] %v6209_v62  ;;  %7962 = vst [vmem:[#allocation175_spill] sm:$0xff] %v6214_v63  ;;  %v6224_v52 = vld [vmem:[%s7791_s5 + $0x640] sm:$0xff]  ;;  %v6229_v60 = vld [vmem:[%s7791_s5 + $0x648] sm:$0xff] }
  0x5f   :  { %7963 = vst [vmem:[#allocation176_spill] sm:$0xff] %v6219_v61  ;;  %7964 = vst [vmem:[#allocation177_spill] sm:$0xff] %v6224_v52  ;;  %v6234_v62 = vld [vmem:[%s7791_s5 + $0x650] sm:$0xff]  ;;  %v6239_v63 = vld [vmem:[%s7791_s5 + $0x658] sm:$0xff] }
  0x60   :  { %7965 = vst [vmem:[#allocation178_spill] sm:$0xff] %v6229_v60  ;;  %7966 = vst [vmem:[#allocation179_spill] sm:$0xff] %v6234_v62  ;;  %v6244_v61 = vld [vmem:[%s7791_s5 + $0x660] sm:$0xff]  ;;  %v6249_v52 = vld [vmem:[%s7791_s5 + $0x668] sm:$0xff] }
  0x61   :  { %7967 = vst [vmem:[#allocation180_spill] sm:$0xff] %v6239_v63  ;;  %7968 = vst [vmem:[#allocation181_spill] sm:$0xff] %v6244_v61  ;;  %v6254_v60 = vld [vmem:[%s7791_s5 + $0x670] sm:$0xff]  ;;  %v6259_v62 = vld [vmem:[%s7791_s5 + $0x678] sm:$0xff] }
  0x62   :  { %7969 = vst [vmem:[#allocation182_spill] sm:$0xff] %v6249_v52  ;;  %7970 = vst [vmem:[#allocation183_spill] sm:$0xff] %v6254_v60  ;;  %v6264_v63 = vld [vmem:[%s7791_s5 + $0x680] sm:$0xff]  ;;  %v6269_v61 = vld [vmem:[%s7791_s5 + $0x688] sm:$0xff] }
  0x63   :  { %7971 = vst [vmem:[#allocation184_spill] sm:$0xff] %v6259_v62  ;;  %7972 = vst [vmem:[#allocation185_spill] sm:$0xff] %v6264_v63  ;;  %v6274_v52 = vld [vmem:[%s7791_s5 + $0x690] sm:$0xff]  ;;  %v6279_v60 = vld [vmem:[%s7791_s5 + $0x698] sm:$0xff] }
  0x64   :  { %7973 = vst [vmem:[#allocation186_spill] sm:$0xff] %v6269_v61  ;;  %7974 = vst [vmem:[#allocation187_spill] sm:$0xff] %v6274_v52  ;;  %v6284_v62 = vld [vmem:[%s7791_s5 + $0x6a0] sm:$0xff]  ;;  %v6289_v63 = vld [vmem:[%s7791_s5 + $0x6a8] sm:$0xff] }
  0x65   :  { %7975 = vst [vmem:[#allocation188_spill] sm:$0xff] %v6279_v60  ;;  %7976 = vst [vmem:[#allocation189_spill] sm:$0xff] %v6284_v62  ;;  %v6294_v61 = vld [vmem:[%s7791_s5 + $0x6b0] sm:$0xff]  ;;  %v6299_v52 = vld [vmem:[%s7791_s5 + $0x6b8] sm:$0xff] }
  0x66   :  { %7977 = vst [vmem:[#allocation190_spill] sm:$0xff] %v6289_v63  ;;  %7978 = vst [vmem:[#allocation191_spill] sm:$0xff] %v6294_v61  ;;  %v6304_v60 = vld [vmem:[%s7791_s5 + $0x6c0] sm:$0xff]  ;;  %v6309_v62 = vld [vmem:[%s7791_s5 + $0x6c8] sm:$0xff] }
  0x67   :  { %7979 = vst [vmem:[#allocation192_spill] sm:$0xff] %v6299_v52  ;;  %7980 = vst [vmem:[#allocation193_spill] sm:$0xff] %v6304_v60  ;;  %v6314_v63 = vld [vmem:[%s7791_s5 + $0x6d0] sm:$0xff]  ;;  %v6319_v61 = vld [vmem:[%s7791_s5 + $0x6d8] sm:$0xff] }
  0x68   :  { %7981 = vst [vmem:[#allocation194_spill] sm:$0xff] %v6309_v62  ;;  %7982 = vst [vmem:[#allocation195_spill] sm:$0xff] %v6314_v63  ;;  %v6324_v52 = vld [vmem:[%s7791_s5 + $0x6e0] sm:$0xff]  ;;  %v6329_v60 = vld [vmem:[%s7791_s5 + $0x6e8] sm:$0xff] }
  0x69   :  { %7983 = vst [vmem:[#allocation196_spill] sm:$0xff] %v6319_v61  ;;  %7984 = vst [vmem:[#allocation197_spill] sm:$0xff] %v6324_v52  ;;  %v6334_v62 = vld [vmem:[%s7791_s5 + $0x6f0] sm:$0xff]  ;;  %v6339_v63 = vld [vmem:[%s7791_s5 + $0x6f8] sm:$0xff] }
  0x6a   :  { %7985 = vst [vmem:[#allocation198_spill] sm:$0xff] %v6329_v60  ;;  %7986 = vst [vmem:[#allocation199_spill] sm:$0xff] %v6334_v62  ;;  %v6344_v61 = vld [vmem:[%s7791_s5 + $0x700] sm:$0xff]  ;;  %v6349_v52 = vld [vmem:[%s7791_s5 + $0x708] sm:$0xff] }
  0x6b   :  { %7987 = vst [vmem:[#allocation200_spill] sm:$0xff] %v6339_v63  ;;  %7988 = vst [vmem:[#allocation201_spill] sm:$0xff] %v6344_v61  ;;  %v6354_v60 = vld [vmem:[%s7791_s5 + $0x710] sm:$0xff]  ;;  %v6359_v62 = vld [vmem:[%s7791_s5 + $0x718] sm:$0xff] }
  0x6c   :  { %7989 = vst [vmem:[#allocation202_spill] sm:$0xff] %v6349_v52  ;;  %7990 = vst [vmem:[#allocation203_spill] sm:$0xff] %v6354_v60  ;;  %v6364_v63 = vld [vmem:[%s7791_s5 + $0x720] sm:$0xff]  ;;  %v6369_v61 = vld [vmem:[%s7791_s5 + $0x728] sm:$0xff] }
  0x6d   :  { %7991 = vst [vmem:[#allocation204_spill] sm:$0xff] %v6359_v62  ;;  %7992 = vst [vmem:[#allocation205_spill] sm:$0xff] %v6364_v63  ;;  %v6374_v52 = vld [vmem:[%s7791_s5 + $0x730] sm:$0xff]  ;;  %v6379_v60 = vld [vmem:[%s7791_s5 + $0x738] sm:$0xff] }
  0x6e   :  { %7993 = vst [vmem:[#allocation206_spill] sm:$0xff] %v6369_v61  ;;  %7994 = vst [vmem:[#allocation207_spill] sm:$0xff] %v6374_v52  ;;  %v6384_v62 = vld [vmem:[%s7791_s5 + $0x740] sm:$0xff]  ;;  %v6389_v63 = vld [vmem:[%s7791_s5 + $0x748] sm:$0xff] }
  0x6f   :  { %7995 = vst [vmem:[#allocation208_spill] sm:$0xff] %v6379_v60  ;;  %7996 = vst [vmem:[#allocation209_spill] sm:$0xff] %v6384_v62  ;;  %v6394_v61 = vld [vmem:[%s7791_s5 + $0x750] sm:$0xff]  ;;  %v6399_v52 = vld [vmem:[%s7791_s5 + $0x758] sm:$0xff] }
  0x70   :  { %7997 = vst [vmem:[#allocation210_spill] sm:$0xff] %v6389_v63  ;;  %7998 = vst [vmem:[#allocation211_spill] sm:$0xff] %v6394_v61  ;;  %v6404_v60 = vld [vmem:[%s7791_s5 + $0x760] sm:$0xff]  ;;  %v6409_v62 = vld [vmem:[%s7791_s5 + $0x768] sm:$0xff] }
  0x71   :  { %7999 = vst [vmem:[#allocation212_spill] sm:$0xff] %v6399_v52  ;;  %8000 = vst [vmem:[#allocation213_spill] sm:$0xff] %v6404_v60  ;;  %v6414_v63 = vld [vmem:[%s7791_s5 + $0x770] sm:$0xff]  ;;  %v6419_v61 = vld [vmem:[%s7791_s5 + $0x778] sm:$0xff] }
  0x72   :  { %8001 = vst [vmem:[#allocation214_spill] sm:$0xff] %v6409_v62  ;;  %8002 = vst [vmem:[#allocation215_spill] sm:$0xff] %v6414_v63  ;;  %v6424_v52 = vld [vmem:[%s7791_s5 + $0x780] sm:$0xff]  ;;  %v6429_v60 = vld [vmem:[%s7791_s5 + $0x788] sm:$0xff] }
  0x73   :  { %8003 = vst [vmem:[#allocation216_spill] sm:$0xff] %v6419_v61  ;;  %8004 = vst [vmem:[#allocation217_spill] sm:$0xff] %v6424_v52  ;;  %v6434_v62 = vld [vmem:[%s7791_s5 + $0x790] sm:$0xff]  ;;  %v6439_v63 = vld [vmem:[%s7791_s5 + $0x798] sm:$0xff] }
  0x74   :  { %8005 = vst [vmem:[#allocation218_spill] sm:$0xff] %v6429_v60  ;;  %8006 = vst [vmem:[#allocation219_spill] sm:$0xff] %v6434_v62  ;;  %v6444_v61 = vld [vmem:[%s7791_s5 + $0x7a0] sm:$0xff]  ;;  %v6449_v52 = vld [vmem:[%s7791_s5 + $0x7a8] sm:$0xff] }
  0x75   :  { %8007 = vst [vmem:[#allocation220_spill] sm:$0xff] %v6439_v63  ;;  %8008 = vst [vmem:[#allocation221_spill] sm:$0xff] %v6444_v61  ;;  %v6454_v60 = vld [vmem:[%s7791_s5 + $0x7b0] sm:$0xff]  ;;  %v6459_v62 = vld [vmem:[%s7791_s5 + $0x7b8] sm:$0xff] }
  0x76   :  { %8009 = vst [vmem:[#allocation222_spill] sm:$0xff] %v6449_v52  ;;  %8010 = vst [vmem:[#allocation223_spill] sm:$0xff] %v6454_v60  ;;  %v6464_v63 = vld [vmem:[%s7791_s5 + $0x7c0] sm:$0xff]  ;;  %v6469_v61 = vld [vmem:[%s7791_s5 + $0x7c8] sm:$0xff] }
  0x77   :  { %8011 = vst [vmem:[#allocation224_spill] sm:$0xff] %v6459_v62  ;;  %8012 = vst [vmem:[#allocation225_spill] sm:$0xff] %v6464_v63  ;;  %v6474_v52 = vld [vmem:[%s7791_s5 + $0x7d0] sm:$0xff]  ;;  %v6479_v60 = vld [vmem:[%s7791_s5 + $0x7d8] sm:$0xff] }
  0x78   :  { %8013 = vst [vmem:[#allocation226_spill] sm:$0xff] %v6469_v61  ;;  %8014 = vst [vmem:[#allocation227_spill] sm:$0xff] %v6474_v52  ;;  %v6484_v62 = vld [vmem:[%s7791_s5 + $0x7e0] sm:$0xff]  ;;  %v6489_v63 = vld [vmem:[%s7791_s5 + $0x7e8] sm:$0xff] }
  0x79   :  { %8015 = vst [vmem:[#allocation228_spill] sm:$0xff] %v6479_v60  ;;  %8016 = vst [vmem:[#allocation229_spill] sm:$0xff] %v6484_v62  ;;  %v6494_v61 = vld [vmem:[%s7791_s5 + $0x7f0] sm:$0xff]  ;;  %v6499_v52 = vld [vmem:[%s7791_s5 + $0x7f8] sm:$0xff] }
  0x7a   :  { %8017 = vst [vmem:[#allocation230_spill] sm:$0xff] %v6489_v63  ;;  %8018 = vst [vmem:[#allocation231_spill] sm:$0xff] %v6494_v61  ;;  %v6504_v60 = vld [vmem:[%s7791_s5 + $0x800] sm:$0xff]  ;;  %v6509_v62 = vld [vmem:[%s7791_s5 + $0x808] sm:$0xff] }
  0x7b   :  { %8019 = vst [vmem:[#allocation232_spill] sm:$0xff] %v6499_v52  ;;  %8020 = vst [vmem:[#allocation233_spill] sm:$0xff] %v6504_v60  ;;  %v6514_v63 = vld [vmem:[%s7791_s5 + $0x810] sm:$0xff]  ;;  %v6519_v61 = vld [vmem:[%s7791_s5 + $0x818] sm:$0xff] }
  0x7c   :  { %8021 = vst [vmem:[#allocation234_spill] sm:$0xff] %v6509_v62  ;;  %8022 = vst [vmem:[#allocation235_spill] sm:$0xff] %v6514_v63  ;;  %v6524_v52 = vld [vmem:[%s7791_s5 + $0x820] sm:$0xff]  ;;  %v6529_v60 = vld [vmem:[%s7791_s5 + $0x828] sm:$0xff] }
  0x7d   :  { %8023 = vst [vmem:[#allocation236_spill] sm:$0xff] %v6519_v61  ;;  %8024 = vst [vmem:[#allocation237_spill] sm:$0xff] %v6524_v52  ;;  %v6534_v62 = vld [vmem:[%s7791_s5 + $0x830] sm:$0xff]  ;;  %v6539_v63 = vld [vmem:[%s7791_s5 + $0x838] sm:$0xff] }
  0x7e   :  { %8025 = vst [vmem:[#allocation238_spill] sm:$0xff] %v6529_v60  ;;  %8026 = vst [vmem:[#allocation239_spill] sm:$0xff] %v6534_v62  ;;  %v6544_v61 = vld [vmem:[%s7791_s5 + $0x840] sm:$0xff]  ;;  %v6549_v52 = vld [vmem:[%s7791_s5 + $0x848] sm:$0xff] }
  0x7f   :  { %8027 = vst [vmem:[#allocation240_spill] sm:$0xff] %v6539_v63  ;;  %8028 = vst [vmem:[#allocation241_spill] sm:$0xff] %v6544_v61  ;;  %v6554_v60 = vld [vmem:[%s7791_s5 + $0x850] sm:$0xff]  ;;  %v6559_v62 = vld [vmem:[%s7791_s5 + $0x858] sm:$0xff] }
  0x80   :  { %8029 = vst [vmem:[#allocation242_spill] sm:$0xff] %v6549_v52  ;;  %8030 = vst [vmem:[#allocation243_spill] sm:$0xff] %v6554_v60  ;;  %v6564_v63 = vld [vmem:[%s7791_s5 + $0x860] sm:$0xff]  ;;  %v6569_v61 = vld [vmem:[%s7791_s5 + $0x868] sm:$0xff] }
  0x81   :  { %8031 = vst [vmem:[#allocation244_spill] sm:$0xff] %v6559_v62  ;;  %8032 = vst [vmem:[#allocation245_spill] sm:$0xff] %v6564_v63  ;;  %v6574_v52 = vld [vmem:[%s7791_s5 + $0x870] sm:$0xff]  ;;  %v6579_v60 = vld [vmem:[%s7791_s5 + $0x878] sm:$0xff] }
  0x82   :  { %8033 = vst [vmem:[#allocation246_spill] sm:$0xff] %v6569_v61  ;;  %8034 = vst [vmem:[#allocation247_spill] sm:$0xff] %v6574_v52  ;;  %v6584_v62 = vld [vmem:[%s7791_s5 + $0x880] sm:$0xff]  ;;  %v6589_v63 = vld [vmem:[%s7791_s5 + $0x888] sm:$0xff] }
  0x83   :  { %8035 = vst [vmem:[#allocation248_spill] sm:$0xff] %v6579_v60  ;;  %8036 = vst [vmem:[#allocation249_spill] sm:$0xff] %v6584_v62  ;;  %v6594_v61 = vld [vmem:[%s7791_s5 + $0x890] sm:$0xff]  ;;  %v6599_v52 = vld [vmem:[%s7791_s5 + $0x898] sm:$0xff] }
  0x84   :  { %8037 = vst [vmem:[#allocation250_spill] sm:$0xff] %v6589_v63  ;;  %8038 = vst [vmem:[#allocation251_spill] sm:$0xff] %v6594_v61  ;;  %v6604_v60 = vld [vmem:[%s7791_s5 + $0x8a0] sm:$0xff]  ;;  %v6609_v62 = vld [vmem:[%s7791_s5 + $0x8a8] sm:$0xff] }
  0x85   :  { %8039 = vst [vmem:[#allocation252_spill] sm:$0xff] %v6599_v52  ;;  %8040 = vst [vmem:[#allocation253_spill] sm:$0xff] %v6604_v60  ;;  %v6614_v63 = vld [vmem:[%s7791_s5 + $0x8b0] sm:$0xff]  ;;  %v6619_v61 = vld [vmem:[%s7791_s5 + $0x8b8] sm:$0xff] }
  0x86   :  { %8041 = vst [vmem:[#allocation254_spill] sm:$0xff] %v6609_v62  ;;  %8042 = vst [vmem:[#allocation255_spill] sm:$0xff] %v6614_v63  ;;  %v6624_v52 = vld [vmem:[%s7791_s5 + $0x8c0] sm:$0xff]  ;;  %v6629_v60 = vld [vmem:[%s7791_s5 + $0x8c8] sm:$0xff] }
  0x87   :  { %8043 = vst [vmem:[#allocation256_spill] sm:$0xff] %v6619_v61  ;;  %8044 = vst [vmem:[#allocation257_spill] sm:$0xff] %v6624_v52  ;;  %v6634_v62 = vld [vmem:[%s7791_s5 + $0x8d0] sm:$0xff]  ;;  %v6639_v63 = vld [vmem:[%s7791_s5 + $0x8d8] sm:$0xff] }
  0x88   :  { %8045 = vst [vmem:[#allocation258_spill] sm:$0xff] %v6629_v60  ;;  %8046 = vst [vmem:[#allocation259_spill] sm:$0xff] %v6634_v62  ;;  %v6644_v61 = vld [vmem:[%s7791_s5 + $0x8e0] sm:$0xff]  ;;  %v6649_v52 = vld [vmem:[%s7791_s5 + $0x8e8] sm:$0xff] }
  0x89   :  { %8047 = vst [vmem:[#allocation260_spill] sm:$0xff] %v6639_v63  ;;  %8048 = vst [vmem:[#allocation261_spill] sm:$0xff] %v6644_v61  ;;  %v6654_v60 = vld [vmem:[%s7791_s5 + $0x8f0] sm:$0xff]  ;;  %v6659_v62 = vld [vmem:[%s7791_s5 + $0x8f8] sm:$0xff] }
  0x8a   :  { %8049 = vst [vmem:[#allocation262_spill] sm:$0xff] %v6649_v52  ;;  %8050 = vst [vmem:[#allocation263_spill] sm:$0xff] %v6654_v60  ;;  %v664_v63 = vld [vmem:[%s7786_s0 + $0x2] sm:$0xff]  ;;  %v666_v61 = vld [vmem:[%s7786_s0 + $0x12] sm:$0xff] }
  0x8b   :  { %8051 = vst [vmem:[#allocation264_spill] sm:$0xff] %v6659_v62  ;;  %v665_v52 = vld [vmem:[%s7786_s0 + $0xa] sm:$0xff]  ;;  %672 = vrot.lane.b32.xlu0 %v664_v63, %s5154_s29  ;;  %676 = vrot.lane.b32.xlu1 %v666_v61, %s5154_s29  ;;  %v667_v62 = vld [vmem:[%s7786_s0 + $0x1a] sm:$0xf] }
  0x8c   :  { %653 = vsyncadd [#allocation7], 36864  ;;  %v4922_v60 = vld [vmem:[%s7787_s1 + $0x4] ss:$8 sps:$4 sm:$0xff]   ;;  %v4924_v51 = vld [vmem:[%s7787_s1] ss:$8 sps:$4 sm:$0xff]  }
  0x8d   :  { %872 = vmatprep.subr.bf16.mxu0 %v4922_v60  ;;  %v4925_v63 = vld [vmem:[%s7787_s1 + $0x14] ss:$8 sps:$4 sm:$0xff]   ;;  %v4927_v61 = vld [vmem:[%s7787_s1 + $0x10] ss:$8 sps:$4 sm:$0xff]   ;;  %v4928_v59 = vld [vmem:[%s7787_s1 + $0x24] ss:$8 sps:$4 sm:$0xff]  }
  0x8e   :  { %873 = vmatpush1.bf16.msra.mxu0 %v4924_v51  ;;  %v4930_v60 = vld [vmem:[%s7787_s1 + $0x20] ss:$8 sps:$4 sm:$0xff]   ;;  %vm658_vm0 = vcmask 523264   ;;  %v4933_v51 = vld [vmem:[%s7787_s1 + $0x30] ss:$8 sps:$4 sm:$0xff]   ;;  %vm662_vm1 = vcmask 519168  }
  0x8f   :  { %674 = vrot.lane.b32.xlu0 %v665_v52, %s5154_s29  ;;  %678 = vrot.lane.b32.xlu1 %v667_v62, %s5154_s29  ;;  %v4931_v52 = vld [vmem:[%s7787_s1 + $0x34] ss:$8 sps:$4 sm:$0xff]   ;;  %v654_v62 = vld [vmem:[%s7786_s0] sm:$0xff]  ;;  %vm684_vm2 = vcmask 1048064   ;;  %vm688_vm3 = vcmask 1043968   ;;  %vm934_vm4 = vcmask 785408  }
  0x90   :  { %874 = vmatprep.subr.bf16.mxu0 %v4925_v63  ;;  %v4934_v63 = vld [vmem:[%s7787_s1 + $0x44] ss:$8 sps:$4 sm:$0xff]   ;;  %659 = vst.msk [vmem:[#allocation2] sm:$0xff] %vm658_vm0, %v654_v62  ;;  %v657_v62 = vld [vmem:[%s7786_s0 + $0x18] sm:$0xf]  ;;  %vm971_vm5 = vcmask 1045504  }
  0x91   :  { %v4937_v53 = vld [vmem:[%s7787_s1 + $0x54] ss:$8 sps:$4 sm:$0xff]   ;;  %663 = vst.msk [vmem:[#allocation2 + $0x30] sm:$0xf] %vm662_vm1, %v657_v62  ;;  %v4942_v62 = vld [vmem:[%s7787_s1 + $0x60] ss:$8 sps:$4 sm:$0xff]  }
  0x92   :  { %875 = vmatpush1.bf16.msra.mxu0 %v4927_v61  ;;  %v655_v61 = vld [vmem:[%s7786_s0 + $0x8] sm:$0xff]  ;;  %v4943_v50 = vld [vmem:[%s7787_s1 + $0x74] ss:$8 sps:$4 sm:$0xff]   ;;  %v5010_v48 = vld [vmem:[%s7789_s3 + $0x138] ss:$12 sps:$4 sm:$0xff]   ;;  %vm941_vm6 = vcmask 781312  }
  0x93   :  { %876 = vmatprep.subr.bf16.mxu0 %v4928_v59  ;;  %v656_v59 = vld [vmem:[%s7786_s0 + $0x10] sm:$0xff]  ;;  %660 = vst.msk [vmem:[#allocation2 + $0x10] sm:$0xff] %vm658_vm0, %v655_v61  ;;  %v5014_v31 = vld [vmem:[%s7789_s3 + $0x158] ss:$12 sps:$4 sm:$0xff]   ;;  %vm1036_vm7 = vcmask 1043456   ;;  %s5155_s5 = smov 96  }
  0x94   :  { %661 = vst.msk [vmem:[#allocation2 + $0x20] sm:$0xff] %vm658_vm0, %v656_v59  ;;  %v4939_v59 = vld [vmem:[%s7787_s1 + $0x50] ss:$8 sps:$4 sm:$0xff]   ;;  %v5012_v47 = vld [vmem:[%s7789_s3 + $0x154] ss:$12 sps:$4 sm:$0xff]   ;;  %vm1010_vm8 = vcmask 1048320  }
  0x95   :  { %v691_v61 = vld [vmem:[%s7786_s0 + $0xc] sm:$0xff]  ;;  %vm1077_vm9 = vcmask 261120  }
  0x96   :  { %877 = vmatpush1.bf16.msra.mxu0 %v4930_v60  ;;  %v4936_v60 = vld [vmem:[%s7787_s1 + $0x40] ss:$8 sps:$4 sm:$0xff]   ;;  %695 = vst.msk [vmem:[#allocation2 + $0x18] sm:$0xff] %vm658_vm0, %v691_v61 }
  0x97   :  { %878 = vmatprep.subr.bf16.mxu0 %v4931_v52  ;;  %v693_v52 = vld [vmem:[%s7786_s0 + $0x1c] sm:$0xf] }
  0x98   :  { %697 = vst.msk [vmem:[#allocation2 + $0x38] sm:$0xf] %vm662_vm1, %v693_v52  ;;  %v4940_v52 = vld [vmem:[%s7787_s1 + $0x64] ss:$8 sps:$4 sm:$0xff]  }
  0x9a   :  { %879 = vmatpush1.bf16.msra.mxu0 %v4933_v51  ;;  %v690_v51 = vld [vmem:[%s7786_s0 + $0x4] sm:$0xff] }
  0x9b   :  { %880 = vmatprep.subr.bf16.mxu0 %v4934_v63  ;;  %v692_v63 = vld [vmem:[%s7786_s0 + $0x14] sm:$0xff]  ;;  %694 = vst.msk [vmem:[#allocation2 + $0x8] sm:$0xff] %vm658_vm0, %v690_v51 }
  0x9c   :  { %696 = vst.msk [vmem:[#allocation2 + $0x28] sm:$0xff] %vm658_vm0, %v692_v63  ;;  %v4945_v51 = vld [vmem:[%s7787_s1 + $0x70] ss:$8 sps:$4 sm:$0xff]   ;;  %v4949_v63 = vld [vmem:[%s7787_s1 + $0x94] ss:$8 sps:$4 sm:$0xff]  }
  0x9d   :  { %v701_v61 = vld [vmem:[#allocation2 + $0x18] sm:$0xff] }
  0x9e   :  { %881 = vmatpush1.bf16.msra.mxu0 %v4936_v60 }
  0x9f   :  { %882 = vmatprep.subr.bf16.mxu0 %v4937_v53  ;;  %v4946_v53 = vld [vmem:[%s7787_s1 + $0x84] ss:$8 sps:$4 sm:$0xff]  }
  0xa2   :  { %883 = vmatpush1.bf16.msra.mxu0 %v4939_v59  ;;  %v699_v58 = vld [vmem:[#allocation2 + $0x8] sm:$0xff] }
  0xa3   :  { %884 = vmatprep.subr.bf16.mxu0 %v4940_v52  ;;  %v707_v60 = vpack.c.bf16 %v701_v61, %v699_v58  ;;  %v4948_v59 = vld [vmem:[%s7787_s1 + $0x80] ss:$8 sps:$4 sm:$0xff]   ;;  %v4951_v52 = vld [vmem:[%s7787_s1 + $0x90] ss:$8 sps:$4 sm:$0xff]  }
  0xa4   :  { %v4954_v58 = vld [vmem:[%s7787_s1 + $0xa0] ss:$8 sps:$4 sm:$0xff]  }
  0xa5   :  { %3950 = vmatprep.mubr.msk.bf16.mxu0 %vm658_vm0, %v707_v60 }
  0xa6   :  { %885 = vmatpush1.bf16.msra.mxu0 %v4942_v62  ;;  %v4955_v62 = vld [vmem:[%s7787_s1 + $0xb4] ss:$8 sps:$4 sm:$0xff]  }
  0xa7   :  { %886 = vmatprep.subr.bf16.mxu0 %v4943_v50  ;;  %v4952_v50 = vld [vmem:[%s7787_s1 + $0xa4] ss:$8 sps:$4 sm:$0xff]  }
  0xaa   :  { %887 = vmatpush1.bf16.msra.mxu0 %v4945_v51  ;;  %v4957_v51 = vld [vmem:[%s7787_s1 + $0xb0] ss:$8 sps:$4 sm:$0xff]  }
  0xab   :  { %888 = vmatprep.subr.bf16.mxu0 %v4946_v53 }
  0xae   :  { %889 = vmatpush1.bf16.msra.mxu0 %v4948_v59 }
  0xaf   :  { %890 = vmatprep.subr.bf16.mxu0 %v4949_v63  ;;  %v703_v63 = vld [vmem:[#allocation2 + $0x28] sm:$0xff] }
  0xb2   :  { %891 = vmatpush1.bf16.msra.mxu0 %v4951_v52  ;;  %v705_v52 = vld [vmem:[#allocation2 + $0x38] sm:$0xf] }
  0xb3   :  { %892 = vmatprep.subr.bf16.mxu0 %v4952_v50 }
  0xb6   :  { %893 = vmatpush1.bf16.msra.mxu0 %v4954_v58  ;;  %v709_v58 = vpack.c.bf16 %v705_v52, %v703_v63  ;;  %v4984_v63 = vld [vmem:[%s7789_s3 + $0xc8] ss:$12 sps:$4 sm:$0xff]  }
  0xb7   :  { %894 = vmatprep.subr.bf16.mxu0 %v4955_v62  ;;  %v4986_v52 = vld [vmem:[%s7789_s3 + $0x8] ss:$12 sps:$4 sm:$0xff]  }
  0xba   :  { %895 = vmatpush1.bf16.msra.mxu0 %v4957_v51 }
  0xbb   :  { %4088 = vmatprep.subr.bf16.mxu0 %v4984_v63  ;;  %v4973_v63 = vld [vmem:[%s7789_s3 + $0x7c] ss:$12 sps:$4 sm:$0xff]  }
  0xfd   :  { %v673_v61 = vpop.permute.xlu0 %672  ;;  %v677_v53 = vpop.permute.xlu1 %676 }
  0xfe   :  { %685 = vst.msk [vmem:[#allocation2] sm:$0xff] %vm684_vm2, %v673_v61  ;;  %687 = vst.msk [vmem:[#allocation2 + $0x20] sm:$0xff] %vm684_vm2, %v677_v53  ;;  %v4958_v53 = vld [vmem:[%s7789_s3 + $0x4] ss:$12 sps:$4 sm:$0xff]  }
  0xff   :  { %1978 = vmatprep.subr.bf16.mxu1 %v4958_v53  ;;  %v4969_v53 = vld [vmem:[%s7789_s3 + $0x48] ss:$12 sps:$4 sm:$0xff]  }
 0x101   :  { %v675_v60 = vpop.permute.xlu0 %674  ;;  %v679_v59 = vpop.permute.xlu1 %678 }
 0x102   :  { %686 = vst.msk [vmem:[#allocation2 + $0x10] sm:$0xff] %vm684_vm2, %v675_v60  ;;  %v4960_v60 = vld [vmem:[%s7789_s3] ss:$12 sps:$4 sm:$0xff]  }
 0x103   :  { %689 = vst.msk [vmem:[#allocation2 + $0x30] sm:$0xf] %vm688_vm3, %v679_v59  ;;  %v4961_v59 = vld [vmem:[%s7789_s3 + $0x1c] ss:$12 sps:$4 sm:$0xff]   ;;  %1979 = vmatpush1.bf16.msra.mxu1 %v4960_v60  ;;  %v4970_v60 = vld [vmem:[%s7789_s3 + $0x64] ss:$12 sps:$4 sm:$0xff]  }
 0x104   :  { %1980 = vmatprep.subr.bf16.mxu1 %v4961_v59  ;;  %v4996_v59 = vld [vmem:[%s7789_s3 + $0x38] ss:$12 sps:$4 sm:$0xff]  }
 0x105   :  { %v698_v50 = vld [vmem:[#allocation2] sm:$0xff] }
 0x106   :  { %v702_v51 = vld [vmem:[#allocation2 + $0x20] sm:$0xff] }
 0x109   :  { %v700_v54 = vld [vmem:[#allocation2 + $0x10] sm:$0xff] }
 0x10a   :  { %v706_v62 = vpack.c.bf16 %v700_v54, %v698_v50  ;;  %v704_v49 = vld [vmem:[#allocation2 + $0x30] sm:$0xf]  ;;  %v4963_v54 = vld [vmem:[%s7789_s3 + $0x18] ss:$12 sps:$4 sm:$0xff]  }
 0x10b   :  { %v708_v61 = vpack.c.bf16 %v704_v49, %v702_v51  ;;  %v4964_v49 = vld [vmem:[%s7789_s3 + $0x34] ss:$12 sps:$4 sm:$0xff]   ;;  %1981 = vmatpush1.bf16.msra.mxu1 %v4963_v54  ;;  %v4966_v50 = vld [vmem:[%s7789_s3 + $0x30] ss:$12 sps:$4 sm:$0xff]  }
 0x10c   :  { %905 = vmatmul.mubr.bf16.vlgmr.msra.gmra.mrb[0].mxu0 %v706_v62  ;;  %1982 = vmatprep.subr.bf16.mxu1 %v4964_v49  ;;  %v4967_v62 = vld [vmem:[%s7789_s3 + $0x4c] ss:$12 sps:$4 sm:$0xff]   ;;  %v4999_v54 = vld [vmem:[%s7789_s3 + $0x110] ss:$12 sps:$4 sm:$0xff]  }
 0x10d   :  { %3951 = vmatprep.mubr.msk.bf16.mxu0 %vm658_vm0, %v709_v58  ;;  %v4989_v58 = vld [vmem:[%s7789_s3 + $0xe0] ss:$12 sps:$4 sm:$0xff]   ;;  %4089 = vmatpush3.bf16.msra.mxu0 %v4986_v52  ;;  %v5001_v52 = vld [vmem:[%s7789_s3 + $0x50] ss:$12 sps:$4 sm:$0xff]  }
 0x10e   :  { %v4991_v51 = vld [vmem:[%s7789_s3 + $0x20] ss:$12 sps:$4 sm:$0xff]   ;;  %4090 = vmatprep.subr.bf16.mxu0 %v4989_v58 }
 0x10f   :  { %1983 = vmatpush1.bf16.msra.mxu1 %v4966_v50  ;;  %v4972_v49 = vld [vmem:[%s7789_s3 + $0x60] ss:$12 sps:$4 sm:$0xff]   ;;  %v4975_v50 = vld [vmem:[%s7789_s3 + $0x78] ss:$12 sps:$4 sm:$0xff]  }
 0x110   :  { %1984 = vmatprep.subr.bf16.mxu1 %v4967_v62  ;;  %v4976_v58 = vld [vmem:[%s7789_s3 + $0x94] ss:$12 sps:$4 sm:$0xff]   ;;  %v4978_v62 = vld [vmem:[%s7789_s3 + $0x90] ss:$12 sps:$4 sm:$0xff]  }
 0x111   :  { %4091 = vmatpush3.bf16.msra.mxu0 %v4991_v51  ;;  %v4979_v51 = vld [vmem:[%s7789_s3 + $0xac] ss:$12 sps:$4 sm:$0xff]  }
 0x113   :  { %1985 = vmatpush1.bf16.msra.mxu1 %v4969_v53  ;;  %v4982_v53 = vld [vmem:[%s7789_s3 + $0xc4] ss:$12 sps:$4 sm:$0xff]  }
 0x114   :  { %915 = vmatmul.mubr.bf16.gmra.mrb[4].mxu0 %v708_v61  ;;  %v4994_v61 = vld [vmem:[%s7789_s3 + $0xf8] ss:$12 sps:$4 sm:$0xff]   ;;  %1986 = vmatprep.subr.bf16.mxu1 %v4970_v60  ;;  %v4985_v60 = vld [vmem:[%s7789_s3 + $0xc0] ss:$12 sps:$4 sm:$0xff]  }
 0x115   :  { %4092 = vmatprep.subr.bf16.mxu0 %v4994_v61  ;;  %v4981_v61 = vld [vmem:[%s7789_s3 + $0xa8] ss:$12 sps:$4 sm:$0xff]  }
 0x116   :  { %4093 = vmatpush3.bf16.msra.mxu0 %v4996_v59  ;;  %v4987_v59 = vld [vmem:[%s7789_s3 + $0xdc] ss:$12 sps:$4 sm:$0xff]  }
 0x117   :  { %4094 = vmatprep.subr.bf16.mxu0 %v4999_v54  ;;  %1987 = vmatpush1.bf16.msra.mxu1 %v4972_v49  ;;  %v4990_v54 = vld [vmem:[%s7789_s3 + $0xd8] ss:$12 sps:$4 sm:$0xff]   ;;  %v4992_v49 = vld [vmem:[%s7789_s3 + $0xf4] ss:$12 sps:$4 sm:$0xff]  }
 0x118   :  { %1988 = vmatprep.subr.bf16.mxu1 %v4973_v63  ;;  %v4995_v63 = vld [vmem:[%s7789_s3 + $0xf0] ss:$12 sps:$4 sm:$0xff]  }
 0x11a   :  { %4095 = vmatpush3.bf16.msra.mxu0 %v5001_v52  ;;  %v4997_v52 = vld [vmem:[%s7789_s3 + $0x10c] ss:$12 sps:$4 sm:$0xff]  }
 0x11b   :  { %1989 = vmatpush1.bf16.msra.mxu1 %v4975_v50  ;;  %v5000_v50 = vld [vmem:[%s7789_s3 + $0x108] ss:$12 sps:$4 sm:$0xff]  }
 0x11c   :  { %1990 = vmatprep.subr.bf16.mxu1 %v4976_v58  ;;  %v736_v58 = vlaneseq }
 0x11f   :  { %1991 = vmatpush1.bf16.msra.mxu1 %v4978_v62  ;;  %v6880_v62 = vshrl.u32 %v736_v58, 7  ;;  %v5007_v58 = vld [vmem:[%s7789_s3 + $0x13c] ss:$12 sps:$4 sm:$0xff]  }
 0x120   :  { %1992 = vmatprep.subr.bf16.mxu1 %v4979_v51 }
 0x121   :  { %v7798_v51 = vsub.s32 0, %v6880_v62 }
 0x123   :  { %1993 = vmatpush1.bf16.msra.mxu1 %v4981_v61  ;;  %v734_v61 = vld [vmem:[%s7788_s2] sm:$0x3] }
 0x124   :  { %1994 = vmatprep.subr.bf16.mxu1 %v4982_v53  ;;  %v7799_v53 = vsub.s32 1, %v6880_v62 }
 0x127   :  { %1995 = vmatpush1.bf16.msra.mxu1 %v4985_v60  ;;  %v5002_v60 = vld [vmem:[%s7789_s3 + $0x124] ss:$12 sps:$4 sm:$0xff]  }
 0x128   :  { %1996 = vmatprep.subr.bf16.mxu1 %v4987_v59  ;;  %v5004_v59 = vld [vmem:[%s7789_s3 + $0x128] ss:$12 sps:$4 sm:$0xff]  }
 0x129   :  { %4096 = vmatprep.subr.bf16.mxu0 %v5004_v59 }
 0x12b   :  { %1997 = vmatpush1.bf16.msra.mxu1 %v4990_v54  ;;  %v739_v54 = vrot.slane %v734_v61, %v7798_v51  ;;  %v5009_v51 = vld [vmem:[%s7789_s3 + $0x140] ss:$12 sps:$4 sm:$0xff]  }
 0x12c   :  { %1998 = vmatprep.subr.bf16.mxu1 %v4992_v49  ;;  %v5005_v49 = vld [vmem:[%s7789_s3 + $0x120] ss:$12 sps:$4 sm:$0xff]  }
 0x12f   :  { %1999 = vmatpush1.bf16.msra.mxu1 %v4995_v63  ;;  %v5006_v63 = vld [vmem:[%s7789_s3 + $0x68] ss:$12 sps:$4 sm:$0xff]  }
 0x130   :  { %2000 = vmatprep.subr.bf16.mxu1 %v4997_v52  ;;  %v743_v52 = vrot.slane %v734_v61, %v7799_v53  ;;  %4097 = vmatpush3.bf16.msra.mxu0 %v5006_v63  ;;  %v5011_v61 = vld [vmem:[%s7789_s3 + $0x80] ss:$12 sps:$4 sm:$0xff]  }
 0x131   :  { %4098 = vmatprep.subr.bf16.mxu0 %v5009_v51 }
 0x133   :  { %2001 = vmatpush1.bf16.msra.mxu1 %v5000_v50 }
 0x134   :  { %2002 = vmatprep.subr.bf16.mxu1 %v5002_v60  ;;  %4099 = vmatpush3.bf16.msra.mxu0 %v5011_v61  ;;  %v5017_v61 = vld [vmem:[%s7789_s3 + $0x16c] ss:$12 sps:$4 sm:$0xff]  }
 0x135   :  { %4100 = vmatprep.subr.bf16.mxu0 %v5014_v31  ;;  %v5020_v31 = vld [vmem:[%s7789_s3 + $0x168] ss:$12 sps:$4 sm:$0xff]  }
 0x137   :  { %2003 = vmatpush1.bf16.msra.mxu1 %v5005_v49 }
 0x138   :  { %2004 = vmatprep.subr.bf16.mxu1 %v5007_v58 }
 0x13b   :  { %2005 = vmatpush1.bf16.msra.mxu1 %v5010_v48  ;;  %v5016_v48 = vld [vmem:[%s7789_s3 + $0x98] ss:$12 sps:$4 sm:$0xff]  }
 0x13c   :  { %2006 = vmatprep.subr.bf16.mxu1 %v5012_v47  ;;  %4101 = vmatpush3.bf16.msra.mxu0 %v5016_v48  ;;  %v5021_v47 = vld [vmem:[%s7789_s3 + $0xb0] ss:$12 sps:$4 sm:$0xff]  }
 0x1df   :  { %v906_v50 = vpop.f32.mrb[0].mxu0 }
 0x1e0   :  { %v907_v57 = vadd.f32 %v906_v50, %v739_v54  ;;  %v908_v55 = vpop.f32.mrb[1].mxu0 }
 0x1e1   :  { %v909_v60 = vadd.f32 %v908_v55, %v743_v52  ;;  %v910_v59 = vpop.f32.mrb[2].mxu0 }
 0x1e2   :  { %v925_v49 = vmax.f32 %v907_v57, 0.0  ;;  %v911_v63 = vadd.f32 %v910_v59, %v739_v54  ;;  %v912_v53 = vpop.f32.mrb[3].mxu0  ;;  %v5015_v57 = vld [vmem:[%s7789_s3 + $0x150] ss:$12 sps:$4 sm:$0xff]  }
 0x1e3   :  { %v926_v50 = vmax.f32 %v909_v60, 0.0  ;;  %v913_v56 = vadd.f32 %v912_v53, %v743_v52  ;;  %2007 = vmatpush1.bf16.msra.mxu1 %v5015_v57  ;;  %v5019_v60 = vld [vmem:[%s7789_s3 + $0x170] ss:$12 sps:$4 sm:$0xff]  }
 0x1e4   :  { %933 = vst [vmem:[#allocation3] sm:$0xff] %v925_v49  ;;  %v6921_v55 = vmax.f32 %v911_v63, 0.0  ;;  %2008 = vmatprep.subr.bf16.mxu1 %v5017_v61  ;;  %4102 = vmatprep.subr.bf16.mxu0 %v5019_v60 }
 0x1e5   :  { %935 = vst.msk [vmem:[#allocation3 + $0x8] sm:$0xff] %vm934_vm4, %v926_v50  ;;  %v928_v51 = vmax.f32 %v913_v56, 0.0  ;;  %4103 = vmatpush3.bf16.msra.mxu0 %v5021_v47 }
 0x1e6   :  { %v6931_v53 = vpack.c.bf16 %v6921_v55, %v925_v49  ;;  %v973_v38 = vrot.slane %v6921_v55, 2 }
 0x1e7   :  { %937 = vst.msk [vmem:[#allocation3 + $0x18] sm:$0xff] %vm934_vm4, %v928_v51  ;;  %v916_v58 = vpop.f32.mrb[4].mxu0  ;;  %2009 = vmatpush1.bf16.msra.mxu1 %v5020_v31 }
 0x1e8   :  { %v917_v59 = vadd.f32 %v916_v58, %v739_v54  ;;  %v918_v56 = vpop.f32.mrb[5].mxu0 }
 0x1e9   :  { %v919_v49 = vadd.f32 %v918_v56, %v743_v52  ;;  %v920_v63 = vpop.f32.mrb[6].mxu0 }
 0x1ea   :  { %v6946_v50 = vmax.f32 %v917_v59, 0.0  ;;  %v921_v57 = vadd.f32 %v920_v63, %v739_v54  ;;  %v922_v48 = vpop.f32.mrb[7].mxu0  ;;  %v1038_v54 = vrot.slane %v6921_v55, 4 }
 0x1eb   :  { %v930_v51 = vmax.f32 %v919_v49, 0.0  ;;  %v923_v58 = vadd.f32 %v922_v48, %v743_v52  ;;  %v955_v39 = vld [vmem:[#allocation3] sm:$0xfc] }
 0x1ec   :  { %v931_v46 = vmax.f32 %v921_v57, 0.0  ;;  %v972_v30 = vrot.slane %v955_v39, 2  ;;  %v978_v56 = vrot.slane %v6946_v50, 2  ;;  %v956_v61 = vld [vmem:[#allocation3 + $0x8] sm:$0xfc]  ;;  %v1043_v59 = vrot.slane %v6946_v50, 4 }
 0x1ed   :  { %939 = vst.msk [vmem:[#allocation3 + $0x28] sm:$0xff] %vm934_vm4, %v930_v51  ;;  %v932_v60 = vmax.f32 %v923_v58, 0.0  ;;  %v944_v31 = vld [vmem:[#allocation3 + $0x8] sm:$0xff]  ;;  %v5024_v39 = vld [vmem:[%s7789_s3 + $0x184] ss:$12 sps:$4 sm:$0xff]   ;;  %v975_v55 = vrot.slane %v956_v61, 2 }
 0x1ee   :  { %940 = vst [vmem:[#allocation3 + $0x30] sm:$0xf] %v931_v46  ;;  %v974_v52 = vsel %vm971_vm5, %v972_v30, %v973_v38  ;;  %v979_v47 = vsel %vm971_vm5, %v973_v38, %v978_v56  ;;  %v958_v49 = vld [vmem:[#allocation3 + $0x18] sm:$0xff]  ;;  %950 = vst.msk [vmem:[#allocation4 + $0x8] sm:$0xff] %vm934_vm4, %v944_v31  ;;  %v1020_v63 = vld [vmem:[#allocation3] sm:$0xf0]  ;;  %v1044_v30 = vsel %vm1036_vm7, %v1038_v54, %v1043_v59  ;;  %2029 = vmatprep.subr.bf16.mxu1 %v5024_v39 }
 0x1ef   :  { %942 = vst.msk [vmem:[#allocation3 + $0x38] sm:$0xf] %vm941_vm6, %v932_v60  ;;  %986 = vrot.lane.b32.xlu0 %v974_v52, %s5155_s5  ;;  %990 = vrot.lane.b32.xlu1 %v979_v47, %s5155_s5  ;;  %v976_v46 = vrot.slane %v958_v49, 2  ;;  %v5025_v38 = vld [vmem:[%s7789_s3 + $0x248] ss:$12 sps:$4 sm:$0xff]   ;;  %v1037_v48 = vrot.slane %v1020_v63, 4 }
 0x1f0   :  { %952 = vst.msk [vmem:[#allocation4 + $0x38] sm:$0xff] %vm934_vm4, %v958_v49  ;;  %4116 = vmatprep.subr.bf16.mxu0 %v5025_v38  ;;  %v1021_v63 = vld [vmem:[#allocation3 + $0x8] sm:$0xf0]  ;;  %v1041_v38 = vrot.slane %v958_v49, 4 }
 0x1f1   :  { %v977_v57 = vsel %vm971_vm5, %v975_v55, %v976_v46  ;;  %v1039_v60 = vsel %vm1036_vm7, %v1037_v48, %v1038_v54  ;;  %v1040_v45 = vrot.slane %v1021_v63, 4  ;;  %v5022_v63 = vld [vmem:[%s7789_s3 + $0x180] ss:$12 sps:$4 sm:$0xff]  }
 0x1f3   :  { %988 = vrot.lane.b32.xlu1 %v977_v57, %s5155_s5  ;;  %v1042_v48 = vsel %vm1036_vm7, %v1040_v45, %v1041_v38 }
 0x1f4   :  { %v960_v51 = vld [vmem:[#allocation3 + $0x28] sm:$0xff] }
 0x1f5   :  { %v961_v58 = vld [vmem:[#allocation3 + $0x30] sm:$0x3]  ;;  %954 = vst.msk [vmem:[#allocation4 + $0x68] sm:$0xff] %vm934_vm4, %v960_v51  ;;  %v980_v52 = vrot.slane %v960_v51, 2 }
 0x1f6   :  { %v982_v61 = vrot.slane %v961_v58, 2  ;;  %v962_v31 = vld [vmem:[#allocation3 + $0x38] sm:$0x3]  ;;  %v1026_v54 = vld [vmem:[#allocation3 + $0x30] sm:$0xf] }
 0x1f7   :  { %1051 = vrot.lane.b32.xlu1 %v1039_v60, %s5154_s29  ;;  %v984_v47 = vrot.slane %v962_v31, 2  ;;  %v1027_v57 = vld [vmem:[#allocation3 + $0x38] sm:$0xf]  ;;  %v981_v58 = vsel %vm971_vm5, %v976_v46, %v980_v52 }
 0x1f8   :  { %v983_v39 = vsel %vm971_vm5, %v978_v56, %v982_v61  ;;  %v1049_v60 = vrot.slane %v1027_v57, 4  ;;  %v1047_v56 = vrot.slane %v1026_v54, 4  ;;  %v1045_v61 = vrot.slane %v960_v51, 4  ;;  %v5030_v54 = vld [vmem:[%s7789_s3 + $0x260] ss:$12 sps:$4 sm:$0xff]  }
 0x1f9   :  { %994 = vrot.lane.b32.xlu0 %v983_v39, %s5155_s5  ;;  %v985_v55 = vsel %vm971_vm5, %v980_v52, %v984_v47 }
 0x1fa   :  { %v1050_v49 = vsel %vm1036_vm7, %v1045_v61, %v1049_v60  ;;  %v1048_v31 = vsel %vm1036_vm7, %v1043_v59, %v1047_v56  ;;  %v1046_v46 = vsel %vm1036_vm7, %v1041_v38, %v1045_v61  ;;  %v5026_v38 = vld [vmem:[%s7789_s3 + $0x188] ss:$12 sps:$4 sm:$0xff]   ;;  %v5027_v56 = vld [vmem:[%s7789_s3 + $0x198] ss:$12 sps:$4 sm:$0xff]   ;;  %v5031_v61 = vld [vmem:[%s7789_s3 + $0x1a0] ss:$12 sps:$4 sm:$0xff]  }
 0x1fb   :  { %996 = vrot.lane.b32.xlu1 %v985_v55, %s5155_s5 }
 0x1fd   :  { %992 = vrot.lane.b32.xlu0 %v981_v58, %s5155_s5  ;;  %v5029_v58 = vld [vmem:[%s7789_s3 + $0x19c] ss:$12 sps:$4 sm:$0xff]  }
 0x1ff   :  { %1053 = vrot.lane.b32.xlu1 %v1042_v48, %s5154_s29 }
 0x201   :  { %1055 = vrot.lane.b32.xlu0 %v1044_v30, %s5154_s29 }
 0x203   :  { %1061 = vrot.lane.b32.xlu1 %v1050_v49, %s5154_s29 }
 0x205   :  { %1059 = vrot.lane.b32.xlu0 %v1048_v31, %s5154_s29  ;;  %v5035_v31 = vld [vmem:[%s7789_s3 + $0x278] ss:$12 sps:$4 sm:$0xff]  }
 0x209   :  { %1057 = vrot.lane.b32.xlu0 %v1046_v46, %s5154_s29 }
 0x261   :  { %v987_v45 = vpop.permute.xlu0 %986  ;;  %v991_v52 = vpop.permute.xlu1 %990 }
 0x262   :  { %1011 = vst.msk [vmem:[#allocation4 + $0x8] sm:$0xff] %vm1010_vm8, %v987_v45  ;;  %1014 = vst.msk [vmem:[#allocation4 + $0x38] sm:$0xff] %vm1010_vm8, %v991_v52 }
 0x265   :  { %v989_v30 = vpop.permute.xlu1 %988 }
 0x266   :  { %v6990_v51 = vsel %vm934_vm4, %v987_v45, %v989_v30  ;;  %1013 = vst.msk [vmem:[#allocation4 + $0x18] sm:$0xff] %vm658_vm0, %v989_v30 }
 0x269   :  { %v1052_v59 = vpop.permute.xlu1 %1051  ;;  %v1086_v47 = vld [vmem:[#allocation4 + $0x8] sm:$0xff]  ;;  %v1092_v39 = vld [vmem:[#allocation4 + $0x38] sm:$0xff] }
 0x26a   :  { %1075 = vst.msk [vmem:[#allocation4 + $0x18] sm:$0xff] %vm684_vm2, %v1052_v59  ;;  %v1104_v55 = vpack.c.bf16 %v1092_v39, %v1086_v47 }
 0x26b   :  { %v995_v57 = vpop.permute.xlu0 %994 }
 0x26c   :  { %1017 = vst.msk [vmem:[#allocation4 + $0x68] sm:$0xff] %vm1010_vm8, %v995_v57  ;;  %2010 = vmatprep.mubr.bf16.mxu1 %v1104_v55  ;;  %2163 = vmatprep.mubr.bf16.mxu0 %v1104_v55 }
 0x26d   :  { %v997_v48 = vpop.permute.xlu1 %996  ;;  %2011 = vmatmul.mubr.bf16.vlgmr.msra.gmra.mrb[0].mxu1 %v6931_v53  ;;  %2164 = vmatmul.mubr.bf16.vlgmr.msra.gmra.mrb[8].mxu0 %v6931_v53  ;;  %v5034_v53 = vld [vmem:[%s7789_s3 + $0x1b4] ss:$12 sps:$4 sm:$0xff]  }
 0x26e   :  { %v7010_v60 = vsel %vm934_vm4, %v995_v57, %v997_v48  ;;  %1019 = vst.msk [vmem:[#allocation4 + $0x78] sm:$0xff] %vm658_vm0, %v997_v48  ;;  %2030 = vmatpush1.bf16.msra.mxu1 %v5022_v63  ;;  %4117 = vmatpush3.bf16.msra.mxu0 %v5026_v38  ;;  %v1109_v38 = vpack.c.bf16 %v6946_v50, %v6946_v50  ;;  %v5039_v57 = vld [vmem:[%s7789_s3 + $0x1cc] ss:$12 sps:$4 sm:$0xff]   ;;  %v5037_v50 = vld [vmem:[%s7789_s3 + $0x1c8] ss:$12 sps:$4 sm:$0xff]  }
 0x26f   :  { %v993_v49 = vpop.permute.xlu0 %992  ;;  %2031 = vmatprep.subr.bf16.mxu1 %v5029_v58  ;;  %4118 = vmatprep.subr.bf16.mxu0 %v5030_v54  ;;  %v5040_v58 = vld [vmem:[%s7789_s3 + $0x290] ss:$12 sps:$4 sm:$0xff]  }
 0x270   :  { %v7026_v46 = vsel %vm934_vm4, %v991_v52, %v993_v49  ;;  %1016 = vst.msk [vmem:[#allocation4 + $0x48] sm:$0xff] %vm658_vm0, %v993_v49  ;;  %v5032_v52 = vld [vmem:[%s7789_s3 + $0x1b0] ss:$12 sps:$4 sm:$0xff]   ;;  %v5045_v49 = vld [vmem:[%s7789_s3 + $0x2a8] ss:$12 sps:$4 sm:$0xff]  }
 0x271   :  { %v1054_v45 = vpop.permute.xlu1 %1053 }
 0x272   :  { %v7030_v30 = vsel %vm658_vm0, %v1052_v59, %v1054_v45  ;;  %1078 = vst.msk [vmem:[#allocation4 + $0x28] sm:$0xff] %vm1077_vm9, %v1054_v45  ;;  %2032 = vmatpush1.bf16.msra.mxu1 %v5027_v56  ;;  %4119 = vmatpush3.bf16.msra.mxu0 %v5031_v61  ;;  %v5036_v59 = vld [vmem:[%s7789_s3 + $0x1b8] ss:$12 sps:$4 sm:$0xff]   ;;  %v5041_v56 = vld [vmem:[%s7789_s3 + $0x1d0] ss:$12 sps:$4 sm:$0xff]  }
 0x273   :  { %v1056_v47 = vpop.permute.xlu0 %1055  ;;  %v1098_v39 = vld [vmem:[#allocation4 + $0x68] sm:$0xff]  ;;  %2033 = vmatprep.subr.bf16.mxu1 %v5034_v53  ;;  %4120 = vmatprep.subr.bf16.mxu0 %v5035_v31  ;;  %v5044_v61 = vld [vmem:[%s7789_s3 + $0x1e4] ss:$12 sps:$4 sm:$0xff]   ;;  %v1088_v31 = vld [vmem:[#allocation4 + $0x18] sm:$0xff] }
 0x274   :  { %1079 = vst.msk [vmem:[#allocation4 + $0x48] sm:$0xff] %vm684_vm2, %v1056_v47  ;;  %v1110_v55 = vpack.c.bf16 %v1098_v39, %v1098_v39 }
 0x275   :  { %v1062_v63 = vpop.permute.xlu1 %1061 }
 0x276   :  { %2020 = vmatprep.mubr.bf16.mxu1 %v1110_v55  ;;  %2171 = vmatprep.mubr.bf16.mxu0 %v1110_v55  ;;  %1084 = vst.msk [vmem:[#allocation4 + $0x88] sm:$0xff] %vm1077_vm9, %v1062_v63 }
 0x277   :  { %v1060_v54 = vpop.permute.xlu0 %1059  ;;  %2021 = vmatmul.mubr.bf16.gmra.mrb[4].mxu1 %v1109_v38  ;;  %2172 = vmatmul.mubr.bf16.gmra.mrb[12].mxu0 %v1109_v38  ;;  %v5047_v38 = vld [vmem:[%s7789_s3 + $0x1f8] ss:$12 sps:$4 sm:$0xff]  }
 0x278   :  { %1082 = vst.msk [vmem:[#allocation4 + $0x78] sm:$0xff] %vm684_vm2, %v1060_v54  ;;  %v7051_v48 = vsel %vm658_vm0, %v1060_v54, %v1062_v63  ;;  %2034 = vmatpush1.bf16.msra.mxu1 %v5032_v52  ;;  %4121 = vmatpush3.bf16.msra.mxu0 %v5036_v59  ;;  %v5042_v52 = vld [vmem:[%s7789_s3 + $0x1e0] ss:$12 sps:$4 sm:$0xff]   ;;  %v5046_v59 = vld [vmem:[%s7789_s3 + $0x1e8] ss:$12 sps:$4 sm:$0xff]  }
 0x279   :  { %2035 = vmatprep.subr.bf16.mxu1 %v5039_v57  ;;  %4122 = vmatprep.subr.bf16.mxu0 %v5040_v58  ;;  %v5050_v63 = vld [vmem:[%s7789_s3 + $0x2c0] ss:$12 sps:$4 sm:$0xff]   ;;  %v5055_v54 = vld [vmem:[%s7789_s3 + $0x2d8] ss:$12 sps:$4 sm:$0xff]  }
 0x27a   :  { %v5051_v57 = vld [vmem:[%s7789_s3 + $0x200] ss:$12 sps:$4 sm:$0xff]  }
 0x27b   :  { %v1058_v53 = vpop.permute.xlu0 %1057  ;;  %v1094_v45 = vld [vmem:[#allocation4 + $0x48] sm:$0xff]  ;;  %v5054_v58 = vld [vmem:[%s7789_s3 + $0x214] ss:$12 sps:$4 sm:$0xff]  }
 0x27c   :  { %v7066_v39 = vsel %vm658_vm0, %v1056_v47, %v1058_v53  ;;  %1081 = vst.msk [vmem:[#allocation4 + $0x58] sm:$0xff] %vm1077_vm9, %v1058_v53  ;;  %v1106_v55 = vpack.c.bf16 %v1094_v45, %v1088_v31  ;;  %2036 = vmatpush1.bf16.msra.mxu1 %v5037_v50  ;;  %4123 = vmatpush3.bf16.msra.mxu0 %v5041_v56  ;;  %v5049_v47 = vld [vmem:[%s7789_s3 + $0x1fc] ss:$12 sps:$4 sm:$0xff]   ;;  %v5056_v56 = vld [vmem:[%s7789_s3 + $0x218] ss:$12 sps:$4 sm:$0xff]  }
 0x27d   :  { %2037 = vmatprep.subr.bf16.mxu1 %v5044_v61  ;;  %4124 = vmatprep.subr.bf16.mxu0 %v5045_v49  ;;  %v5052_v50 = vld [vmem:[%s7789_s3 + $0x210] ss:$12 sps:$4 sm:$0xff]   ;;  %v5059_v61 = vld [vmem:[%s7789_s3 + $0x22c] ss:$12 sps:$4 sm:$0xff]   ;;  %v5057_v53 = vld [vmem:[%s7789_s3 + $0x228] ss:$12 sps:$4 sm:$0xff]  }
 0x27e   :  { %2061 = vmatprep.mubr.bf16.mxu1 %v1106_v55  ;;  %2211 = vmatprep.mubr.bf16.mxu0 %v1106_v55  ;;  %v5060_v49 = vld [vmem:[%s7789_s3 + $0x2f0] ss:$12 sps:$4 sm:$0xff]  }
 0x27f   :  { %v5061_v31 = vld [vmem:[%s7789_s3 + $0x230] ss:$12 sps:$4 sm:$0xff]  }
 0x280   :  { %2038 = vmatpush1.bf16.msra.mxu1 %v5042_v52  ;;  %4125 = vmatpush3.bf16.msra.mxu0 %v5046_v59  ;;  %v5064_v45 = vld [vmem:[%s7789_s3 + $0x244] ss:$12 sps:$4 sm:$0xff]   ;;  %v1100_v55 = vld [vmem:[#allocation4 + $0x78] sm:$0xff]  ;;  %v5062_v52 = vld [vmem:[%s7789_s3 + $0x240] ss:$12 sps:$4 sm:$0xff]   ;;  %v7119_v59 = vpack.c.bf16 %v7026_v46, %v6990_v51 }
 0x281   :  { %2039 = vmatprep.subr.bf16.mxu1 %v5049_v47  ;;  %4126 = vmatprep.subr.bf16.mxu0 %v5050_v63  ;;  %v5156_v47 = vmov 0   ;;  %v5065_v63 = vld [vmem:[%s7789_s3 + $0x308] ss:$12 sps:$4 sm:$0xff]   ;;  %v5066_v51 = vld [vmem:[%s7789_s3 + $0x258] ss:$12 sps:$4 sm:$0xff]  }
 0x282   :  { %v5069_v46 = vld [vmem:[%s7789_s3 + $0x320] ss:$12 sps:$4 sm:$0xff]  }
 0x284   :  { %2040 = vmatpush1.bf16.msra.mxu1 %v5047_v38  ;;  %4127 = vmatpush3.bf16.msra.mxu0 %v5051_v57  ;;  %v5068_v38 = vld [vmem:[%s7789_s3 + $0x25c] ss:$12 sps:$4 sm:$0xff]   ;;  %v7128_v57 = vpack.c.bf16 %v1100_v55, %v1100_v55  ;;  %v5080_v55 = vld [vmem:[%s7789_s3 + $0x2a4] ss:$12 sps:$4 sm:$0xff]  }
 0x285   :  { %2041 = vmatprep.subr.bf16.mxu1 %v5054_v58  ;;  %4128 = vmatprep.subr.bf16.mxu0 %v5055_v54  ;;  %v5072_v58 = vld [vmem:[%s7789_s3 + $0x274] ss:$12 sps:$4 sm:$0xff]   ;;  %v1096_v54 = vld [vmem:[#allocation4 + $0x58] sm:$0xff] }
 0x288   :  { %2042 = vmatpush1.bf16.msra.mxu1 %v5052_v50  ;;  %4129 = vmatpush3.bf16.msra.mxu0 %v5056_v56  ;;  %v5070_v50 = vld [vmem:[%s7789_s3 + $0x270] ss:$12 sps:$4 sm:$0xff]   ;;  %v7147_v56 = vpack.c.bf16 %v7010_v60, %v7010_v60  ;;  %v5074_v60 = vld [vmem:[%s7789_s3 + $0x288] ss:$12 sps:$4 sm:$0xff]  }
 0x289   :  { %2043 = vmatprep.subr.bf16.mxu1 %v5059_v61  ;;  %4130 = vmatprep.subr.bf16.mxu0 %v5060_v49  ;;  %v5073_v61 = vld [vmem:[%s7789_s3 + $0x338] ss:$12 sps:$4 sm:$0xff]   ;;  %v1090_v49 = vld [vmem:[#allocation4 + $0x28] sm:$0xff] }
 0x28c   :  { %2044 = vmatpush1.bf16.msra.mxu1 %v5057_v53  ;;  %4131 = vmatpush3.bf16.msra.mxu0 %v5061_v31  ;;  %v5076_v53 = vld [vmem:[%s7789_s3 + $0x28c] ss:$12 sps:$4 sm:$0xff]   ;;  %v7156_v31 = vpack.c.bf16 %v1096_v54, %v1090_v49  ;;  %v5086_v54 = vld [vmem:[%s7789_s3 + $0x2d0] ss:$12 sps:$4 sm:$0xff]   ;;  %v5090_v49 = vld [vmem:[%s7789_s3 + $0x2e8] ss:$12 sps:$4 sm:$0xff]  }
 0x28d   :  { %2045 = vmatprep.subr.bf16.mxu1 %v5064_v45  ;;  %2227 = vmatprep.subr.bf16.mxu0 %v5156_v47  ;;  %v5077_v45 = vld [vmem:[%s7789_s3 + $0x350] ss:$12 sps:$4 sm:$0xff]  }
 0x28f   :  { %2212 = vmatmul.mubr.bf16.vlgmr.msra.gmra.mrb[16].mxu0 %v7119_v59 }
 0x290   :  { %2046 = vmatpush1.bf16.msra.mxu1 %v5062_v52  ;;  %2219 = vmatprep.mubr.bf16.mxu0 %v7128_v57  ;;  %v5078_v52 = vld [vmem:[%s7789_s3 + $0x2a0] ss:$12 sps:$4 sm:$0xff]  }
 0x291   :  { %2228 = vmatpush1.bf16.msra.mxu0 %v5065_v63  ;;  %2047 = vmatprep.subr.bf16.mxu1 %v5068_v38  ;;  %v5081_v63 = vld [vmem:[%s7789_s3 + $0x368] ss:$12 sps:$4 sm:$0xff]  }
 0x292   :  { %2229 = vmatprep.subr.bf16.mxu0 %v5156_v47  ;;  %v5084_v38 = vld [vmem:[%s7789_s3 + $0x2bc] ss:$12 sps:$4 sm:$0xff]  }
 0x294   :  { %2048 = vmatpush1.bf16.msra.mxu1 %v5066_v51  ;;  %v5082_v51 = vld [vmem:[%s7789_s3 + $0x2b8] ss:$12 sps:$4 sm:$0xff]  }
 0x295   :  { %2230 = vmatpush1.bf16.msra.mxu0 %v5069_v46  ;;  %2049 = vmatprep.subr.bf16.mxu1 %v5072_v58  ;;  %v5085_v46 = vld [vmem:[%s7789_s3 + $0x380] ss:$12 sps:$4 sm:$0xff]  }
 0x296   :  { %2231 = vmatprep.subr.bf16.mxu0 %v5156_v47  ;;  %v5088_v58 = vld [vmem:[%s7789_s3 + $0x2d4] ss:$12 sps:$4 sm:$0xff]  }
 0x297   :  { %2220 = vmatmul.mubr.bf16.gmra.mrb[20].mxu0 %v7147_v56 }
 0x298   :  { %2050 = vmatpush1.bf16.msra.mxu1 %v5070_v50  ;;  %4080 = vmatprep.mubr.msk.bf16.mxu0 %vm1077_vm9, %v7156_v31  ;;  %v5089_v50 = vld [vmem:[%s7789_s3 + $0x398] ss:$12 sps:$4 sm:$0xff]  }
 0x299   :  { %2232 = vmatpush1.bf16.msra.mxu0 %v5073_v61  ;;  %2051 = vmatprep.subr.bf16.mxu1 %v5076_v53  ;;  %v5092_v61 = vld [vmem:[%s7789_s3 + $0x2ec] ss:$12 sps:$4 sm:$0xff]   ;;  %v5093_v53 = vld [vmem:[%s7789_s3 + $0x3b0] ss:$12 sps:$4 sm:$0xff]  }
 0x29a   :  { %2233 = vmatprep.subr.bf16.mxu0 %v5156_v47 }
 0x29c   :  { %2052 = vmatpush1.bf16.msra.mxu1 %v5074_v60  ;;  %v5096_v60 = vld [vmem:[%s7789_s3 + $0x304] ss:$12 sps:$4 sm:$0xff]  }
 0x29d   :  { %2234 = vmatpush1.bf16.msra.mxu0 %v5077_v45  ;;  %2053 = vmatprep.subr.bf16.mxu1 %v5080_v55  ;;  %v5094_v45 = vld [vmem:[%s7789_s3 + $0x300] ss:$12 sps:$4 sm:$0xff]   ;;  %v5097_v55 = vld [vmem:[%s7789_s3 + $0x3c8] ss:$12 sps:$4 sm:$0xff]  }
 0x29e   :  { %2235 = vmatprep.subr.bf16.mxu0 %v5156_v47 }
 0x2a0   :  { %2054 = vmatpush1.bf16.msra.mxu1 %v5078_v52  ;;  %v5100_v52 = vld [vmem:[%s7789_s3 + $0x31c] ss:$12 sps:$4 sm:$0xff]  }
 0x2a1   :  { %2236 = vmatpush1.bf16.msra.mxu0 %v5081_v63  ;;  %2055 = vmatprep.subr.bf16.mxu1 %v5084_v38  ;;  %v5098_v63 = vld [vmem:[%s7789_s3 + $0x318] ss:$12 sps:$4 sm:$0xff]   ;;  %v5101_v38 = vld [vmem:[%s7789_s3 + $0x3e0] ss:$12 sps:$4 sm:$0xff]  }
 0x2a2   :  { %2237 = vmatprep.subr.bf16.mxu0 %v5156_v47 }
 0x2a4   :  { %2056 = vmatpush1.bf16.msra.mxu1 %v5082_v51  ;;  %v5104_v51 = vld [vmem:[%s7789_s3 + $0x334] ss:$12 sps:$4 sm:$0xff]  }
 0x2a5   :  { %2238 = vmatpush1.bf16.msra.mxu0 %v5085_v46  ;;  %2057 = vmatprep.subr.bf16.mxu1 %v5088_v58  ;;  %v1107_v46 = vpack.c.bf16 %v7066_v39, %v7030_v30  ;;  %v5107_v58 = vld [vmem:[%s7789_s3 + $0x34c] ss:$12 sps:$4 sm:$0xff]   ;;  %v5110_v30 = vld [vmem:[%s7789_s3 + $0x364] ss:$12 sps:$4 sm:$0xff]  }
 0x2a6   :  { %2239 = vmatprep.subr.bf16.mxu0 %v5156_v47  ;;  %v5108_v39 = vld [vmem:[%s7789_s3 + $0x360] ss:$12 sps:$4 sm:$0xff]  }
 0x2a8   :  { %2058 = vmatpush1.bf16.msra.mxu1 %v5086_v54 }
 0x2a9   :  { %2240 = vmatpush1.bf16.msra.mxu0 %v5089_v50  ;;  %2059 = vmatprep.subr.bf16.mxu1 %v5092_v61  ;;  %v5111_v50 = vld [vmem:[%s7789_s3 + $0x378] ss:$12 sps:$4 sm:$0xff]   ;;  %v5116_v61 = vld [vmem:[%s7789_s3 + $0x394] ss:$12 sps:$4 sm:$0xff]  }
 0x2aa   :  { %2241 = vmatprep.subr.bf16.mxu0 %v5156_v47 }
 0x2ac   :  { %2060 = vmatpush1.bf16.msra.mxu1 %v5090_v49  ;;  %v5114_v49 = vld [vmem:[%s7789_s3 + $0x390] ss:$12 sps:$4 sm:$0xff]  }
 0x2ad   :  { %2242 = vmatpush1.bf16.msra.mxu0 %v5093_v53  ;;  %2080 = vmatprep.subr.bf16.mxu1 %v5096_v60  ;;  %v5117_v53 = vld [vmem:[%s7789_s3 + $0x3a8] ss:$12 sps:$4 sm:$0xff]   ;;  %v5122_v60 = vld [vmem:[%s7789_s3 + $0x3c4] ss:$12 sps:$4 sm:$0xff]  }
 0x2ae   :  { %2243 = vmatprep.subr.bf16.mxu0 %v5156_v47 }
 0x2af   :  { %2062 = vmatmul.mubr.bf16.vlgmr.msra.gmra.mrb[0].mxu1 %v7119_v59  ;;  %v5102_v59 = vld [vmem:[%s7789_s3 + $0x330] ss:$12 sps:$4 sm:$0xff]  }
 0x2b0   :  { %2071 = vmatprep.mubr.bf16.mxu1 %v7128_v57  ;;  %2081 = vmatpush1.bf16.msra.mxu1 %v5094_v45  ;;  %v1102_v57 = vld [vmem:[#allocation4 + $0x88] sm:$0xff] }
 0x2b1   :  { %2244 = vmatpush1.bf16.msra.mxu0 %v5097_v55  ;;  %2082 = vmatprep.subr.bf16.mxu1 %v5100_v52  ;;  %v1114_v54 = vpack.c.bf16 %v1102_v57, %v1102_v57  ;;  %v5120_v45 = vld [vmem:[%s7789_s3 + $0x3c0] ss:$12 sps:$4 sm:$0xff]   ;;  %v5125_v55 = vld [vmem:[%s7789_s3 + $0x3dc] ss:$12 sps:$4 sm:$0xff]   ;;  %v5123_v52 = vld [vmem:[%s7789_s3 + $0x3d8] ss:$12 sps:$4 sm:$0xff]  }
 0x2b2   :  { %2245 = vmatprep.subr.bf16.mxu0 %v5156_v47  ;;  %v5105_v47 = vld [vmem:[%s7789_s3 + $0x348] ss:$12 sps:$4 sm:$0xff]  }
 0x2b4   :  { %2083 = vmatpush1.bf16.msra.mxu1 %v5098_v63 }
 0x2b5   :  { %2246 = vmatpush1.bf16.msra.mxu0 %v5101_v38  ;;  %2084 = vmatprep.subr.bf16.mxu1 %v5104_v51 }
 0x2b6   :  { %4144 = vmatprep.subr.bf16.mxu0 %v5264_v8 }
 0x2b7   :  { %2072 = vmatmul.mubr.bf16.gmra.mrb[4].mxu1 %v7147_v56  ;;  %v5113_v56 = vld [vmem:[%s7789_s3 + $0x37c] ss:$12 sps:$4 sm:$0xff]  }
 0x2b8   :  { %2260 = vmatmul.mubr.bf16.vlgmr.msra.gmra.mrb[24].mxu0 %v1107_v46  ;;  %2085 = vmatpush1.bf16.msra.mxu1 %v5102_v59 }
 0x2b9   :  { %4078 = vmatprep.mubr.msk.bf16.mxu1 %vm1077_vm9, %v7156_v31  ;;  %4081 = vmatprep.mubr.msk.bf16.mxu0 %vm1077_vm9, %v1114_v54  ;;  %v1113_v31 = vpack.c.bf16 %v7051_v48, %v7051_v48  ;;  %v5119_v48 = vld [vmem:[%s7789_s3 + $0x3ac] ss:$12 sps:$4 sm:$0xff]  }
 0x2ba   :  { %2086 = vmatprep.subr.bf16.mxu1 %v5107_v58 }
 0x2bc   :  { %2087 = vmatpush1.bf16.msra.mxu1 %v5105_v47 }
 0x2bd   :  { %2088 = vmatprep.subr.bf16.mxu1 %v5110_v30 }
 0x2c0   :  { %2268 = vmatmul.mubr.bf16.gmra.mrb[28].mxu0 %v1113_v31  ;;  %2089 = vmatpush1.bf16.msra.mxu1 %v5108_v39 }
 0x2c1   :  { %2090 = vmatprep.subr.bf16.mxu1 %v5113_v56 }
 0x2c4   :  { %2091 = vmatpush1.bf16.msra.mxu1 %v5111_v50 }
 0x2c5   :  { %2092 = vmatprep.subr.bf16.mxu1 %v5116_v61  ;;  %v1295_v61 = vsub.s32 2, %v6880_v62 }
 0x2c8   :  { %2093 = vmatpush1.bf16.msra.mxu1 %v5114_v49 }
 0x2c9   :  { %2094 = vmatprep.subr.bf16.mxu1 %v5119_v48 }
 0x2cc   :  { %2095 = vmatpush1.bf16.msra.mxu1 %v5117_v53 }
 0x2cd   :  { %2096 = vmatprep.subr.bf16.mxu1 %v5122_v60 }
 0x2d0   :  { %2097 = vmatpush1.bf16.msra.mxu1 %v5120_v45 }
 0x2d1   :  { %2098 = vmatprep.subr.bf16.mxu1 %v5125_v55 }
 0x2d4   :  { %2099 = vmatpush1.bf16.msra.mxu1 %v5123_v52 }
 0x2d7   :  { %2113 = vmatmul.mubr.bf16.vlgmr.msra.gmra.mrb[0].mxu1 %v1107_v46  ;;  %v1283_v46 = vld [vmem:[%s7790_s4] sm:$0x7] }
 0x2d8   :  { %4079 = vmatprep.mubr.msk.bf16.mxu1 %vm1077_vm9, %v1114_v54  ;;  %v1296_v49 = vrot.slane %v1283_v46, %v1295_v61 }
 0x2df   :  { %2123 = vmatmul.mubr.bf16.gmra.mrb[4].mxu1 %v1113_v31 }
 0x340   :  { %v4104_v63 = vpop.f32.mrb[8].mxu0 }
 0x341   :  { %v4105_v38 = vpop.f32.mrb[9].mxu0 }
 0x342   :  { %v4106_v51 = vadd.f32 %v4105_v38, %v4104_v63  ;;  %v4107_v59 = vpop.f32.mrb[10].mxu0 }
 0x343   :  { %v4108_v57 = vpop.f32.mrb[11].mxu0 }
 0x344   :  { %v4109_v58 = vadd.f32 %v4108_v57, %v4107_v59  ;;  %v2166_v48 = vadd.f32 %v4106_v51, %v1296_v49 }
 0x346   :  { %v2169_v55 = vadd.f32 %v4109_v58, %v1296_v49 }
 0x34a   :  { %v4110_v47 = vpop.f32.mrb[12].mxu0 }
 0x34b   :  { %v4111_v30 = vpop.f32.mrb[13].mxu0 }
 0x34c   :  { %v4112_v39 = vadd.f32 %v4111_v30, %v4110_v47  ;;  %v4113_v56 = vpop.f32.mrb[14].mxu0 }
 0x34d   :  { %v4114_v50 = vpop.f32.mrb[15].mxu0 }
 0x34e   :  { %v2174_v47 = vadd.f32 %v4112_v39, %v1296_v49  ;;  %v8052_v49 = vsub.s32 0, %v6880_v62 }
 0x362   :  { %v4132_v54 = vpop.f32.mrb[16].mxu0 }
 0x363   :  { %v4133_v31 = vpop.f32.mrb[17].mxu0 }
 0x364   :  { %v4134_v53 = vadd.f32 %v4133_v31, %v4132_v54  ;;  %v4135_v60 = vpop.f32.mrb[18].mxu0 }
 0x365   :  { %v4136_v45 = vpop.f32.mrb[19].mxu0 }
 0x366   :  { %v4137_v52 = vadd.f32 %v4136_v45, %v4135_v60  ;;  %v2214_v63 = vadd.f32 %v4134_v53, %v2166_v48 }
 0x368   :  { %v2217_v38 = vadd.f32 %v4137_v52, %v2169_v55  ;;  %v1288_v55 = vrot.slane %v1283_v46, %v8052_v49 }
 0x36a   :  { %v4138_v59 = vpop.f32.mrb[20].mxu0 }
 0x36b   :  { %v4139_v57 = vpop.f32.mrb[21].mxu0 }
 0x36c   :  { %v4140_v30 = vadd.f32 %v4139_v57, %v4138_v59  ;;  %v4141_v56 = vpop.f32.mrb[22].mxu0 }
 0x36d   :  { %v4142_v50 = vpop.f32.mrb[23].mxu0 }
 0x36e   :  { %v2222_v29 = vadd.f32 %v4140_v30, %v2174_v47 }
 0x38b   :  { %v2261_v37 = vpop.f32.mrb[24].mxu0 }
 0x38c   :  { %v2262_v44 = vadd.f32 %v2261_v37, %v2214_v63  ;;  %v2263_v61 = vpop.f32.mrb[25].mxu0  ;;  %v8053_v37 = vsub.s32 1, %v6880_v62 }
 0x38d   :  { %v2264_v28 = vpop.f32.mrb[26].mxu0 }
 0x38e   :  { %v2277_v36 = vmax.f32 %v2262_v44, 0.0  ;;  %v2265_v51 = vadd.f32 %v2264_v28, %v2217_v38  ;;  %v2266_v54 = vpop.f32.mrb[27].mxu0  ;;  %v1292_v52 = vrot.slane %v1283_v46, %v8053_v37 }
 0x390   :  { %2286 = vst [vmem:[#allocation5 + $0x10] sm:$0xff] %v2277_v36  ;;  %v2280_v31 = vmax.f32 %v2265_v51, 0.0 }
 0x392   :  { %2289 = vst [vmem:[#allocation5 + $0x28] sm:$0xff] %v2280_v31 }
 0x393   :  { %v2269_v58 = vpop.f32.mrb[28].mxu0 }
 0x394   :  { %v2270_v48 = vadd.f32 %v2269_v58, %v2222_v29  ;;  %v2271_v53 = vpop.f32.mrb[29].mxu0 }
 0x395   :  { %v2272_v60 = vpop.f32.mrb[30].mxu0 }
 0x396   :  { %v2283_v45 = vmax.f32 %v2270_v48, 0.0  ;;  %v2273_v39 = vpop.f32.mrb[31].mxu0 }
 0x398   :  { %2292 = vst [vmem:[#allocation5 + $0x40] sm:$0xff] %v2283_v45 }
 0x3aa   :  { %v2114_v63 = vpop.f32.mrb[0].mxu1 }
 0x3ab   :  { %v4836_v44 = vadd.f32 %v2114_v63, %v1288_v55  ;;  %v2116_v28 = vpop.f32.mrb[1].mxu1 }
 0x3ac   :  { %v4837_v38 = vadd.f32 %v2116_v28, %v1292_v52  ;;  %v2118_v36 = vpop.f32.mrb[2].mxu1 }
 0x3ad   :  { %v2275_v59 = vmax.f32 %v4836_v44, 0.0  ;;  %v4838_v57 = vadd.f32 %v2118_v36, %v1288_v55  ;;  %v2120_v47 = vpop.f32.mrb[3].mxu1 }
 0x3ae   :  { %v2276_v29 = vmax.f32 %v4837_v38, 0.0  ;;  %v4839_v30 = vadd.f32 %v2120_v47, %v1292_v52 }
 0x3af   :  { %2284 = vst [vmem:[#allocation5] sm:$0xff] %v2275_v59  ;;  %v2278_v56 = vmax.f32 %v4838_v57, 0.0 }
 0x3b0   :  { %2285 = vst [vmem:[#allocation5 + $0x8] sm:$0xff] %v2276_v29  ;;  %v2279_v50 = vmax.f32 %v4839_v30, 0.0 }
 0x3b1   :  { %2287 = vst [vmem:[#allocation5 + $0x18] sm:$0xff] %v2278_v56 }
 0x3b2   :  { %2288 = vst [vmem:[#allocation5 + $0x20] sm:$0xff] %v2279_v50  ;;  %v2124_v61 = vpop.f32.mrb[4].mxu1 }
 0x3b3   :  { %v4840_v51 = vadd.f32 %v2124_v61, %v1288_v55  ;;  %v2126_v62 = vpop.f32.mrb[5].mxu1 }
 0x3b4   :  { %v4841_v46 = vadd.f32 %v2126_v62, %v1292_v52  ;;  %v2128_v54 = vpop.f32.mrb[6].mxu1 }
 0x3b5   :  { %v2281_v31 = vmax.f32 %v4840_v51, 0.0  ;;  %v2129_v58 = vpop.f32.mrb[7].mxu1 }
 0x3b6   :  { %v2282_v48 = vmax.f32 %v4841_v46, 0.0 }
 0x3b7   :  { %2290 = vst [vmem:[#allocation5 + $0x30] sm:$0xff] %v2281_v31 }
 0x3b8   :  { %2291 = vst [vmem:[#allocation5 + $0x38] sm:$0xff] %v2282_v48 }
 0x3b9   :  { %5150 = dma.done.wait [#allocation7], 36864 }
 0x3ba   :  { %5151 = vsyncadd [#allocation7], 4294930432  ;;  %4145 = vmatpush3.bf16.msra.mxu0 %v5224_v0  ;;  %v5157_v53 = vmov 0.0   ;;  %vm5158_vm10 = vmmov 0   ;;  %v2305_v0 = vld [vmem:[#allocation5 + $0x8] sm:$0x3] }
 0x3bb   :  { %4534 = vmatprep.subr.bf16.mxu1 %v5157_v53  ;;  %4146 = vmatprep.subr.bf16.mxu0 %v5269_v9  ;;  %v2308_v8 = vpack.c.bf16 %v2305_v0, %v2305_v0  ;;  %v8072_v60 = vld [vmem:[#allocation35_spill] sm:$0xff]  ;;  %v8075_v49 = vld [vmem:[#allocation36_spill] sm:$0xff]  ;;  %v8078_v52 = vld [vmem:[#allocation37_spill] sm:$0xff]  ;;  %vm3896_vm11 = vcmask 41984  }
 0x3bc   :  { %4535 = vmatpush3.bf16.msra.mxu1 %v5304_v16  ;;  %4550 = vmatprep.mubr.msk.bf16.mxu1 %vm5158_vm10, %v5157_v53  ;;  %v8060_v16 = vld [vmem:[#allocation19_spill] sm:$0xff]  ;;  %v8076_v55 = vld [vmem:[#allocation28_spill] sm:$0xff]  ;;  %v8079_v63 = vld [vmem:[#allocation29_spill] sm:$0xff] }
 0x3bd   :  { %4536 = vmatprep.subr.bf16.mxu1 %v5157_v53  ;;  %2366 = vmatprep.mubr.bf16.mxu0 %v2308_v8  ;;  %v8073_v45 = vld [vmem:[#allocation27_spill] sm:$0xff]  ;;  %v8077_v37 = vld [vmem:[#allocation44_spill] sm:$0xff]  ;;  %v8080_v44 = vld [vmem:[#allocation45_spill] sm:$0xff] }
 0x3be   :  { %4147 = vmatpush3.bf16.msra.mxu0 %v5229_v1  ;;  %v2416_v1 = vld [vmem:[#allocation5 + $0x8] sm:$0xc]  ;;  %v8074_v39 = vld [vmem:[#allocation43_spill] sm:$0xff]  ;;  %v8081_v28 = vld [vmem:[#allocation38_spill] sm:$0xff] }
 0x3bf   :  { %4148 = vmatprep.subr.bf16.mxu0 %v5274_v10  ;;  %v8055_v10 = vld [vmem:[#allocation13_spill] sm:$0xff]  ;;  %v8082_v38 = vld [vmem:[#allocation30_spill] sm:$0xff]  ;;  %v2535_v36 = vld [vmem:[#allocation5] sm:$0x30] }
 0x3c0   :  { %4537 = vmatpush3.bf16.msra.mxu1 %v5309_v17  ;;  %v2417_v17 = vld [vmem:[#allocation5 + $0x10] sm:$0xc]  ;;  %v8084_v57 = vld [vmem:[#allocation39_spill] sm:$0xff]  ;;  %v2537_v47 = vld [vmem:[#allocation5 + $0x10] sm:$0x30]  ;;  %v2538_v29 = vpack.c.bf16 %v2535_v36, %v2535_v36 }
 0x3c1   :  { %4538 = vmatprep.subr.bf16.mxu1 %v5157_v53  ;;  %v8083_v59 = vld [vmem:[#allocation46_spill] sm:$0xff]  ;;  %v2656_v30 = vld [vmem:[#allocation5 + $0x8] sm:$0xc0]  ;;  %v8085_v56 = vld [vmem:[#allocation31_spill] sm:$0xff]  ;;  %v2540_v50 = vpack.c.bf16 %v2537_v47, %v2537_v47 }
 0x3c2   :  { %4149 = vmatpush3.bf16.msra.mxu0 %v5234_v2  ;;  %v2304_v2 = vld [vmem:[#allocation5] sm:$0x3]  ;;  %v8087_v51 = vld [vmem:[#allocation40_spill] sm:$0xff]  ;;  %v2659_v62 = vpack.c.bf16 %v2656_v30, %v2656_v30  ;;  %v2568_v46 = vrot.slane %v2538_v29, 2  ;;  %v8090_v48 = vld [vmem:[#allocation57_spill] sm:$0xff] }
 0x3c3   :  { %4150 = vmatprep.subr.bf16.mxu0 %v5279_v11  ;;  %v2307_v9 = vpack.c.bf16 %v2304_v2, %v2304_v2  ;;  %v8056_v11 = vld [vmem:[#allocation21_spill] sm:$0xff]  ;;  %v8086_v61 = vld [vmem:[#allocation47_spill] sm:$0xff]  ;;  %v8088_v54 = vld [vmem:[#allocation32_spill] sm:$0xff]  ;;  %v2570_v31 = vrot.slane %v2540_v50, 2 }
 0x3c4   :  { %4539 = vmatpush3.bf16.msra.mxu1 %v5314_v18  ;;  %v8089_v58 = vld [vmem:[#allocation48_spill] sm:$0xff]  ;;  %v2689_v0 = vrot.slane %v2659_v62, 3  ;;  %v8091_v8 = vld [vmem:[#allocation49_spill] sm:$0xff]  ;;  %v8093_v2 = vld [vmem:[#allocation58_spill] sm:$0xff] }
 0x3c5   :  { %4540 = vmatprep.subr.bf16.mxu1 %v5157_v53  ;;  %v8129_v36 = vld [vmem:[#allocation86_spill] sm:$0xff]  ;;  %v8132_v47 = vld [vmem:[#allocation87_spill] sm:$0xff]  ;;  %v2887_v29 = vld [vmem:[#allocation5 + $0x20] sm:$0xc] }
 0x3c6   :  { %4151 = vmatpush3.bf16.msra.mxu0 %v5239_v3  ;;  %v2306_v3 = vld [vmem:[#allocation5 + $0x10] sm:$0x3]  ;;  %v8133_v30 = vld [vmem:[#allocation79_spill] sm:$0xff]  ;;  %v2890_v62 = vpack.c.bf16 %v2887_v29, %v2887_v29  ;;  %v8179_v29 = vld [vmem:[#allocation142_spill] sm:$0xff] }
 0x3c7   :  { %4152 = vmatprep.subr.bf16.mxu0 %v5284_v12  ;;  %v8057_v12 = vld [vmem:[#allocation18_spill] sm:$0xff]  ;;  %v8134_v50 = vld [vmem:[#allocation95_spill] sm:$0xff] }
 0x3c8   :  { %4541 = vmatpush3.bf16.msra.mxu1 %v5319_v19  ;;  %v2536_v19 = vld [vmem:[#allocation5 + $0x8] sm:$0x30] }
 0x3c9   :  { %4542 = vmatprep.subr.bf16.mxu1 %v5157_v53 }
 0x3ca   :  { %4153 = vmatpush3.bf16.msra.mxu0 %v5244_v4  ;;  %v2419_v4 = vpack.c.bf16 %v2416_v1, %v2416_v1  ;;  %v8092_v1 = vld [vmem:[#allocation65_spill] sm:$0xff] }
 0x3cb   :  { %4154 = vmatprep.subr.bf16.mxu0 %v5289_v13  ;;  %v8058_v13 = vld [vmem:[#allocation14_spill] sm:$0xff] }
 0x3cc   :  { %4543 = vmatpush3.bf16.msra.mxu1 %v5324_v20  ;;  %v8061_v20 = vld [vmem:[#allocation15_spill] sm:$0xff] }
 0x3cd   :  { %4544 = vmatprep.subr.bf16.mxu1 %v5157_v53 }
 0x3ce   :  { %4155 = vmatpush3.bf16.msra.mxu0 %v5249_v5  ;;  %v2309_v5 = vpack.c.bf16 %v2306_v3, %v2306_v3  ;;  %v8094_v3 = vld [vmem:[#allocation50_spill] sm:$0xff] }
 0x3cf   :  { %4156 = vmatprep.subr.bf16.mxu0 %v5294_v14  ;;  %v2415_v14 = vld [vmem:[#allocation5] sm:$0xc] }
 0x3d0   :  { %4545 = vmatpush3.bf16.msra.mxu1 %v5329_v21  ;;  %v2418_v18 = vpack.c.bf16 %v2415_v14, %v2415_v14  ;;  %v2420_v21 = vpack.c.bf16 %v2417_v17, %v2417_v17  ;;  %v8104_v14 = vld [vmem:[#allocation69_spill] sm:$0xff]  ;;  %v2655_v17 = vld [vmem:[#allocation5] sm:$0xc0] }
 0x3d1   :  { %4546 = vmatprep.subr.bf16.mxu1 %v5157_v53 }
 0x3d2   :  { %4157 = vmatpush3.bf16.msra.mxu0 %v5254_v6  ;;  %v2449_v6 = vrot.slane %v2419_v4, 1  ;;  %v8095_v4 = vld [vmem:[#allocation66_spill] sm:$0xff] }
 0x3d3   :  { %4158 = vmatprep.subr.bf16.mxu0 %v5299_v15  ;;  %v8059_v15 = vld [vmem:[#allocation22_spill] sm:$0xff] }
 0x3d4   :  { %4547 = vmatpush3.bf16.msra.mxu1 %v5334_v22  ;;  %v8062_v22 = vld [vmem:[#allocation23_spill] sm:$0xff] }
 0x3d5   :  { %4548 = vmatprep.subr.bf16.mxu1 %v5157_v53 }
 0x3d6   :  { %4159 = vmatpush3.bf16.msra.mxu0 %v5259_v7  ;;  %v8054_v7 = vld [vmem:[#allocation17_spill] sm:$0xff] }
 0x3d7   :  { %4175 = vmatprep.subr.bf16.mxu0 %v5384_v32  ;;  %v8065_v32 = vld [vmem:[#allocation24_spill] sm:$0xff] }
 0x3d8   :  { %4549 = vmatpush3.bf16.msra.mxu1 %v5339_v23  ;;  %v8063_v23 = vld [vmem:[#allocation20_spill] sm:$0xff] }
 0x3d9   :  { %4554 = vmatprep.subr.bf16.mxu1 %v5157_v53  ;;  %2367 = vmatmul.mubr.bf16.vlgmr.msra.gmra.mrb[32].mxu0 %v2307_v9  ;;  %v8096_v9 = vld [vmem:[#allocation59_spill] sm:$0xff] }
 0x3da   :  { %4176 = vmatpush3.bf16.msra.mxu0 %v5344_v24  ;;  %2486 = vmatprep.mubr.bf16.mxu0 %v2449_v6  ;;  %v2539_v24 = vpack.c.bf16 %v2536_v19, %v2536_v19  ;;  %v8098_v6 = vld [vmem:[#allocation67_spill] sm:$0xff] }
 0x3db   :  { %4551 = vmatmul.mubr.bf16.vlgmr.msra.gmra.mrb[8].mxu1 %v2309_v5  ;;  %4177 = vmatprep.subr.bf16.mxu0 %v5389_v33  ;;  %v8066_v33 = vld [vmem:[#allocation33_spill] sm:$0xff]  ;;  %v8097_v5 = vld [vmem:[#allocation51_spill] sm:$0xff] }
 0x3dc   :  { %4555 = vmatpush3.bf16.msra.mxu1 %v5424_v40  ;;  %4570 = vmatprep.mubr.msk.bf16.mxu1 %vm5158_vm10, %v5157_v53  ;;  %v8068_v40 = vld [vmem:[#allocation41_spill] sm:$0xff]  ;;  %v8108_v19 = vld [vmem:[#allocation63_spill] sm:$0xff] }
 0x3dd   :  { %4556 = vmatprep.subr.bf16.mxu1 %v5157_v53 }
 0x3de   :  { %4178 = vmatpush3.bf16.msra.mxu0 %v5349_v25  ;;  %v2448_v25 = vrot.slane %v2418_v18, 1  ;;  %v8107_v18 = vld [vmem:[#allocation70_spill] sm:$0xff] }
 0x3df   :  { %4179 = vmatprep.subr.bf16.mxu0 %v5394_v34  ;;  %v2569_v34 = vrot.slane %v2539_v24, 2  ;;  %v8110_v24 = vld [vmem:[#allocation71_spill] sm:$0xff] }
 0x3e0   :  { %4557 = vmatpush3.bf16.msra.mxu1 %v5429_v41  ;;  %v8069_v41 = vld [vmem:[#allocation34_spill] sm:$0xff] }
 0x3e1   :  { %4558 = vmatprep.subr.bf16.mxu1 %v5157_v53 }
 0x3e2   :  { %4180 = vmatpush3.bf16.msra.mxu0 %v5354_v26  ;;  %v8064_v26 = vld [vmem:[#allocation16_spill] sm:$0xff] }
 0x3e3   :  { %4181 = vmatprep.subr.bf16.mxu0 %v5399_v35  ;;  %v8067_v35 = vld [vmem:[#allocation25_spill] sm:$0xff] }
 0x3e4   :  { %4559 = vmatpush3.bf16.msra.mxu1 %v5434_v42  ;;  %v8070_v42 = vld [vmem:[#allocation26_spill] sm:$0xff] }
 0x3e5   :  { %4560 = vmatprep.subr.bf16.mxu1 %v5157_v53 }
 0x3e6   :  { %4182 = vmatpush3.bf16.msra.mxu0 %v5359_v27  ;;  %v2450_v27 = vrot.slane %v2420_v21, 1  ;;  %v2658_v21 = vpack.c.bf16 %v2655_v17, %v2655_v17  ;;  %v2886_v17 = vld [vmem:[#allocation5 + $0x18] sm:$0xc] }
 0x3e7   :  { %4183 = vmatprep.subr.bf16.mxu0 %v8054_v7  ;;  %v8099_v7 = vld [vmem:[#allocation60_spill] sm:$0xff] }
 0x3e8   :  { %4561 = vmatpush3.bf16.msra.mxu1 %v5439_v43  ;;  %v8071_v43 = vld [vmem:[#allocation42_spill] sm:$0xff] }
 0x3e9   :  { %4562 = vmatprep.subr.bf16.mxu1 %v5157_v53 }
 0x3ea   :  { %4184 = vmatpush3.bf16.msra.mxu0 %v8055_v10  ;;  %v8100_v10 = vld [vmem:[#allocation52_spill] sm:$0xff] }
 0x3eb   :  { %4185 = vmatprep.subr.bf16.mxu0 %v8057_v12  ;;  %v8102_v12 = vld [vmem:[#allocation61_spill] sm:$0xff] }
 0x3ec   :  { %4563 = vmatpush3.bf16.msra.mxu1 %v8056_v11  ;;  %v8101_v11 = vld [vmem:[#allocation68_spill] sm:$0xff] }
 0x3ed   :  { %4564 = vmatprep.subr.bf16.mxu1 %v5157_v53 }
 0x3ee   :  { %4186 = vmatpush3.bf16.msra.mxu0 %v8058_v13  ;;  %v8103_v13 = vld [vmem:[#allocation53_spill] sm:$0xff] }
 0x3ef   :  { %4187 = vmatprep.subr.bf16.mxu0 %v8060_v16  ;;  %v8106_v16 = vld [vmem:[#allocation54_spill] sm:$0xff] }
 0x3f0   :  { %4565 = vmatpush3.bf16.msra.mxu1 %v8059_v15  ;;  %v8105_v15 = vld [vmem:[#allocation62_spill] sm:$0xff] }
 0x3f1   :  { %4566 = vmatprep.subr.bf16.mxu1 %v5157_v53 }
 0x3f2   :  { %4188 = vmatpush3.bf16.msra.mxu0 %v8061_v20  ;;  %v2657_v20 = vld [vmem:[#allocation5 + $0x10] sm:$0xc0] }
 0x3f3   :  { %4189 = vmatprep.subr.bf16.mxu0 %v8063_v23  ;;  %v2660_v23 = vpack.c.bf16 %v2657_v20, %v2657_v20  ;;  %v2888_v20 = vld [vmem:[#allocation5 + $0x28] sm:$0xc] }
 0x3f4   :  { %4567 = vmatpush3.bf16.msra.mxu1 %v8062_v22  ;;  %v8109_v22 = vld [vmem:[#allocation55_spill] sm:$0xff] }
 0x3f5   :  { %4568 = vmatprep.subr.bf16.mxu1 %v5157_v53 }
 0x3f6   :  { %4190 = vmatpush3.bf16.msra.mxu0 %v8064_v26  ;;  %v2688_v26 = vrot.slane %v2658_v21, 3  ;;  %v2889_v21 = vpack.c.bf16 %v2886_v17, %v2886_v17  ;;  %v8200_v17 = vld [vmem:[#allocation165_spill] sm:$0xff] }
 0x3f7   :  { %4206 = vmatprep.subr.bf16.mxu0 %v8066_v33  ;;  %v2690_v33 = vrot.slane %v2660_v23, 3  ;;  %v8157_v23 = vld [vmem:[#allocation103_spill] sm:$0xff] }
 0x3f8   :  { %4569 = vmatpush3.bf16.msra.mxu1 %v8065_v32  ;;  %v8112_v32 = vld [vmem:[#allocation56_spill] sm:$0xff] }
 0x3f9   :  { %4574 = vmatprep.subr.bf16.mxu1 %v5157_v53  ;;  %2487 = vmatmul.mubr.bf16.vlgmr.msra.gmra.mrb[36].mxu0 %v2448_v25  ;;  %v8111_v25 = vld [vmem:[#allocation64_spill] sm:$0xff] }
 0x3fa   :  { %4207 = vmatpush3.bf16.msra.mxu0 %v8067_v35  ;;  %2606 = vmatprep.mubr.bf16.mxu0 %v2569_v34  ;;  %v8113_v34 = vld [vmem:[#allocation72_spill] sm:$0xff]  ;;  %v8114_v35 = vld [vmem:[#allocation81_spill] sm:$0xff] }
 0x3fb   :  { %4571 = vmatmul.mubr.bf16.vlgmr.msra.gmra.mrb[8].mxu1 %v2450_v27  ;;  %4208 = vmatprep.subr.bf16.mxu0 %v8069_v41  ;;  %v2776_v27 = vld [vmem:[#allocation5 + $0x20] sm:$0x3]  ;;  %v8115_v41 = vld [vmem:[#allocation73_spill] sm:$0xff] }
 0x3fc   :  { %4575 = vmatpush3.bf16.msra.mxu1 %v8068_v40  ;;  %4590 = vmatprep.mubr.msk.bf16.mxu1 %vm5158_vm10, %v5157_v53  ;;  %v2779_v40 = vpack.c.bf16 %v2776_v27, %v2776_v27 }
 0x3fd   :  { %4576 = vmatprep.subr.bf16.mxu1 %v5157_v53 }
 0x3fe   :  { %4209 = vmatpush3.bf16.msra.mxu0 %v8070_v42  ;;  %v8116_v42 = vld [vmem:[#allocation89_spill] sm:$0xff] }
 0x3ff   :  { %4210 = vmatprep.subr.bf16.mxu0 %v8072_v60  ;;  %v8118_v60 = vld [vmem:[#allocation74_spill] sm:$0xff] }
 0x400   :  { %4577 = vmatpush3.bf16.msra.mxu1 %v8071_v43  ;;  %v8117_v43 = vld [vmem:[#allocation82_spill] sm:$0xff] }
 0x401   :  { %4578 = vmatprep.subr.bf16.mxu1 %v5157_v53 }
 0x402   :  { %4211 = vmatpush3.bf16.msra.mxu0 %v8073_v45  ;;  %v8119_v45 = vld [vmem:[#allocation90_spill] sm:$0xff] }
 0x403   :  { %4212 = vmatprep.subr.bf16.mxu0 %v8075_v49  ;;  %v8121_v49 = vld [vmem:[#allocation75_spill] sm:$0xff] }
 0x404   :  { %4579 = vmatpush3.bf16.msra.mxu1 %v8074_v39  ;;  %v8120_v39 = vld [vmem:[#allocation83_spill] sm:$0xff] }
 0x405   :  { %4580 = vmatprep.subr.bf16.mxu1 %v5157_v53 }
 0x406   :  { %4213 = vmatpush3.bf16.msra.mxu0 %v8076_v55  ;;  %v8122_v55 = vld [vmem:[#allocation91_spill] sm:$0xff] }
 0x407   :  { %4214 = vmatprep.subr.bf16.mxu0 %v8078_v52  ;;  %v8124_v52 = vld [vmem:[#allocation76_spill] sm:$0xff] }
 0x408   :  { %4581 = vmatpush3.bf16.msra.mxu1 %v8077_v37  ;;  %v8123_v37 = vld [vmem:[#allocation84_spill] sm:$0xff] }
 0x409   :  { %4582 = vmatprep.subr.bf16.mxu1 %v5157_v53 }
 0x40a   :  { %4215 = vmatpush3.bf16.msra.mxu0 %v8079_v63  ;;  %v8125_v63 = vld [vmem:[#allocation92_spill] sm:$0xff] }
 0x40b   :  { %4216 = vmatprep.subr.bf16.mxu0 %v8081_v28  ;;  %v8127_v28 = vld [vmem:[#allocation77_spill] sm:$0xff] }
 0x40c   :  { %4583 = vmatpush3.bf16.msra.mxu1 %v8080_v44  ;;  %v8126_v44 = vld [vmem:[#allocation85_spill] sm:$0xff] }
 0x40d   :  { %4584 = vmatprep.subr.bf16.mxu1 %v5157_v53 }
 0x40e   :  { %4217 = vmatpush3.bf16.msra.mxu0 %v8082_v38  ;;  %v8128_v38 = vld [vmem:[#allocation93_spill] sm:$0xff] }
 0x40f   :  { %4218 = vmatprep.subr.bf16.mxu0 %v8084_v57  ;;  %v8131_v57 = vld [vmem:[#allocation94_spill] sm:$0xff] }
 0x410   :  { %4585 = vmatpush3.bf16.msra.mxu1 %v8083_v59  ;;  %v8130_v59 = vld [vmem:[#allocation78_spill] sm:$0xff] }
 0x411   :  { %4586 = vmatprep.subr.bf16.mxu1 %v5157_v53 }
 0x412   :  { %4219 = vmatpush3.bf16.msra.mxu0 %v8085_v56  ;;  %v2775_v56 = vld [vmem:[#allocation5 + $0x18] sm:$0x3] }
 0x413   :  { %4220 = vmatprep.subr.bf16.mxu0 %v8087_v51  ;;  %v2777_v51 = vld [vmem:[#allocation5 + $0x28] sm:$0x3] }
 0x414   :  { %4587 = vmatpush3.bf16.msra.mxu1 %v8086_v61  ;;  %v8135_v61 = vld [vmem:[#allocation88_spill] sm:$0xff] }
 0x415   :  { %4588 = vmatprep.subr.bf16.mxu1 %v5157_v53 }
 0x416   :  { %4221 = vmatpush3.bf16.msra.mxu0 %v8088_v54  ;;  %v8136_v54 = vld [vmem:[#allocation80_spill] sm:$0xff] }
 0x417   :  { %4237 = vmatprep.subr.bf16.mxu0 %v8090_v48  ;;  %v8138_v48 = vld [vmem:[#allocation105_spill] sm:$0xff] }
 0x418   :  { %4589 = vmatpush3.bf16.msra.mxu1 %v8089_v58  ;;  %v8137_v58 = vld [vmem:[#allocation96_spill] sm:$0xff] }
 0x419   :  { %4594 = vmatprep.subr.bf16.mxu1 %v5157_v53  ;;  %2607 = vmatmul.mubr.bf16.vlgmr.msra.gmra.mrb[40].mxu0 %v2568_v46  ;;  %v2778_v46 = vpack.c.bf16 %v2775_v56, %v2775_v56  ;;  %v3008_v56 = vld [vmem:[#allocation5 + $0x28] sm:$0x30] }
 0x41a   :  { %4238 = vmatpush3.bf16.msra.mxu0 %v8091_v8  ;;  %2726 = vmatprep.mubr.bf16.mxu0 %v2689_v0  ;;  %v2920_v0 = vrot.slane %v2890_v62, 1  ;;  %v8139_v8 = vld [vmem:[#allocation97_spill] sm:$0xff]  ;;  %v3011_v62 = vpack.c.bf16 %v3008_v56, %v3008_v56 }
 0x41b   :  { %4591 = vmatmul.mubr.bf16.vlgmr.msra.gmra.mrb[8].mxu1 %v2570_v31  ;;  %4239 = vmatprep.subr.bf16.mxu0 %v8093_v2  ;;  %v2780_v31 = vpack.c.bf16 %v2777_v51, %v2777_v51  ;;  %v8141_v2 = vld [vmem:[#allocation106_spill] sm:$0xff]  ;;  %v8181_v51 = vld [vmem:[#allocation127_spill] sm:$0xff]  ;;  %v8223_v56 = vld [vmem:[#allocation173_spill] sm:$0xff] }
 0x41c   :  { %4595 = vmatpush3.bf16.msra.mxu1 %v8092_v1  ;;  %4610 = vmatprep.mubr.msk.bf16.mxu1 %vm5158_vm10, %v5157_v53  ;;  %v8140_v1 = vld [vmem:[#allocation113_spill] sm:$0xff] }
 0x41d   :  { %4596 = vmatprep.subr.bf16.mxu1 %v5157_v53 }
 0x41e   :  { %4240 = vmatpush3.bf16.msra.mxu0 %v8094_v3  ;;  %v8142_v3 = vld [vmem:[#allocation98_spill] sm:$0xff] }
 0x41f   :  { %4241 = vmatprep.subr.bf16.mxu0 %v8096_v9  ;;  %v8144_v9 = vld [vmem:[#allocation107_spill] sm:$0xff] }
 0x420   :  { %4597 = vmatpush3.bf16.msra.mxu1 %v8095_v4  ;;  %v8143_v4 = vld [vmem:[#allocation114_spill] sm:$0xff] }
 0x421   :  { %4598 = vmatprep.subr.bf16.mxu1 %v5157_v53 }
 0x422   :  { %4242 = vmatpush3.bf16.msra.mxu0 %v8097_v5  ;;  %v8145_v5 = vld [vmem:[#allocation99_spill] sm:$0xff] }
 0x423   :  { %4243 = vmatprep.subr.bf16.mxu0 %v8099_v7  ;;  %v8147_v7 = vld [vmem:[#allocation108_spill] sm:$0xff] }
 0x424   :  { %4599 = vmatpush3.bf16.msra.mxu1 %v8098_v6  ;;  %v8146_v6 = vld [vmem:[#allocation115_spill] sm:$0xff] }
 0x425   :  { %4600 = vmatprep.subr.bf16.mxu1 %v5157_v53 }
 0x426   :  { %4244 = vmatpush3.bf16.msra.mxu0 %v8100_v10  ;;  %v8148_v10 = vld [vmem:[#allocation100_spill] sm:$0xff] }
 0x427   :  { %4245 = vmatprep.subr.bf16.mxu0 %v8102_v12  ;;  %v8150_v12 = vld [vmem:[#allocation109_spill] sm:$0xff] }
 0x428   :  { %4601 = vmatpush3.bf16.msra.mxu1 %v8101_v11  ;;  %v8149_v11 = vld [vmem:[#allocation116_spill] sm:$0xff] }
 0x429   :  { %4602 = vmatprep.subr.bf16.mxu1 %v5157_v53 }
 0x42a   :  { %4246 = vmatpush3.bf16.msra.mxu0 %v8103_v13  ;;  %v8151_v13 = vld [vmem:[#allocation101_spill] sm:$0xff] }
 0x42b   :  { %4247 = vmatprep.subr.bf16.mxu0 %v8105_v15  ;;  %v8153_v15 = vld [vmem:[#allocation110_spill] sm:$0xff] }
 0x42c   :  { %4603 = vmatpush3.bf16.msra.mxu1 %v8104_v14  ;;  %v8152_v14 = vld [vmem:[#allocation117_spill] sm:$0xff] }
 0x42d   :  { %4604 = vmatprep.subr.bf16.mxu1 %v5157_v53 }
 0x42e   :  { %4248 = vmatpush3.bf16.msra.mxu0 %v8106_v16  ;;  %v8154_v16 = vld [vmem:[#allocation102_spill] sm:$0xff] }
 0x42f   :  { %4249 = vmatprep.subr.bf16.mxu0 %v8108_v19  ;;  %v8156_v19 = vld [vmem:[#allocation111_spill] sm:$0xff] }
 0x430   :  { %4605 = vmatpush3.bf16.msra.mxu1 %v8107_v18  ;;  %v8155_v18 = vld [vmem:[#allocation118_spill] sm:$0xff] }
 0x431   :  { %4606 = vmatprep.subr.bf16.mxu1 %v5157_v53 }
 0x432   :  { %4250 = vmatpush3.bf16.msra.mxu0 %v8109_v22  ;;  %v3007_v22 = vld [vmem:[#allocation5 + $0x20] sm:$0x30] }
 0x433   :  { %4251 = vmatprep.subr.bf16.mxu0 %v8111_v25  ;;  %v8158_v25 = vld [vmem:[#allocation119_spill] sm:$0xff]  ;;  %v3010_v27 = vpack.c.bf16 %v3007_v22, %v3007_v22 }
 0x434   :  { %4607 = vmatpush3.bf16.msra.mxu1 %v8110_v24  ;;  %v2891_v24 = vpack.c.bf16 %v2888_v20, %v2888_v20 }
 0x435   :  { %4608 = vmatprep.subr.bf16.mxu1 %v5157_v53 }
 0x436   :  { %4252 = vmatpush3.bf16.msra.mxu0 %v8112_v32  ;;  %v2919_v32 = vrot.slane %v2889_v21, 1 }
 0x437   :  { %4268 = vmatprep.subr.bf16.mxu0 %v8114_v35  ;;  %v8161_v35 = vld [vmem:[#allocation120_spill] sm:$0xff] }
 0x438   :  { %4609 = vmatpush3.bf16.msra.mxu1 %v8113_v34  ;;  %v2921_v34 = vrot.slane %v2891_v24, 1  ;;  %v3126_v24 = vld [vmem:[#allocation5 + $0x18] sm:$0xc0] }
 0x439   :  { %4614 = vmatprep.subr.bf16.mxu1 %v5157_v53  ;;  %2727 = vmatmul.mubr.bf16.vlgmr.msra.gmra.mrb[44].mxu0 %v2688_v26  ;;  %v8159_v26 = vld [vmem:[#allocation112_spill] sm:$0xff] }
 0x43a   :  { %4269 = vmatpush3.bf16.msra.mxu0 %v8115_v41  ;;  %2837 = vmatprep.mubr.bf16.mxu0 %v2779_v40  ;;  %v8162_v40 = vld [vmem:[#allocation129_spill] sm:$0xff]  ;;  %v3040_v41 = vrot.slane %v3010_v27, 2  ;;  %v8204_v27 = vld [vmem:[#allocation159_spill] sm:$0xff] }
 0x43b   :  { %4611 = vmatmul.mubr.bf16.vlgmr.msra.gmra.mrb[8].mxu1 %v2690_v33  ;;  %4270 = vmatprep.subr.bf16.mxu0 %v8117_v43  ;;  %v8160_v33 = vld [vmem:[#allocation104_spill] sm:$0xff]  ;;  %v8164_v43 = vld [vmem:[#allocation137_spill] sm:$0xff] }
 0x43c   :  { %4615 = vmatpush3.bf16.msra.mxu1 %v8116_v42  ;;  %4630 = vmatprep.mubr.msk.bf16.mxu1 %vm5158_vm10, %v5157_v53  ;;  %v8163_v42 = vld [vmem:[#allocation121_spill] sm:$0xff] }
 0x43d   :  { %4616 = vmatprep.subr.bf16.mxu1 %v5157_v53 }
 0x43e   :  { %4271 = vmatpush3.bf16.msra.mxu0 %v8118_v60  ;;  %v8165_v60 = vld [vmem:[#allocation130_spill] sm:$0xff] }
 0x43f   :  { %4272 = vmatprep.subr.bf16.mxu0 %v8120_v39  ;;  %v8167_v39 = vld [vmem:[#allocation138_spill] sm:$0xff] }
 0x440   :  { %4617 = vmatpush3.bf16.msra.mxu1 %v8119_v45  ;;  %v8166_v45 = vld [vmem:[#allocation122_spill] sm:$0xff] }
 0x441   :  { %4618 = vmatprep.subr.bf16.mxu1 %v5157_v53 }
 0x442   :  { %4273 = vmatpush3.bf16.msra.mxu0 %v8121_v49  ;;  %v8168_v49 = vld [vmem:[#allocation131_spill] sm:$0xff] }
 0x443   :  { %4274 = vmatprep.subr.bf16.mxu0 %v8123_v37  ;;  %v8170_v37 = vld [vmem:[#allocation139_spill] sm:$0xff] }
 0x444   :  { %4619 = vmatpush3.bf16.msra.mxu1 %v8122_v55  ;;  %v8169_v55 = vld [vmem:[#allocation123_spill] sm:$0xff] }
 0x445   :  { %4620 = vmatprep.subr.bf16.mxu1 %v5157_v53 }
 0x446   :  { %4275 = vmatpush3.bf16.msra.mxu0 %v8124_v52  ;;  %v8171_v52 = vld [vmem:[#allocation132_spill] sm:$0xff] }
 0x447   :  { %4276 = vmatprep.subr.bf16.mxu0 %v8126_v44  ;;  %v8173_v44 = vld [vmem:[#allocation140_spill] sm:$0xff] }
 0x448   :  { %4621 = vmatpush3.bf16.msra.mxu1 %v8125_v63  ;;  %v8172_v63 = vld [vmem:[#allocation124_spill] sm:$0xff] }
 0x449   :  { %4622 = vmatprep.subr.bf16.mxu1 %v5157_v53 }
 0x44a   :  { %4277 = vmatpush3.bf16.msra.mxu0 %v8127_v28  ;;  %v8174_v28 = vld [vmem:[#allocation133_spill] sm:$0xff] }
 0x44b   :  { %4278 = vmatprep.subr.bf16.mxu0 %v8129_v36  ;;  %v8176_v36 = vld [vmem:[#allocation141_spill] sm:$0xff] }
 0x44c   :  { %4623 = vmatpush3.bf16.msra.mxu1 %v8128_v38  ;;  %v8175_v38 = vld [vmem:[#allocation125_spill] sm:$0xff] }
 0x44d   :  { %4624 = vmatprep.subr.bf16.mxu1 %v5157_v53 }
 0x44e   :  { %4279 = vmatpush3.bf16.msra.mxu0 %v8130_v59  ;;  %v8177_v59 = vld [vmem:[#allocation134_spill] sm:$0xff] }
 0x44f   :  { %4280 = vmatprep.subr.bf16.mxu0 %v8132_v47  ;;  %v3006_v47 = vld [vmem:[#allocation5 + $0x18] sm:$0x30] }
 0x450   :  { %4625 = vmatpush3.bf16.msra.mxu1 %v8131_v57  ;;  %v8178_v57 = vld [vmem:[#allocation126_spill] sm:$0xff] }
 0x451   :  { %4626 = vmatprep.subr.bf16.mxu1 %v5157_v53 }
 0x452   :  { %4281 = vmatpush3.bf16.msra.mxu0 %v8133_v30  ;;  %v8180_v30 = vld [vmem:[#allocation135_spill] sm:$0xff] }
 0x453   :  { %4282 = vmatprep.subr.bf16.mxu0 %v8135_v61  ;;  %v3127_v61 = vld [vmem:[#allocation5 + $0x20] sm:$0xc0] }
 0x454   :  { %4627 = vmatpush3.bf16.msra.mxu1 %v8134_v50  ;;  %v3009_v50 = vpack.c.bf16 %v3006_v47, %v3006_v47  ;;  %v8220_v47 = vld [vmem:[#allocation172_spill] sm:$0xff] }
 0x455   :  { %4628 = vmatprep.subr.bf16.mxu1 %v5157_v53 }
 0x456   :  { %4283 = vmatpush3.bf16.msra.mxu0 %v8136_v54  ;;  %v8183_v54 = vld [vmem:[#allocation136_spill] sm:$0xff] }
 0x457   :  { %4299 = vmatprep.subr.bf16.mxu0 %v8138_v48  ;;  %v8184_v48 = vld [vmem:[#allocation128_spill] sm:$0xff] }
 0x458   :  { %4629 = vmatpush3.bf16.msra.mxu1 %v8137_v58  ;;  %v3039_v58 = vrot.slane %v3009_v50, 2  ;;  %v4082_v50 = vld [vmem:[%s7792_s6] ss:$0 sm:$0xff] }
 0x459   :  { %4634 = vmatprep.subr.bf16.mxu1 %v5157_v53  ;;  %2838 = vmatmul.mubr.bf16.vlgmr.msra.gmra.mrb[48].mxu0 %v2778_v46  ;;  %v8182_v46 = vld [vmem:[#allocation143_spill] sm:$0xff] }
 0x45a   :  { %4300 = vmatpush3.bf16.msra.mxu0 %v8139_v8  ;;  %2957 = vmatprep.mubr.bf16.mxu0 %v2920_v0  ;;  %v3041_v0 = vrot.slane %v3011_v62, 2  ;;  %v8185_v8 = vld [vmem:[#allocation144_spill] sm:$0xff] }
 0x45b   :  { %4631 = vmatmul.mubr.bf16.vlgmr.msra.gmra.mrb[8].mxu1 %v2780_v31  ;;  %4301 = vmatprep.subr.bf16.mxu0 %v8141_v2  ;;  %v3130_v31 = vpack.c.bf16 %v3127_v61, %v3127_v61  ;;  %v8224_v61 = vld [vmem:[#allocation189_spill] sm:$0xff] }
 0x45c   :  { %4635 = vmatpush3.bf16.msra.mxu1 %v8140_v1  ;;  %4650 = vmatprep.mubr.msk.bf16.mxu1 %vm5158_vm10, %v5157_v53  ;;  %v8186_v1 = vld [vmem:[#allocation153_spill] sm:$0xff] }
 0x45d   :  { %4636 = vmatprep.subr.bf16.mxu1 %v5157_v53  ;;  %v3160_v2 = vrot.slane %v3130_v31, 3 }
 0x45e   :  { %4302 = vmatpush3.bf16.msra.mxu0 %v8142_v3  ;;  %v8187_v3 = vld [vmem:[#allocation145_spill] sm:$0xff] }
 0x45f   :  { %4303 = vmatprep.subr.bf16.mxu0 %v8144_v9  ;;  %v8189_v9 = vld [vmem:[#allocation154_spill] sm:$0xff] }
 0x460   :  { %4637 = vmatpush3.bf16.msra.mxu1 %v8143_v4  ;;  %v8188_v4 = vld [vmem:[#allocation161_spill] sm:$0xff] }
 0x461   :  { %4638 = vmatprep.subr.bf16.mxu1 %v5157_v53 }
 0x462   :  { %4304 = vmatpush3.bf16.msra.mxu0 %v8145_v5  ;;  %v8190_v5 = vld [vmem:[#allocation146_spill] sm:$0xff] }
 0x463   :  { %4305 = vmatprep.subr.bf16.mxu0 %v8147_v7  ;;  %v8192_v7 = vld [vmem:[#allocation155_spill] sm:$0xff] }
 0x464   :  { %4639 = vmatpush3.bf16.msra.mxu1 %v8146_v6  ;;  %v8191_v6 = vld [vmem:[#allocation162_spill] sm:$0xff] }
 0x465   :  { %4640 = vmatprep.subr.bf16.mxu1 %v5157_v53 }
 0x466   :  { %4306 = vmatpush3.bf16.msra.mxu0 %v8148_v10  ;;  %v8193_v10 = vld [vmem:[#allocation147_spill] sm:$0xff] }
 0x467   :  { %4307 = vmatprep.subr.bf16.mxu0 %v8150_v12  ;;  %v8195_v12 = vld [vmem:[#allocation156_spill] sm:$0xff] }
 0x468   :  { %4641 = vmatpush3.bf16.msra.mxu1 %v8149_v11  ;;  %v8194_v11 = vld [vmem:[#allocation163_spill] sm:$0xff] }
 0x469   :  { %4642 = vmatprep.subr.bf16.mxu1 %v5157_v53 }
 0x46a   :  { %4308 = vmatpush3.bf16.msra.mxu0 %v8151_v13  ;;  %v8196_v13 = vld [vmem:[#allocation148_spill] sm:$0xff] }
 0x46b   :  { %4309 = vmatprep.subr.bf16.mxu0 %v8153_v15  ;;  %v8198_v15 = vld [vmem:[#allocation157_spill] sm:$0xff] }
 0x46c   :  { %4643 = vmatpush3.bf16.msra.mxu1 %v8152_v14  ;;  %v8197_v14 = vld [vmem:[#allocation164_spill] sm:$0xff] }
 0x46d   :  { %4644 = vmatprep.subr.bf16.mxu1 %v5157_v53 }
 0x46e   :  { %4310 = vmatpush3.bf16.msra.mxu0 %v8154_v16  ;;  %v8199_v16 = vld [vmem:[#allocation149_spill] sm:$0xff] }
 0x46f   :  { %4311 = vmatprep.subr.bf16.mxu0 %v8156_v19 }
 0x470   :  { %4645 = vmatpush3.bf16.msra.mxu1 %v8155_v18  ;;  %v8201_v18 = vld [vmem:[#allocation158_spill] sm:$0xff] }
 0x471   :  { %4646 = vmatprep.subr.bf16.mxu1 %v5157_v53 }
 0x472   :  { %4312 = vmatpush3.bf16.msra.mxu0 %v8157_v23  ;;  %v8202_v23 = vld [vmem:[#allocation150_spill] sm:$0xff] }
 0x473   :  { %4313 = vmatprep.subr.bf16.mxu0 %v8159_v26  ;;  %v8203_v26 = vld [vmem:[#allocation166_spill] sm:$0xff] }
 0x474   :  { %4647 = vmatpush3.bf16.msra.mxu1 %v8158_v25 }
 0x475   :  { %4648 = vmatprep.subr.bf16.mxu1 %v5157_v53 }
 0x476   :  { %4314 = vmatpush3.bf16.msra.mxu0 %v8160_v33  ;;  %v3129_v33 = vpack.c.bf16 %v3126_v24, %v3126_v24  ;;  %v8242_v24 = vld [vmem:[#allocation211_spill] sm:$0xff] }
 0x477   :  { %4330 = vmatprep.subr.bf16.mxu0 %v8162_v40  ;;  %v8206_v40 = vld [vmem:[#allocation167_spill] sm:$0xff] }
 0x478   :  { %4649 = vmatpush3.bf16.msra.mxu1 %v8161_v35 }
 0x479   :  { %4654 = vmatprep.subr.bf16.mxu1 %v5157_v53  ;;  %2958 = vmatmul.mubr.bf16.vlgmr.msra.gmra.mrb[52].mxu0 %v2919_v32  ;;  %v3128_v32 = vld [vmem:[#allocation5 + $0x28] sm:$0xc0] }
 0x47a   :  { %4331 = vmatpush3.bf16.msra.mxu0 %v8163_v42  ;;  %3077 = vmatprep.mubr.bf16.mxu0 %v3040_v41  ;;  %v3131_v35 = vpack.c.bf16 %v3128_v32, %v3128_v32  ;;  %v8207_v41 = vld [vmem:[#allocation160_spill] sm:$0xff]  ;;  %v3159_v42 = vrot.slane %v3129_v33, 3  ;;  %v8246_v32 = vld [vmem:[#allocation205_spill] sm:$0xff] }
 0x47b   :  { %4651 = vmatmul.mubr.bf16.vlgmr.msra.gmra.mrb[8].mxu1 %v2921_v34  ;;  %4332 = vmatprep.subr.bf16.mxu0 %v8165_v60  ;;  %v8205_v34 = vld [vmem:[#allocation151_spill] sm:$0xff]  ;;  %v8208_v60 = vld [vmem:[#allocation152_spill] sm:$0xff]  ;;  %v8247_v33 = vld [vmem:[#allocation197_spill] sm:$0xff] }
 0x47c   :  { %4655 = vmatpush3.bf16.msra.mxu1 %v8164_v43  ;;  %4670 = vmatprep.mubr.msk.bf16.mxu1 %vm5158_vm10, %v5157_v53  ;;  %v3247_v43 = vld [vmem:[#allocation5 + $0x38] sm:$0x3] }
 0x47d   :  { %4656 = vmatprep.subr.bf16.mxu1 %v5157_v53 }
 0x47e   :  { %4333 = vmatpush3.bf16.msra.mxu0 %v8166_v45  ;;  %v3161_v45 = vrot.slane %v3131_v35, 3  ;;  %v8249_v35 = vld [vmem:[#allocation206_spill] sm:$0xff] }
 0x47f   :  { %4334 = vmatprep.subr.bf16.mxu0 %v8168_v49  ;;  %v8210_v49 = vld [vmem:[#allocation177_spill] sm:$0xff] }
 0x480   :  { %4657 = vmatpush3.bf16.msra.mxu1 %v8167_v39  ;;  %v8209_v39 = vld [vmem:[#allocation168_spill] sm:$0xff] }
 0x481   :  { %4658 = vmatprep.subr.bf16.mxu1 %v5157_v53 }
 0x482   :  { %4335 = vmatpush3.bf16.msra.mxu0 %v8169_v55  ;;  %v3250_v55 = vpack.c.bf16 %v3247_v43, %v3247_v43 }
 0x483   :  { %4336 = vmatprep.subr.bf16.mxu0 %v8171_v52  ;;  %v8212_v52 = vld [vmem:[#allocation185_spill] sm:$0xff] }
 0x484   :  { %4659 = vmatpush3.bf16.msra.mxu1 %v8170_v37  ;;  %v8211_v37 = vld [vmem:[#allocation169_spill] sm:$0xff] }
 0x485   :  { %4660 = vmatprep.subr.bf16.mxu1 %v5157_v53 }
 0x486   :  { %4337 = vmatpush3.bf16.msra.mxu0 %v8172_v63  ;;  %v8213_v63 = vld [vmem:[#allocation178_spill] sm:$0xff] }
 0x487   :  { %4338 = vmatprep.subr.bf16.mxu0 %v8174_v28  ;;  %v8215_v28 = vld [vmem:[#allocation186_spill] sm:$0xff] }
 0x488   :  { %4661 = vmatpush3.bf16.msra.mxu1 %v8173_v44  ;;  %v8214_v44 = vld [vmem:[#allocation170_spill] sm:$0xff] }
 0x489   :  { %4662 = vmatprep.subr.bf16.mxu1 %v5157_v53 }
 0x48a   :  { %4339 = vmatpush3.bf16.msra.mxu0 %v8175_v38  ;;  %v8216_v38 = vld [vmem:[#allocation179_spill] sm:$0xff] }
 0x48b   :  { %4340 = vmatprep.subr.bf16.mxu0 %v8177_v59  ;;  %v8218_v59 = vld [vmem:[#allocation187_spill] sm:$0xff] }
 0x48c   :  { %4663 = vmatpush3.bf16.msra.mxu1 %v8176_v36  ;;  %v8217_v36 = vld [vmem:[#allocation171_spill] sm:$0xff] }
 0x48d   :  { %4664 = vmatprep.subr.bf16.mxu1 %v5157_v53 }
 0x48e   :  { %4341 = vmatpush3.bf16.msra.mxu0 %v8178_v57  ;;  %v8219_v57 = vld [vmem:[#allocation180_spill] sm:$0xff] }
 0x48f   :  { %4342 = vmatprep.subr.bf16.mxu0 %v8180_v30  ;;  %v8222_v30 = vld [vmem:[#allocation181_spill] sm:$0xff] }
 0x490   :  { %4665 = vmatpush3.bf16.msra.mxu1 %v8179_v29  ;;  %v8221_v29 = vld [vmem:[#allocation188_spill] sm:$0xff] }
 0x491   :  { %4666 = vmatprep.subr.bf16.mxu1 %v5157_v53 }
 0x492   :  { %4343 = vmatpush3.bf16.msra.mxu0 %v8181_v51  ;;  %v8225_v51 = vld [vmem:[#allocation182_spill] sm:$0xff] }
 0x493   :  { %4344 = vmatprep.subr.bf16.mxu0 %v8183_v54 }
 0x494   :  { %4667 = vmatpush3.bf16.msra.mxu1 %v8182_v46 }
 0x495   :  { %4668 = vmatprep.subr.bf16.mxu1 %v5157_v53 }
 0x496   :  { %4345 = vmatpush3.bf16.msra.mxu0 %v8184_v48  ;;  %v8226_v48 = vld [vmem:[#allocation174_spill] sm:$0xff] }
 0x497   :  { %4361 = vmatprep.subr.bf16.mxu0 %v8186_v1  ;;  %v8228_v1 = vld [vmem:[#allocation183_spill] sm:$0xff] }
 0x498   :  { %4669 = vmatpush3.bf16.msra.mxu1 %v8185_v8  ;;  %v8227_v8 = vld [vmem:[#allocation190_spill] sm:$0xff] }
 0x499   :  { %4674 = vmatprep.subr.bf16.mxu1 %v5157_v53  ;;  %3078 = vmatmul.mubr.bf16.vlgmr.msra.gmra.mrb[56].mxu0 %v3039_v58 }
 0x49a   :  { %4362 = vmatpush3.bf16.msra.mxu0 %v8187_v3  ;;  %3197 = vmatprep.mubr.bf16.mxu0 %v3160_v2  ;;  %v3358_v3 = vld [vmem:[#allocation5 + $0x38] sm:$0xc] }
 0x49b   :  { %4671 = vmatmul.mubr.bf16.vlgmr.msra.gmra.mrb[8].mxu1 %v3041_v0  ;;  %4363 = vmatprep.subr.bf16.mxu0 %v8189_v9  ;;  %v3246_v9 = vld [vmem:[#allocation5 + $0x30] sm:$0x3] }
 0x49c   :  { %4675 = vmatpush3.bf16.msra.mxu1 %v8188_v4  ;;  %4690 = vmatprep.mubr.msk.bf16.mxu1 %vm5158_vm10, %v5157_v53  ;;  %v8229_v4 = vld [vmem:[#allocation175_spill] sm:$0xff] }
 0x49d   :  { %4676 = vmatprep.subr.bf16.mxu1 %v5157_v53 }
 0x49e   :  { %4364 = vmatpush3.bf16.msra.mxu0 %v8190_v5  ;;  %v8230_v5 = vld [vmem:[#allocation191_spill] sm:$0xff] }
 0x49f   :  { %4365 = vmatprep.subr.bf16.mxu0 %v8192_v7  ;;  %v3248_v7 = vld [vmem:[#allocation5 + $0x40] sm:$0x3] }
 0x4a0   :  { %4677 = vmatpush3.bf16.msra.mxu1 %v8191_v6  ;;  %v8231_v6 = vld [vmem:[#allocation184_spill] sm:$0xff] }
 0x4a1   :  { %4678 = vmatprep.subr.bf16.mxu1 %v5157_v53 }
 0x4a2   :  { %4366 = vmatpush3.bf16.msra.mxu0 %v8193_v10  ;;  %v3361_v10 = vpack.c.bf16 %v3358_v3, %v3358_v3  ;;  %v8270_v3 = vld [vmem:[#allocation229_spill] sm:$0xff] }
 0x4a3   :  { %4367 = vmatprep.subr.bf16.mxu0 %v8195_v12  ;;  %v8232_v12 = vld [vmem:[#allocation176_spill] sm:$0xff] }
 0x4a4   :  { %4679 = vmatpush3.bf16.msra.mxu1 %v8194_v11  ;;  %v3249_v11 = vpack.c.bf16 %v3246_v9, %v3246_v9  ;;  %v8272_v9 = vld [vmem:[#allocation237_spill] sm:$0xff] }
 0x4a5   :  { %4680 = vmatprep.subr.bf16.mxu1 %v5157_v53 }
 0x4a6   :  { %4368 = vmatpush3.bf16.msra.mxu0 %v8196_v13  ;;  %v3251_v13 = vpack.c.bf16 %v3248_v7, %v3248_v7 }
 0x4a7   :  { %4369 = vmatprep.subr.bf16.mxu0 %v8198_v15  ;;  %v8234_v15 = vld [vmem:[#allocation201_spill] sm:$0xff] }
 0x4a8   :  { %4681 = vmatpush3.bf16.msra.mxu1 %v8197_v14  ;;  %v8233_v14 = vld [vmem:[#allocation192_spill] sm:$0xff] }
 0x4a9   :  { %4682 = vmatprep.subr.bf16.mxu1 %v5157_v53 }
 0x4aa   :  { %4370 = vmatpush3.bf16.msra.mxu0 %v8199_v16  ;;  %v3391_v16 = vrot.slane %v3361_v10, 1 }
 0x4ab   :  { %4371 = vmatprep.subr.bf16.mxu0 %v8201_v18  ;;  %v8236_v18 = vld [vmem:[#allocation209_spill] sm:$0xff] }
 0x4ac   :  { %4683 = vmatpush3.bf16.msra.mxu1 %v8200_v17  ;;  %v4160_v19 = vpop.f32.mrb[32].mxu0  ;;  %v8235_v17 = vld [vmem:[#allocation193_spill] sm:$0xff] }
 0x4ad   :  { %4684 = vmatprep.subr.bf16.mxu1 %v5157_v53  ;;  %v4161_v20 = vpop.f32.mrb[33].mxu0 }
 0x4ae   :  { %v4162_v21 = vadd.f32 %v4161_v20, %v4160_v19  ;;  %v4163_v22 = vpop.f32.mrb[34].mxu0  ;;  %4372 = vmatpush3.bf16.msra.mxu0 %v8202_v23  ;;  %v8237_v19 = vld [vmem:[#allocation202_spill] sm:$0xff]  ;;  %v8241_v23 = vld [vmem:[#allocation195_spill] sm:$0xff] }
 0x4af   :  { %v4164_v25 = vpop.f32.mrb[35].mxu0  ;;  %4373 = vmatprep.subr.bf16.mxu0 %v8204_v27  ;;  %v8238_v20 = vld [vmem:[#allocation194_spill] sm:$0xff]  ;;  %v8240_v22 = vld [vmem:[#allocation203_spill] sm:$0xff]  ;;  %v8245_v27 = vld [vmem:[#allocation212_spill] sm:$0xff] }
 0x4b0   :  { %4685 = vmatpush3.bf16.msra.mxu1 %v8203_v26  ;;  %v4842_v54 = vadd.f32 %v4162_v21, %v4082_v50  ;;  %v8239_v21 = vld [vmem:[#allocation210_spill] sm:$0xff]  ;;  %v8243_v25 = vld [vmem:[#allocation204_spill] sm:$0xff]  ;;  %v8258_v50 = vld [vmem:[#allocation225_spill] sm:$0xff] }
 0x4b1   :  { %4686 = vmatprep.subr.bf16.mxu1 %v5157_v53  ;;  %v8244_v26 = vld [vmem:[#allocation196_spill] sm:$0xff] }
 0x4b2   :  { %4374 = vmatpush3.bf16.msra.mxu0 %v8205_v34  ;;  %v8248_v34 = vld [vmem:[#allocation213_spill] sm:$0xff] }
 0x4b3   :  { %4375 = vmatprep.subr.bf16.mxu0 %v8207_v41 }
 0x4b4   :  { %4687 = vmatpush3.bf16.msra.mxu1 %v8206_v40 }
 0x4b5   :  { %4688 = vmatprep.subr.bf16.mxu1 %v5157_v53 }
 0x4b6   :  { %4376 = vmatpush3.bf16.msra.mxu0 %v8208_v60  ;;  %v8250_v60 = vld [vmem:[#allocation198_spill] sm:$0xff] }
 0x4b7   :  { %4392 = vmatprep.subr.bf16.mxu0 %v8210_v49  ;;  %v8251_v49 = vld [vmem:[#allocation214_spill] sm:$0xff] }
 0x4b8   :  { %4689 = vmatpush3.bf16.msra.mxu1 %v8209_v39 }
 0x4b9   :  { %4694 = vmatprep.subr.bf16.mxu1 %v5157_v53  ;;  %3198 = vmatmul.mubr.bf16.vlgmr.msra.gmra.mrb[60].mxu0 %v3159_v42 }
 0x4ba   :  { %4393 = vmatpush3.bf16.msra.mxu0 %v8211_v37  ;;  %3308 = vmatprep.mubr.bf16.mxu0 %v3250_v55  ;;  %v8252_v55 = vld [vmem:[#allocation207_spill] sm:$0xff]  ;;  %v3359_v37 = vld [vmem:[#allocation5 + $0x40] sm:$0xc] }
 0x4bb   :  { %4691 = vmatmul.mubr.bf16.vlgmr.msra.gmra.mrb[8].mxu1 %v3161_v45  ;;  %4394 = vmatprep.subr.bf16.mxu0 %v8213_v63  ;;  %v3357_v45 = vld [vmem:[#allocation5 + $0x30] sm:$0xc] }
 0x4bc   :  { %4695 = vmatpush3.bf16.msra.mxu1 %v8212_v52  ;;  %4710 = vmatprep.mubr.msk.bf16.mxu1 %vm5158_vm10, %v5157_v53  ;;  %v3360_v63 = vpack.c.bf16 %v3357_v45, %v3357_v45  ;;  %v8288_v45 = vld [vmem:[#allocation251_spill] sm:$0xff] }
 0x4bd   :  { %4696 = vmatprep.subr.bf16.mxu1 %v5157_v53 }
 0x4be   :  { %4395 = vmatpush3.bf16.msra.mxu0 %v8214_v44  ;;  %v3478_v44 = vld [vmem:[#allocation5 + $0x38] sm:$0x30] }
 0x4bf   :  { %4396 = vmatprep.subr.bf16.mxu0 %v8216_v38  ;;  %v3362_v38 = vpack.c.bf16 %v3359_v37, %v3359_v37  ;;  %v8292_v37 = vld [vmem:[#allocation244_spill] sm:$0xff] }
 0x4c0   :  { %4697 = vmatpush3.bf16.msra.mxu1 %v8215_v28  ;;  %v8253_v28 = vld [vmem:[#allocation199_spill] sm:$0xff] }
 0x4c1   :  { %4698 = vmatprep.subr.bf16.mxu1 %v5157_v53 }
 0x4c2   :  { %4397 = vmatpush3.bf16.msra.mxu0 %v8217_v36  ;;  %v8254_v36 = vld [vmem:[#allocation215_spill] sm:$0xff] }
 0x4c3   :  { %4398 = vmatprep.subr.bf16.mxu0 %v8219_v57  ;;  %v3481_v57 = vpack.c.bf16 %v3478_v44, %v3478_v44  ;;  %v8295_v44 = vld [vmem:[#allocation245_spill] sm:$0xff] }
 0x4c4   :  { %4699 = vmatpush3.bf16.msra.mxu1 %v8218_v59  ;;  %v8255_v59 = vld [vmem:[#allocation208_spill] sm:$0xff] }
 0x4c5   :  { %4700 = vmatprep.subr.bf16.mxu1 %v5157_v53 }
 0x4c6   :  { %4399 = vmatpush3.bf16.msra.mxu0 %v8220_v47  ;;  %v3390_v47 = vrot.slane %v3360_v63, 1  ;;  %v8294_v63 = vld [vmem:[#allocation253_spill] sm:$0xff] }
 0x4c7   :  { %4400 = vmatprep.subr.bf16.mxu0 %v8222_v30  ;;  %v3392_v30 = vrot.slane %v3362_v38, 1  ;;  %v8297_v38 = vld [vmem:[#allocation254_spill] sm:$0xff] }
 0x4c8   :  { %4701 = vmatpush3.bf16.msra.mxu1 %v8221_v29  ;;  %v8256_v29 = vld [vmem:[#allocation200_spill] sm:$0xff] }
 0x4c9   :  { %4702 = vmatprep.subr.bf16.mxu1 %v5157_v53 }
 0x4ca   :  { %4401 = vmatpush3.bf16.msra.mxu0 %v8223_v56  ;;  %v8257_v56 = vld [vmem:[#allocation216_spill] sm:$0xff] }
 0x4cb   :  { %4402 = vmatprep.subr.bf16.mxu0 %v8225_v51  ;;  %v8259_v51 = vld [vmem:[#allocation217_spill] sm:$0xff] }
 0x4cc   :  { %4703 = vmatpush3.bf16.msra.mxu1 %v8224_v61  ;;  %v4191_v62 = vpop.f32.mrb[36].mxu0  ;;  %v3511_v61 = vrot.slane %v3481_v57, 2 }
 0x4cd   :  { %4704 = vmatprep.subr.bf16.mxu1 %v5157_v53  ;;  %v4192_v46 = vpop.f32.mrb[37].mxu0 }
 0x4ce   :  { %v4193_v31 = vadd.f32 %v4192_v46, %v4191_v62  ;;  %v4194_v58 = vpop.f32.mrb[38].mxu0  ;;  %4403 = vmatpush3.bf16.msra.mxu0 %v8226_v48  ;;  %v8260_v62 = vld [vmem:[#allocation233_spill] sm:$0xff]  ;;  %v8261_v46 = vld [vmem:[#allocation226_spill] sm:$0xff]  ;;  %v8265_v48 = vld [vmem:[#allocation219_spill] sm:$0xff] }
 0x4cf   :  { %v4195_v0 = vpop.f32.mrb[39].mxu0  ;;  %4404 = vmatprep.subr.bf16.mxu0 %v8228_v1  ;;  %v8264_v58 = vld [vmem:[#allocation227_spill] sm:$0xff]  ;;  %v8268_v1 = vld [vmem:[#allocation220_spill] sm:$0xff] }
 0x4d0   :  { %4705 = vmatpush3.bf16.msra.mxu1 %v8227_v8  ;;  %v4843_v2 = vadd.f32 %v4842_v54, %v4193_v31  ;;  %v8262_v54 = vld [vmem:[#allocation218_spill] sm:$0xff]  ;;  %v8266_v0 = vld [vmem:[#allocation235_spill] sm:$0xff]  ;;  %v8267_v8 = vld [vmem:[#allocation228_spill] sm:$0xff] }
 0x4d1   :  { %4706 = vmatprep.subr.bf16.mxu1 %v5157_v53  ;;  %v8263_v31 = vld [vmem:[#allocation234_spill] sm:$0xff] }
 0x4d2   :  { %4405 = vmatpush3.bf16.msra.mxu0 %v8229_v4  ;;  %v8271_v4 = vld [vmem:[#allocation221_spill] sm:$0xff] }
 0x4d3   :  { %4406 = vmatprep.subr.bf16.mxu0 %v8231_v6 }
 0x4d4   :  { %4707 = vmatpush3.bf16.msra.mxu1 %v8230_v5  ;;  %v8273_v5 = vld [vmem:[#allocation230_spill] sm:$0xff] }
 0x4d5   :  { %4708 = vmatprep.subr.bf16.mxu1 %v5157_v53 }
 0x4d6   :  { %4407 = vmatpush3.bf16.msra.mxu0 %v8232_v12  ;;  %v8274_v12 = vld [vmem:[#allocation222_spill] sm:$0xff] }
 0x4d7   :  { %4423 = vmatprep.subr.bf16.mxu0 %v8234_v15  ;;  %v8275_v15 = vld [vmem:[#allocation238_spill] sm:$0xff] }
 0x4d8   :  { %4709 = vmatpush3.bf16.msra.mxu1 %v8233_v14 }
 0x4d9   :  { %4714 = vmatprep.subr.bf16.mxu1 %v5157_v53  ;;  %3309 = vmatmul.mubr.bf16.vlgmr.msra.gmra.mrb[64].mxu0 %v3249_v11 }
 0x4da   :  { %4424 = vmatpush3.bf16.msra.mxu0 %v8235_v17  ;;  %3428 = vmatprep.mubr.bf16.mxu0 %v3391_v16  ;;  %v8276_v16 = vld [vmem:[#allocation231_spill] sm:$0xff]  ;;  %v3479_v17 = vld [vmem:[#allocation5 + $0x40] sm:$0x30] }
 0x4db   :  { %4711 = vmatmul.mubr.bf16.vlgmr.msra.gmra.mrb[8].mxu1 %v3251_v13  ;;  %4425 = vmatprep.subr.bf16.mxu0 %v8237_v19  ;;  %v3477_v13 = vld [vmem:[#allocation5 + $0x30] sm:$0x30] }
 0x4dc   :  { %4715 = vmatpush3.bf16.msra.mxu1 %v8236_v18  ;;  %4730 = vmatprep.mubr.msk.bf16.mxu1 %vm5158_vm10, %v5157_v53  ;;  %v3480_v19 = vpack.c.bf16 %v3477_v13, %v3477_v13 }
 0x4dd   :  { %4716 = vmatprep.subr.bf16.mxu1 %v5157_v53 }
 0x4de   :  { %4426 = vmatpush3.bf16.msra.mxu0 %v8238_v20  ;;  %v3598_v20 = vld [vmem:[#allocation5 + $0x38] sm:$0xc0] }
 0x4df   :  { %4427 = vmatprep.subr.bf16.mxu0 %v8240_v22  ;;  %v3482_v22 = vpack.c.bf16 %v3479_v17, %v3479_v17  ;;  %v3719_v17 = vld [vmem:[%s7793_s7 + $0x8] sm:$0xff] }
 0x4e0   :  { %4717 = vmatpush3.bf16.msra.mxu1 %v8239_v21  ;;  %v8277_v21 = vld [vmem:[#allocation223_spill] sm:$0xff] }
 0x4e1   :  { %4718 = vmatprep.subr.bf16.mxu1 %v5157_v53 }
 0x4e2   :  { %4428 = vmatpush3.bf16.msra.mxu0 %v8241_v23  ;;  %v8278_v23 = vld [vmem:[#allocation239_spill] sm:$0xff] }
 0x4e3   :  { %4429 = vmatprep.subr.bf16.mxu0 %v8243_v25  ;;  %v3601_v25 = vpack.c.bf16 %v3598_v20, %v3598_v20 }
 0x4e4   :  { %4719 = vmatpush3.bf16.msra.mxu1 %v8242_v24  ;;  %v8279_v24 = vld [vmem:[#allocation232_spill] sm:$0xff] }
 0x4e5   :  { %4720 = vmatprep.subr.bf16.mxu1 %v5157_v53 }
 0x4e6   :  { %4430 = vmatpush3.bf16.msra.mxu0 %v8244_v26  ;;  %v3510_v26 = vrot.slane %v3480_v19, 2  ;;  %v5159_v19 = vmov 0.0|0.0  }
 0x4e7   :  { %4431 = vmatprep.subr.bf16.mxu0 %v8246_v32  ;;  %v3512_v32 = vrot.slane %v3482_v22, 2 }
 0x4e8   :  { %4721 = vmatpush3.bf16.msra.mxu1 %v8245_v27  ;;  %v8280_v27 = vld [vmem:[#allocation224_spill] sm:$0xff] }
 0x4e9   :  { %4722 = vmatprep.subr.bf16.mxu1 %v5157_v53 }
 0x4ea   :  { %4432 = vmatpush3.bf16.msra.mxu0 %v8247_v33  ;;  %v8281_v33 = vld [vmem:[#allocation240_spill] sm:$0xff] }
 0x4eb   :  { %4433 = vmatprep.subr.bf16.mxu0 %v8249_v35  ;;  %v3631_v35 = vrot.slane %v3601_v25, 3  ;;  %v3723_v25 = vld [vmem:[%s7793_s7 + $0x28] sm:$0xff] }
 0x4ec   :  { %4723 = vmatpush3.bf16.msra.mxu1 %v8248_v34  ;;  %v4222_v40 = vpop.f32.mrb[40].mxu0  ;;  %v8282_v34 = vld [vmem:[#allocation249_spill] sm:$0xff] }
 0x4ed   :  { %4724 = vmatprep.subr.bf16.mxu1 %v5157_v53  ;;  %v4223_v41 = vpop.f32.mrb[41].mxu0 }
 0x4ee   :  { %v4224_v42 = vadd.f32 %v4223_v41, %v4222_v40  ;;  %v4225_v43 = vpop.f32.mrb[42].mxu0  ;;  %4434 = vmatpush3.bf16.msra.mxu0 %v8250_v60  ;;  %v8283_v40 = vld [vmem:[#allocation241_spill] sm:$0xff]  ;;  %v8287_v60 = vld [vmem:[#allocation258_spill] sm:$0xff] }
 0x4ef   :  { %v4226_v39 = vpop.f32.mrb[43].mxu0  ;;  %4435 = vmatprep.subr.bf16.mxu0 %v8252_v55  ;;  %v8284_v41 = vld [vmem:[#allocation257_spill] sm:$0xff]  ;;  %v8286_v43 = vld [vmem:[#allocation242_spill] sm:$0xff]  ;;  %v8291_v55 = vld [vmem:[#allocation252_spill] sm:$0xff] }
 0x4f0   :  { %4725 = vmatpush3.bf16.msra.mxu1 %v8251_v49  ;;  %v4844_v52 = vadd.f32 %v4843_v2, %v4224_v42  ;;  %v8269_v2 = vld [vmem:[#allocation236_spill] sm:$0xff]  ;;  %v8285_v42 = vld [vmem:[#allocation250_spill] sm:$0xff]  ;;  %v8289_v39 = vld [vmem:[#allocation243_spill] sm:$0xff] }
 0x4f1   :  { %4726 = vmatprep.subr.bf16.mxu1 %v5157_v53  ;;  %v8290_v49 = vld [vmem:[#allocation259_spill] sm:$0xff] }
 0x4f2   :  { %4436 = vmatpush3.bf16.msra.mxu0 %v8253_v28  ;;  %v8296_v28 = vld [vmem:[#allocation261_spill] sm:$0xff] }
 0x4f3   :  { %4437 = vmatprep.subr.bf16.mxu0 %v8255_v59 }
 0x4f4   :  { %4727 = vmatpush3.bf16.msra.mxu1 %v8254_v36 }
 0x4f5   :  { %4728 = vmatprep.subr.bf16.mxu1 %v5157_v53 }
 0x4f6   :  { %4438 = vmatpush3.bf16.msra.mxu0 %v8256_v29  ;;  %v8298_v29 = vld [vmem:[#allocation246_spill] sm:$0xff] }
 0x4f7   :  { %4454 = vmatprep.subr.bf16.mxu0 %v8258_v50  ;;  %v8299_v50 = vld [vmem:[#allocation262_spill] sm:$0xff] }
 0x4f8   :  { %4729 = vmatpush3.bf16.msra.mxu1 %v8257_v56 }
 0x4f9   :  { %4734 = vmatprep.subr.bf16.mxu1 %v5157_v53  ;;  %3429 = vmatmul.mubr.bf16.vlgmr.msra.gmra.mrb[68].mxu0 %v3390_v47 }
 0x4fa   :  { %4455 = vmatpush3.bf16.msra.mxu0 %v8259_v51  ;;  %3548 = vmatprep.mubr.bf16.mxu0 %v3511_v61  ;;  %v8300_v61 = vld [vmem:[#allocation255_spill] sm:$0xff]  ;;  %v3599_v51 = vld [vmem:[#allocation5 + $0x40] sm:$0xc0] }
 0x4fb   :  { %4731 = vmatmul.mubr.bf16.vlgmr.msra.gmra.mrb[8].mxu1 %v3392_v30  ;;  %4456 = vmatprep.subr.bf16.mxu0 %v8261_v46  ;;  %v3597_v30 = vld [vmem:[#allocation5 + $0x30] sm:$0xc0] }
 0x4fc   :  { %4735 = vmatpush3.bf16.msra.mxu1 %v8260_v62  ;;  %4750 = vmatprep.mubr.msk.bf16.mxu1 %vm5158_vm10, %v5157_v53  ;;  %v3600_v46 = vpack.c.bf16 %v3597_v30, %v3597_v30 }
 0x4fd   :  { %4736 = vmatprep.subr.bf16.mxu1 %v5157_v53 }
 0x4fe   :  { %4457 = vmatpush3.bf16.msra.mxu0 %v8262_v54  ;;  %v8301_v54 = vld [vmem:[#allocation247_spill] sm:$0xff] }
 0x4ff   :  { %4458 = vmatprep.subr.bf16.mxu0 %v8264_v58  ;;  %v8302_v58 = vld [vmem:[#allocation263_spill] sm:$0xff] }
 0x500   :  { %4737 = vmatpush3.bf16.msra.mxu1 %v8263_v31  ;;  %v3602_v31 = vpack.c.bf16 %v3599_v51, %v3599_v51 }
 0x501   :  { %4738 = vmatprep.subr.bf16.mxu1 %v5157_v53 }
 0x502   :  { %4459 = vmatpush3.bf16.msra.mxu0 %v8265_v48  ;;  %v8303_v48 = vld [vmem:[#allocation256_spill] sm:$0xff] }
 0x503   :  { %4460 = vmatprep.subr.bf16.mxu0 %v8267_v8  ;;  %v8304_v8 = vld [vmem:[#allocation248_spill] sm:$0xff] }
 0x504   :  { %4739 = vmatpush3.bf16.msra.mxu1 %v8266_v0  ;;  %v3630_v0 = vrot.slane %v3600_v46, 3 }
 0x505   :  { %4740 = vmatprep.subr.bf16.mxu1 %v5157_v53 }
 0x506   :  { %4461 = vmatpush3.bf16.msra.mxu0 %v8268_v1  ;;  %v3632_v1 = vrot.slane %v3602_v31, 3 }
 0x507   :  { %4462 = vmatprep.subr.bf16.mxu0 %v8270_v3 }
 0x508   :  { %4741 = vmatpush3.bf16.msra.mxu1 %v8269_v2  ;;  %v8305_v2 = vld [vmem:[#allocation264_spill] sm:$0xff] }
 0x509   :  { %4742 = vmatprep.subr.bf16.mxu1 %v5157_v53 }
 0x50a   :  { %4463 = vmatpush3.bf16.msra.mxu0 %v8271_v4 }
 0x50b   :  { %4464 = vmatprep.subr.bf16.mxu0 %v8273_v5 }
 0x50c   :  { %4743 = vmatpush3.bf16.msra.mxu1 %v8272_v9  ;;  %v4253_v6 = vpop.f32.mrb[44].mxu0 }
 0x50d   :  { %4744 = vmatprep.subr.bf16.mxu1 %v5157_v53  ;;  %v4254_v7 = vpop.f32.mrb[45].mxu0 }
 0x50e   :  { %v4255_v10 = vadd.f32 %v4254_v7, %v4253_v6  ;;  %v4256_v11 = vpop.f32.mrb[46].mxu0  ;;  %4465 = vmatpush3.bf16.msra.mxu0 %v8274_v12 }
 0x50f   :  { %v4257_v14 = vpop.f32.mrb[47].mxu0  ;;  %4466 = vmatprep.subr.bf16.mxu0 %v8276_v16  ;;  %v3718_v16 = vld [vmem:[%s7793_s7] sm:$0xff] }
 0x510   :  { %4745 = vmatpush3.bf16.msra.mxu1 %v8275_v15  ;;  %v4845_v18 = vadd.f32 %v4844_v52, %v4255_v10  ;;  %v8293_v52 = vld [vmem:[#allocation260_spill] sm:$0xff]  ;;  %v4813_v20 = vpack.c.bf16 %v3719_v17, %v3718_v16 }
 0x511   :  { %4746 = vmatprep.subr.bf16.mxu1 %v5157_v53 }
 0x512   :  { %4467 = vmatpush3.bf16.msra.mxu0 %v8277_v21  ;;  %v3721_v21 = vld [vmem:[%s7793_s7 + $0x18] sm:$0xff] }
 0x513   :  { %4468 = vmatprep.subr.bf16.mxu0 %v8279_v24  ;;  %v3722_v24 = vld [vmem:[%s7793_s7 + $0x20] sm:$0xff] }
 0x514   :  { %4747 = vmatpush3.bf16.msra.mxu1 %v8278_v23 }
 0x515   :  { %4748 = vmatprep.subr.bf16.mxu1 %v5157_v53 }
 0x516   :  { %4469 = vmatpush3.bf16.msra.mxu0 %v8280_v27  ;;  %v4819_v27 = vpack.c.bf16 %v3723_v25, %v3722_v24 }
 0x517   :  { %4485 = vmatprep.subr.bf16.mxu0 %v8282_v34 }
 0x518   :  { %4749 = vmatpush3.bf16.msra.mxu1 %v8281_v33 }
 0x519   :  { %4754 = vmatprep.subr.bf16.mxu1 %v5157_v53  ;;  %3549 = vmatmul.mubr.bf16.vlgmr.msra.gmra.mrb[72].mxu0 %v3510_v26 }
 0x51a   :  { %4486 = vmatpush3.bf16.msra.mxu0 %v8283_v40  ;;  %3668 = vmatprep.mubr.bf16.mxu0 %v3631_v35  ;;  %v3724_v40 = vld [vmem:[%s7793_s7 + $0x30] sm:$0xff] }
 0x51b   :  { %4751 = vmatmul.mubr.bf16.vlgmr.msra.gmra.mrb[8].mxu1 %v3512_v32  ;;  %4487 = vmatprep.subr.bf16.mxu0 %v8285_v42 }
 0x51c   :  { %4755 = vmatpush3.bf16.msra.mxu1 %v8284_v41  ;;  %4770 = vmatprep.mubr.msk.bf16.mxu1 %vm5158_vm10, %v5157_v53  ;;  %v3725_v41 = vld [vmem:[%s7793_s7 + $0x38] sm:$0xff] }
 0x51d   :  { %4756 = vmatprep.subr.bf16.mxu1 %v5157_v53  ;;  %v4822_v42 = vpack.c.bf16 %v3725_v41, %v3724_v40 }
 0x51e   :  { %4488 = vmatpush3.bf16.msra.mxu0 %v8286_v43 }
 0x51f   :  { %4489 = vmatprep.subr.bf16.mxu0 %v8288_v45 }
 0x520   :  { %4757 = vmatpush3.bf16.msra.mxu1 %v8287_v60 }
 0x521   :  { %4758 = vmatprep.subr.bf16.mxu1 %v5157_v53 }
 0x522   :  { %4490 = vmatpush3.bf16.msra.mxu0 %v8289_v39 }
 0x523   :  { %4491 = vmatprep.subr.bf16.mxu0 %v8291_v55 }
 0x524   :  { %4759 = vmatpush3.bf16.msra.mxu1 %v8290_v49 }
 0x525   :  { %4760 = vmatprep.subr.bf16.mxu1 %v5157_v53 }
 0x526   :  { %4492 = vmatpush3.bf16.msra.mxu0 %v8292_v37 }
 0x527   :  { %4493 = vmatprep.subr.bf16.mxu0 %v8294_v63 }
 0x528   :  { %4761 = vmatpush3.bf16.msra.mxu1 %v8293_v52 }
 0x529   :  { %4762 = vmatprep.subr.bf16.mxu1 %v5157_v53 }
 0x52a   :  { %4494 = vmatpush3.bf16.msra.mxu0 %v8295_v44 }
 0x52b   :  { %4495 = vmatprep.subr.bf16.mxu0 %v8297_v38 }
 0x52c   :  { %4763 = vmatpush3.bf16.msra.mxu1 %v8296_v28  ;;  %v4284_v36 = vpop.f32.mrb[48].mxu0 }
 0x52d   :  { %4764 = vmatprep.subr.bf16.mxu1 %v5157_v53  ;;  %v4285_v59 = vpop.f32.mrb[49].mxu0 }
 0x52e   :  { %v4286_v57 = vadd.f32 %v4285_v59, %v4284_v36  ;;  %v4287_v47 = vpop.f32.mrb[50].mxu0  ;;  %4496 = vmatpush3.bf16.msra.mxu0 %v8298_v29 }
 0x52f   :  { %v4288_v56 = vpop.f32.mrb[51].mxu0  ;;  %4497 = vmatprep.subr.bf16.mxu0 %v8300_v61 }
 0x530   :  { %4765 = vmatpush3.bf16.msra.mxu1 %v8299_v50  ;;  %v4846_v62 = vadd.f32 %v4845_v18, %v4286_v57  ;;  %v3720_v18 = vld [vmem:[%s7793_s7 + $0x10] sm:$0xff] }
 0x531   :  { %4766 = vmatprep.subr.bf16.mxu1 %v5157_v53  ;;  %v4816_v22 = vpack.c.bf16 %v3721_v21, %v3720_v18  ;;  %v4085_v18 = vld [vmem:[%s7796_s10] ss:$0 sm:$0xff] }
 0x532   :  { %4498 = vmatpush3.bf16.msra.mxu0 %v8301_v54 }
 0x533   :  { %4499 = vmatprep.subr.bf16.mxu0 %v8303_v48 }
 0x534   :  { %4767 = vmatpush3.bf16.msra.mxu1 %v8302_v58 }
 0x535   :  { %4768 = vmatprep.subr.bf16.mxu1 %v5157_v53 }
 0x536   :  { %4500 = vmatpush3.bf16.msra.mxu0 %v8304_v8  ;;  %v3808_v8 = vld [vmem:[%s7795_s9 + $0x8] sm:$0xff] }
 0x537   :  { %4812 = vmatprep.subr.bf16.mxu0 %v5159_v19 }
 0x538   :  { %4769 = vmatpush3.bf16.msra.mxu1 %v8305_v2 }
 0x539   :  { %3669 = vmatmul.mubr.bf16.vlgmr.msra.gmra.mrb[76].mxu0 %v3630_v0  ;;  %v3807_v0 = vld [vmem:[%s7795_s9] sm:$0xff] }
 0x53a   :  { %4790 = vmatprep.mubr.msk.f32.mxu0 %vm5158_vm10, %v5157_v53  ;;  %4814 = vmatpush3.bf16.msra.mxu0 %v4813_v20  ;;  %v4825_v2 = vpack.c.bf16 %v3808_v8, %v3807_v0 }
 0x53b   :  { %4771 = vmatmul.mubr.bf16.vlgmr.msra.gmra.mrb[8].mxu1 %v3632_v1  ;;  %4815 = vmatprep.subr.bf16.mxu0 %v5159_v19 }
 0x53e   :  { %4817 = vmatpush3.bf16.msra.mxu0 %v4816_v22 }
 0x53f   :  { %4818 = vmatprep.subr.bf16.mxu0 %v5159_v19 }
 0x542   :  { %4820 = vmatpush3.bf16.msra.mxu0 %v4819_v27 }
 0x543   :  { %4821 = vmatprep.subr.bf16.mxu0 %v5159_v19 }
 0x546   :  { %4823 = vmatpush3.bf16.msra.mxu0 %v4822_v42 }
 0x547   :  { %4824 = vmatprep.subr.bf16.mxu0 %v5159_v19 }
 0x54c   :  { %v4315_v3 = vpop.f32.mrb[52].mxu0 }
 0x54d   :  { %v4316_v4 = vpop.f32.mrb[53].mxu0 }
 0x54e   :  { %v4317_v9 = vadd.f32 %v4316_v4, %v4315_v3  ;;  %v4318_v5 = vpop.f32.mrb[54].mxu0  ;;  %v3809_v4 = vld [vmem:[%s7795_s9 + $0x10] sm:$0xff] }
 0x54f   :  { %v4319_v6 = vpop.f32.mrb[55].mxu0 }
 0x550   :  { %v4847_v7 = vadd.f32 %v4846_v62, %v4317_v9  ;;  %v3810_v9 = vld [vmem:[%s7795_s9 + $0x18] sm:$0xff]  ;;  %v3811_v6 = vld [vmem:[%s7795_s9 + $0x20] sm:$0xff] }
 0x551   :  { %v4828_v5 = vpack.c.bf16 %v3810_v9, %v3809_v4 }
 0x56c   :  { %v4346_v10 = vpop.f32.mrb[56].mxu0 }
 0x56d   :  { %v4347_v11 = vpop.f32.mrb[57].mxu0 }
 0x56e   :  { %v4348_v12 = vadd.f32 %v4347_v11, %v4346_v10  ;;  %v4349_v13 = vpop.f32.mrb[58].mxu0  ;;  %v3814_v11 = vld [vmem:[%s7795_s9 + $0x38] sm:$0xff] }
 0x56f   :  { %v4350_v14 = vpop.f32.mrb[59].mxu0  ;;  %v4083_v13 = vld [vmem:[%s7794_s8] ss:$0 sm:$0xff] }
 0x570   :  { %v4848_v15 = vadd.f32 %v4847_v7, %v4348_v12  ;;  %v3812_v7 = vld [vmem:[%s7795_s9 + $0x28] sm:$0xff] }
 0x571   :  { %v4831_v10 = vpack.c.bf16 %v3812_v7, %v3811_v6 }
 0x58c   :  { %v4377_v23 = vpop.f32.mrb[60].mxu0 }
 0x58d   :  { %v4378_v26 = vpop.f32.mrb[61].mxu0 }
 0x58e   :  { %v4379_v32 = vadd.f32 %v4378_v26, %v4377_v23  ;;  %v4380_v33 = vpop.f32.mrb[62].mxu0 }
 0x58f   :  { %v4381_v34 = vpop.f32.mrb[63].mxu0 }
 0x590   :  { %v4849_v35 = vadd.f32 %v4848_v15, %v4379_v32 }
 0x5ac   :  { %v4408_v43 = vpop.f32.mrb[64].mxu0 }
 0x5ad   :  { %v4409_v60 = vpop.f32.mrb[65].mxu0 }
 0x5ae   :  { %v4410_v45 = vadd.f32 %v4409_v60, %v4408_v43  ;;  %v4411_v39 = vpop.f32.mrb[66].mxu0 }
 0x5af   :  { %v4412_v49 = vpop.f32.mrb[67].mxu0 }
 0x5b0   :  { %v4850_v55 = vadd.f32 %v4849_v35, %v4410_v45 }
 0x5cc   :  { %v4439_v37 = vpop.f32.mrb[68].mxu0 }
 0x5cd   :  { %v4440_v52 = vpop.f32.mrb[69].mxu0 }
 0x5ce   :  { %v4441_v63 = vadd.f32 %v4440_v52, %v4439_v37  ;;  %v4442_v44 = vpop.f32.mrb[70].mxu0 }
 0x5cf   :  { %v4443_v28 = vpop.f32.mrb[71].mxu0 }
 0x5d0   :  { %v4851_v38 = vadd.f32 %v4850_v55, %v4441_v63 }
 0x5ec   :  { %v4470_v36 = vpop.f32.mrb[72].mxu0 }
 0x5ed   :  { %v4471_v59 = vpop.f32.mrb[73].mxu0 }
 0x5ee   :  { %v4472_v57 = vadd.f32 %v4471_v59, %v4470_v36  ;;  %v4473_v47 = vpop.f32.mrb[74].mxu0 }
 0x5ef   :  { %v4474_v29 = vpop.f32.mrb[75].mxu0 }
 0x5f0   :  { %v4852_v30 = vadd.f32 %v4851_v38, %v4472_v57 }
 0x60c   :  { %v4501_v56 = vpop.f32.mrb[76].mxu0 }
 0x60d   :  { %v4502_v50 = vpop.f32.mrb[77].mxu0 }
 0x60e   :  { %v3710_v61 = vpop.f32.mrb[8].mxu1  ;;  %v4503_v51 = vadd.f32 %v4502_v50, %v4501_v56  ;;  %v4504_v62 = vpop.f32.mrb[78].mxu0 }
 0x60f   :  { %v4772_v46 = vpop.f32.mrb[9].mxu1  ;;  %v4505_v54 = vpop.f32.mrb[79].mxu0 }
 0x610   :  { %v3713_v31 = vpop.f32.mrb[10].mxu1  ;;  %v4853_v58 = vadd.f32 %v4852_v30, %v4503_v51 }
 0x611   :  { %v4773_v48 = vpop.f32.mrb[11].mxu1 }
 0x612   :  { %v4854_v1 = vadd.f32 %v4853_v58, %v3710_v61 }
 0x614   :  { %v3717_v3 = vmax.f32 %v4854_v1, 0.0 }
 0x616   :  { %4791 = vmatmul.mubr.msk.f32.vlgmr.msra.gmra.mrb[80].mxu0 %vm658_vm0, %v3717_v3 }
 0x617   :  { %4826 = vmatpush3.bf16.msra.mxu0 %v4825_v2  ;;  %4809 = vmatprep.mubr.msk.f32.mxu0 %vm5158_vm10, %v5157_v53  ;;  %v3813_v53 = vld [vmem:[%s7795_s9 + $0x30] sm:$0xff]  ;;  %s5160_s9 = smov [#allocation8]  }
 0x618   :  { %4827 = vmatprep.subr.bf16.mxu0 %v5159_v19  ;;  %v4834_v12 = vpack.c.bf16 %v3814_v11, %v3813_v53  ;;  %s3904_s14 = sshll.u32 %s5160_s9, 4  ;;  %s3905_s14 = int_to_ptr.vmem [resolvable:$true] %s3904_s14 }
 0x619   :  { %s5128_s8 = scalar_lea.vmem %s3905_s14, 32  ;;  %p5133_p1 = scmp.lt.s32.totalorder %s3905_s14, %s3905_s14 }
 0x61a   :  { %p5129_p0 = scmp.ne.s32.totalorder %s3905_s14, %s5128_s8  ;;  %p5134_p2 = scmp.lt.s32.totalorder %s5128_s8, %s5128_s8 }
 0x61b   :  { %4829 = vmatpush3.bf16.msra.mxu0 %v4828_v5 }
 0x61c   :  { %4830 = vmatprep.subr.bf16.mxu0 %v5159_v19  ;;  %p5135_p3 = por %p5134_p2, %p5133_p1 }
 0x61e   :  { %p5136_p4 = pnand %p5135_p3, %p5129_p0 }
 0x61f   :  { %4832 = vmatpush3.bf16.msra.mxu0 %v4831_v10 }
 0x620   :  { %4833 = vmatprep.subr.bf16.mxu0 %v5159_v19 }
 0x623   :  { %4835 = vmatpush3.bf16.msra.mxu0 %v4834_v12 }
 0x6e9   :  { %v3802_v14 = vpop.f32.mrb[80].mxu0 }
 0x6ea   :  { %v3803_v15 = vadd.f32 %v4083_v13, %v3802_v14  ;;  %v4792_v16 = vpop.f32.mrb[81].mxu0 }
 0x6ec   :  { %v3806_v17 = vmax.f32 %v3803_v15, 0.0 }
 0x6ee   :  { %4810 = vmatmul.mubr.msk.f32.vlgmr.msra.gmra.mrb[82].mxu0 %vm658_vm0, %v3806_v17 }
 0x7c1   :  { %v3891_v19 = vpop.f32.mrb[82].mxu0 }
 0x7c2   :  { %v3892_v20 = vadd.f32 %v4085_v18, %v3891_v19  ;;  %v4811_v21 = vpop.f32.mrb[83].mxu0 }
 0x7c4   :  { %5126 = vtanh.f32 %v3892_v20 }
 0x7ce   :  { %v5127_v22 = vpop.eup %5126 }
 0x7cf   :  { %3897 = vst.msk [vmem:[#allocation8] sm:$0x3] %vm3896_vm11, %v5127_v22 }
 0x7d0   :  { %5139 = shalt.err (!%p5136_p4)
}
 0x7d1   :  { %s5140_s10 = scalar_lea.hbm %s7797_s11, 32 }
 0x7d2   :  { %p5141_p5 = scmp.ne.s32.totalorder %s7797_s11, %s5140_s10  ;;  %p5144_p6 = scmp.lt.u32.totalorder %s5140_s10, %s7797_s11 }
 0x7d4   :  { %p5146_p7 = pnand %p5144_p6, %p5141_p5 }
 0x7d6   :  { %5149 = shalt.err (!%p5146_p7)
}
 0x7d7   :  { %3907 = dma.vmem_to_hbm [thread:$0]  %s3905_s14, 32, %s7797_s11, [#allocation9]  }
 0x7d8   :  { %5152 = dma.done.wait [#allocation9], 32  }
 0x7d9   :  { %5153 = vsyncadd [#allocation9], 4294967264 }
 0x7da   :  { %3911 = vsyncpa [#allocation9], 1 }
 0x7db   :  { %3912 = vsyncmov [#allocation7] }
 0x7de   :  { %s3913_s20 = vpop.sfrf %3912 }
 0x7df   :  { %p4087_p8 = scmp.ne.s32.totalorder %s3913_s20, 0 }
 0x7e1   :  { %3917 = shalt.err (%p4087_p8)  }

</bundles_post_ra>
